<compile_context>
chip_gen: v5e
topology: v5e:2x2
jax: 0.10.0
libtpu: 0.0.40
codegen_flags: <defaults>
</compile_context>

<pallas_src>
import functools

import jax
import jax.numpy as jnp
from jax import lax
from jax.experimental import pallas as pl
from jax.experimental.pallas import tpu as pltpu

# ----------------------------- tiny CLIP config ------------------------------
B = 2            # batch
IMG = 16         # image spatial size
C_IN = 3         # image channels
PATCH = 8        # patch size (stride == kernel)
SEQ_T = 8        # text sequence length
VOCAB = 64       # text vocab size
D = 32           # hidden size (shared by both towers)
HEADS = 2        # attention heads
DH = D // HEADS  # head dim
FF = 64          # MLP intermediate size
LAYERS = 2       # encoder layers per tower
PROJ = 16        # projection dim
PROJ_PAD = 128   # lane-dense output width (proj weights zero-padded to 128 lanes)
EPS = 1e-5
NEG_INF = -1e9

NUM_PATCHES = (IMG // PATCH) ** 2
SEQ_V = NUM_PATCHES + 1  # + CLS token


# --------------------- shared math (kernel body AND reference) ----------------
# These helpers operate on objects supporting `[...]` / `[i, h]` indexing, so the same code is
# traced inside the Pallas kernel (Refs) and runs as the pure-JAX reference (arrays).
# `exact=False` selects the in-kernel approx-reciprocal softmax path.
def _ln(x, g, b):
    mu = jnp.mean(x, axis=-1, keepdims=True)
    xc = x - mu
    var = jnp.mean(xc * xc, axis=-1, keepdims=True)
    return xc * lax.rsqrt(var + EPS) * g + b


def _softmax_rows(s, exact):
    s = s - jnp.max(s, axis=-1, keepdims=True)
    p = jnp.exp(s)
    denom = jnp.sum(p, axis=-1, keepdims=True)
    if exact:
        return p / denom
    return p * pl.reciprocal(denom, approx=True)


def _encoder_layer(x, attn_bias, lw, i, exact):
    """One CLIP encoder layer on flattened (B*S, D) tokens; batches separated by attn_bias."""
    h = _ln(x, lw["ln1_g"][i], lw["ln1_b"][i])
    attn = None
    for hd in range(HEADS):
        # per-head full-width matmuls (weights pre-split host-side; softmax scale folded into Q)
        q = jnp.dot(h, lw["q_w"][i, hd], preferred_element_type=jnp.float32) + lw["q_b"][i, hd]
        k = jnp.dot(h, lw["k_w"][i, hd], preferred_element_type=jnp.float32) + lw["k_b"][i, hd]
        v = jnp.dot(h, lw["v_w"][i, hd], preferred_element_type=jnp.float32) + lw["v_b"][i, hd]
        # q @ k^T without an explicit transpose: contract the head dim of both operands
        s = lax.dot_general(q, k, dimension_numbers=(((1,), (1,)), ((), ())),
                            preferred_element_type=jnp.float32)
        p = _softmax_rows(s + attn_bias, exact)
        ctx = jnp.dot(p, v, preferred_element_type=jnp.float32)
        part = jnp.dot(ctx, lw["o_w"][i, hd], preferred_element_type=jnp.float32)
        attn = part if attn is None else attn + part
    x = x + attn + lw["o_b"][i]

    h = _ln(x, lw["ln2_g"][i], lw["ln2_b"][i])
    m = jnp.dot(h, lw["fc1_w"][i], preferred_element_type=jnp.float32) + lw["fc1_b"][i]
    m = m * jax.nn.sigmoid(1.702 * m)  # quick-GELU (CLIP hidden_act)
    m = jnp.dot(m, lw["fc2_w"][i], preferred_element_type=jnp.float32) + lw["fc2_b"][i]
    return x + m


def _run_tower(x, tw, exact):
    attn_bias = tw["bias"][...]          # (N, N), loaded once, reused for all layers/heads
    for i in range(LAYERS):
        x = _encoder_layer(x, attn_bias, tw["layers"], i, exact)
    return x


def _head(pooled, tw):
    pooled = _ln(pooled, tw["fin_g"][...], tw["fin_b"][...])
    # proj_w is zero-padded to PROJ_PAD lanes host-side -> full-lane-width (unmasked) output store
    return jnp.dot(pooled, tw["proj_w"][...], preferred_element_type=jnp.float32)


def _vision_embed(v):
    # patch-embedding Conv2d(stride==kernel) as a matmul; CLS/pos rows pre-baked in emb_bias
    x = jnp.dot(v["patches"][...], v["patch_w"][...],
                preferred_element_type=jnp.float32) + v["emb_bias"][...]
    return _ln(x, v["pre_g"][...], v["pre_b"][...])


# ------------------------------ fused Pallas kernel ---------------------------
def _fused_kernel(treedef, n_in, eos_ref, *refs):
    # Single straight-line body: both towers are independent, so the scheduler is free to
    # interleave their ops (no pl.when / grid split on 1-TC parts).
    # TODO(synk): on v7x the two towers could be sharded across TensorCores with CORE_PARALLEL
    # semantics and per-tower BlockSpecs; omitted here since everything fits one core's VMEM.
    inputs = jax.tree_util.tree_unflatten(treedef, refs[:n_in])
    out_ref = refs[n_in]
    txt_scratch = refs[n_in + 1]
    v, t = inputs["v"], inputs["t"]

    # --- vision tower ---------------------------------------------------------
    xv = _vision_embed(v)
    xv = _run_tower(xv, v, exact=False)
    nb = xv.shape[0] // SEQ_V
    # CLS pooling: static row slices (no one-hot matmul)
    pooled_v = jnp.concatenate([xv[b * SEQ_V:b * SEQ_V + 1, :] for b in range(nb)], axis=0)
    out_ref[0] = _head(pooled_v, v)       # image_embeds (lane-padded)

    # --- text tower -----------------------------------------------------------
    xt = _run_tower(t["x0"][...], t, exact=False)
    # EOS pooling: dynamic row reads from a VMEM scratch using SMEM scalar indices
    txt_scratch[...] = xt
    pooled_t = jnp.concatenate(
        [txt_scratch[pl.ds(eos_ref[b], 1), :] for b in range(nb)], axis=0)
    out_ref[1] = _head(pooled_t, t)       # text_embeds (lane-padded)


def _zero_block_index(nd, i):
    return (0,) * nd


# ------------------------------ host-side glue --------------------------------
def _prepare_inputs(params, input_ids, pixel_values, attention_mask):
    """Embedding gathers, patch unfolding, masks, EOS row indices, padded proj weights."""
    vp, tp = params["vision"], params["text"]
    Bb = input_ids.shape[0]
    cpp = C_IN * PATCH * PATCH
    Hg = IMG // PATCH

    # vision: unfold pixels into patch rows, prepend a zero row per image for the CLS slot
    patches = pixel_values.reshape(Bb, C_IN, Hg, PATCH, Hg, PATCH)
    patches = patches.transpose(0, 2, 4, 1, 3, 5).reshape(Bb, NUM_PATCHES, cpp)
    patches = jnp.concatenate([jnp.zeros((Bb, 1, cpp), jnp.float32), patches], axis=1)
    patches = patches.reshape(Bb * SEQ_V, cpp)
    # rows added after the in-kernel patch matmul: CLS row = class_emb + pos[0], others = pos[1:]
    emb_rows = jnp.concatenate([vp["class_emb"] + vp["pos_emb"][:1], vp["pos_emb"][1:]], axis=0)
    emb_bias = jnp.tile(emb_rows, (Bb, 1))
    nv = Bb * SEQ_V
    rv = jnp.arange(nv)
    same_v = (rv[:, None] // SEQ_V) == (rv[None, :] // SEQ_V)
    bias_v = jnp.where(same_v, 0.0, NEG_INF).astype(jnp.float32)          # block-diag batch mask

    # text: token + position embeddings; block-diag + causal + padding mask; EOS row indices
    x0_t = (jnp.take(tp["tok_emb"], input_ids, axis=0) + tp["pos_emb"][None, :]).reshape(
        Bb * SEQ_T, D)
    nt = Bb * SEQ_T
    rt = jnp.arange(nt)
    rb, rp = rt // SEQ_T, rt % SEQ_T
    allowed = ((rb[:, None] == rb[None, :])
               & (rp[None, :] <= rp[:, None])
               & (attention_mask.reshape(-1)[None, :] > 0))
    bias_t = jnp.where(allowed, 0.0, NEG_INF).astype(jnp.float32)
    # TODO(synk): EOS pooling via argmax(input_ids) assumes the highest vocab id is the EOS token
    # (old HF CLIP convention); arbitrary tokenizers would need the real eos_token_id.
    eos_rows = (jnp.arange(Bb) * SEQ_T + jnp.argmax(input_ids, axis=-1)).astype(jnp.int32)

    def pad_proj(w):
        return jnp.zeros((D, PROJ_PAD), jnp.float32).at[:, :PROJ].set(w)

    inputs = {
        "v": {"patches": patches, "patch_w": vp["patch_w"], "emb_bias": emb_bias,
              "pre_g": vp["pre_ln_g"], "pre_b": vp["pre_ln_b"],
              "fin_g": vp["post_ln_g"], "fin_b": vp["post_ln_b"],
              "proj_w": pad_proj(params["visual_proj_w"]), "bias": bias_v,
              "layers": vp["layers"]},
        "t": {"x0": x0_t,
              "fin_g": tp["final_ln_g"], "fin_b": tp["final_ln_b"],
              "proj_w": pad_proj(params["text_proj_w"]), "bias": bias_t,
              "layers": tp["layers"]},
    }
    return inputs, eos_rows


@jax.jit
def clip_forward(params, input_ids, pixel_values, attention_mask):
    """Mirrors the wrapper forward: returns (text_embeds, image_embeds)."""
    Bb = input_ids.shape[0]
    inputs, eos_rows = _prepare_inputs(params, input_ids, pixel_values, attention_mask)
    flat, treedef = jax.tree_util.tree_flatten(inputs)
    in_specs = [pl.BlockSpec(memory_space=pltpu.MemorySpace.SMEM)] + [
        pl.BlockSpec(tuple(x.shape), functools.partial(_zero_block_index, x.ndim))
        for x in flat]
    embeds = pl.pallas_call(
        functools.partial(_fused_kernel, treedef, len(flat)),
        out_shape=jax.ShapeDtypeStruct((2, Bb, PROJ_PAD), jnp.float32),
        grid=(1,),                                   # single step: both towers straight-line
        in_specs=in_specs,                           # everything resident in VMEM, fetched once
        out_specs=pl.BlockSpec((2, Bb, PROJ_PAD), lambda i: (0, 0, 0)),
        scratch_shapes=[pltpu.VMEM((Bb * SEQ_T, D), jnp.float32)],
        compiler_params=pltpu.CompilerParams(dimension_semantics=("arbitrary",)),
    )(eos_rows, *flat)
    # TODO(synk): the wrapper's host-side input_names/use_cache dict bookkeeping has no
    # device-side equivalent.
    return embeds[1, :, :PROJ], embeds[0, :, :PROJ]   # (text_embeds, image_embeds)


def clip_forward_reference(params, input_ids, pixel_values, attention_mask):
    """Pure-JAX reference sharing the exact same math (exact reciprocal softmax)."""
    inputs, eos_rows = _prepare_inputs(params, input_ids, pixel_values, attention_mask)
    v, t = inputs["v"], inputs["t"]
    Bb = input_ids.shape[0]

    xv = _vision_embed(v)
    xv = _run_tower(xv, v, exact=True)
    pooled_v = xv[jnp.arange(Bb) * SEQ_V]
    image_embeds = _head(pooled_v, v)[:, :PROJ]

    xt = _run_tower(t["x0"][...], t, exact=True)
    pooled_t = jnp.take(xt, eos_rows, axis=0)
    text_embeds = _head(pooled_t, t)[:, :PROJ]
    return text_embeds, image_embeds


# --------------------------- deterministic params ----------------------------
def init_params(key):
    keys = iter(jax.random.split(key, 64))

    def dense(shape):
        return jax.random.normal(next(keys), shape, jnp.float32) * 0.02

    scale = DH ** -0.5

    def make_layers():
        return {
            "ln1_g": jnp.ones((LAYERS, 1, D), jnp.float32),
            "ln1_b": jnp.zeros((LAYERS, 1, D), jnp.float32),
            # per-head Q/K/V/O slabs; DH**-0.5 softmax scale folded into Q weights + bias
            "q_w": dense((LAYERS, HEADS, D, DH)) * scale,
            "q_b": jnp.zeros((LAYERS, HEADS, 1, DH), jnp.float32) * scale,
            "k_w": dense((LAYERS, HEADS, D, DH)),
            "k_b": jnp.zeros((LAYERS, HEADS, 1, DH), jnp.float32),
            "v_w": dense((LAYERS, HEADS, D, DH)),
            "v_b": jnp.zeros((LAYERS, HEADS, 1, DH), jnp.float32),
            "o_w": dense((LAYERS, HEADS, DH, D)),
            "o_b": jnp.zeros((LAYERS, 1, D), jnp.float32),
            "ln2_g": jnp.ones((LAYERS, 1, D), jnp.float32),
            "ln2_b": jnp.zeros((LAYERS, 1, D), jnp.float32),
            "fc1_w": dense((LAYERS, D, FF)),
            "fc1_b": jnp.zeros((LAYERS, 1, FF), jnp.float32),
            "fc2_w": dense((LAYERS, FF, D)),
            "fc2_b": jnp.zeros((LAYERS, 1, D), jnp.float32),
        }

    vision = {
        "patch_w": dense((C_IN * PATCH * PATCH, D)),   # Conv2d(C, D, P, P, bias=False) flattened
        "class_emb": dense((1, D)),
        "pos_emb": dense((SEQ_V, D)),
        "pre_ln_g": jnp.ones((1, D), jnp.float32), "pre_ln_b": jnp.zeros((1, D), jnp.float32),
        "post_ln_g": jnp.ones((1, D), jnp.float32), "post_ln_b": jnp.zeros((1, D), jnp.float32),
        "layers": make_layers(),
    }
    text = {
        "tok_emb": dense((VOCAB, D)),
        "pos_emb": dense((SEQ_T, D)),
        "final_ln_g": jnp.ones((1, D), jnp.float32), "final_ln_b": jnp.zeros((1, D), jnp.float32),
        "layers": make_layers(),
    }
    return {"vision": vision, "text": text,
            "visual_proj_w": dense((D, PROJ)),   # bias-free Linear
            "text_proj_w": dense((D, PROJ))}     # bias-free Linear


# ----------------------------------- main -------------------------------------
if __name__ == "__main__":
    root = jax.random.PRNGKey(0)
    pkey, ikey, xkey = jax.random.split(root, 3)

    params = init_params(pkey)
    input_ids = jax.random.randint(ikey, (B, SEQ_T), 0, VOCAB, dtype=jnp.int32)
    pixel_values = jax.random.normal(xkey, (B, C_IN, IMG, IMG), jnp.float32)  # NCHW
    attention_mask = jnp.array([[1] * SEQ_T, [1] * (SEQ_T - 2) + [0] * 2], dtype=jnp.int32)

    text_embeds, image_embeds = clip_forward(params, input_ids, pixel_values, attention_mask)
    jax.block_until_ready((text_embeds, image_embeds))

    assert text_embeds.shape == (B, PROJ), text_embeds.shape
    assert image_embeds.shape == (B, PROJ), image_embeds.shape
    assert bool(jnp.all(jnp.isfinite(text_embeds))) and bool(jnp.all(jnp.isfinite(image_embeds)))

    ref_text, ref_image = clip_forward_reference(params, input_ids, pixel_values, attention_mask)
    assert bool(jnp.allclose(text_embeds, ref_text, atol=1e-2, rtol=1e-2))
    assert bool(jnp.allclose(image_embeds, ref_image, atol=1e-2, rtol=1e-2))

    print("KERNEL_OK")
</pallas_src>

<mosaic_0001>
module attributes {stable_mosaic.version = 11 : i64} {
  func.func @_fused_kernel(%arg0: i32, %arg1: memref<2xi32, #tpu.memory_space<smem>>, %arg2: memref<16x16xf32, #tpu.memory_space<vmem>>, %arg3: memref<1x32xf32, #tpu.memory_space<vmem>>, %arg4: memref<1x32xf32, #tpu.memory_space<vmem>>, %arg5: memref<2x1x64xf32, #tpu.memory_space<vmem>>, %arg6: memref<2x32x64xf32, #tpu.memory_space<vmem>>, %arg7: memref<2x1x32xf32, #tpu.memory_space<vmem>>, %arg8: memref<2x64x32xf32, #tpu.memory_space<vmem>>, %arg9: memref<2x2x1x16xf32, #tpu.memory_space<vmem>>, %arg10: memref<2x2x32x16xf32, #tpu.memory_space<vmem>>, %arg11: memref<2x1x32xf32, #tpu.memory_space<vmem>>, %arg12: memref<2x1x32xf32, #tpu.memory_space<vmem>>, %arg13: memref<2x1x32xf32, #tpu.memory_space<vmem>>, %arg14: memref<2x1x32xf32, #tpu.memory_space<vmem>>, %arg15: memref<2x1x32xf32, #tpu.memory_space<vmem>>, %arg16: memref<2x2x16x32xf32, #tpu.memory_space<vmem>>, %arg17: memref<2x2x1x16xf32, #tpu.memory_space<vmem>>, %arg18: memref<2x2x32x16xf32, #tpu.memory_space<vmem>>, %arg19: memref<2x2x1x16xf32, #tpu.memory_space<vmem>>, %arg20: memref<2x2x32x16xf32, #tpu.memory_space<vmem>>, %arg21: memref<32x128xf32, #tpu.memory_space<vmem>>, %arg22: memref<16x32xf32, #tpu.memory_space<vmem>>, %arg23: memref<10x10xf32, #tpu.memory_space<vmem>>, %arg24: memref<10x32xf32, #tpu.memory_space<vmem>>, %arg25: memref<1x32xf32, #tpu.memory_space<vmem>>, %arg26: memref<1x32xf32, #tpu.memory_space<vmem>>, %arg27: memref<2x1x64xf32, #tpu.memory_space<vmem>>, %arg28: memref<2x32x64xf32, #tpu.memory_space<vmem>>, %arg29: memref<2x1x32xf32, #tpu.memory_space<vmem>>, %arg30: memref<2x64x32xf32, #tpu.memory_space<vmem>>, %arg31: memref<2x2x1x16xf32, #tpu.memory_space<vmem>>, %arg32: memref<2x2x32x16xf32, #tpu.memory_space<vmem>>, %arg33: memref<2x1x32xf32, #tpu.memory_space<vmem>>, %arg34: memref<2x1x32xf32, #tpu.memory_space<vmem>>, %arg35: memref<2x1x32xf32, #tpu.memory_space<vmem>>, %arg36: memref<2x1x32xf32, #tpu.memory_space<vmem>>, %arg37: memref<2x1x32xf32, #tpu.memory_space<vmem>>, %arg38: memref<2x2x16x32xf32, #tpu.memory_space<vmem>>, %arg39: memref<2x2x1x16xf32, #tpu.memory_space<vmem>>, %arg40: memref<2x2x32x16xf32, #tpu.memory_space<vmem>>, %arg41: memref<2x2x1x16xf32, #tpu.memory_space<vmem>>, %arg42: memref<2x2x32x16xf32, #tpu.memory_space<vmem>>, %arg43: memref<192x32xf32, #tpu.memory_space<vmem>>, %arg44: memref<10x192xf32, #tpu.memory_space<vmem>>, %arg45: memref<1x32xf32, #tpu.memory_space<vmem>>, %arg46: memref<1x32xf32, #tpu.memory_space<vmem>>, %arg47: memref<32x128xf32, #tpu.memory_space<vmem>>, %arg48: memref<2x2x128xf32, #tpu.memory_space<vmem>>, %arg49: memref<16x32xf32, #tpu.memory_space<vmem>>) attributes {dimension_semantics = [#tpu.dimension_semantics<arbitrary>], iteration_bounds = array<i64: 1>, scalar_prefetch = 0 : i64, scratch_operands = 1 : i64, tpu.core_type = #tpu.core_type<tc>, window_params = [{transform_indices = @transform_0, window_bounds = array<i64: 2>}, {pipeline_mode = #tpu.pipeline_mode<synchronous>, transform_indices = @transform_1, window_bounds = array<i64: 16, 16>}, {pipeline_mode = #tpu.pipeline_mode<synchronous>, transform_indices = @transform_2, window_bounds = array<i64: 1, 32>}, {pipeline_mode = #tpu.pipeline_mode<synchronous>, transform_indices = @transform_3, window_bounds = array<i64: 1, 32>}, {pipeline_mode = #tpu.pipeline_mode<synchronous>, transform_indices = @transform_4, window_bounds = array<i64: 2, 1, 64>}, {pipeline_mode = #tpu.pipeline_mode<synchronous>, transform_indices = @transform_5, window_bounds = array<i64: 2, 32, 64>}, {pipeline_mode = #tpu.pipeline_mode<synchronous>, transform_indices = @transform_6, window_bounds = array<i64: 2, 1, 32>}, {pipeline_mode = #tpu.pipeline_mode<synchronous>, transform_indices = @transform_7, window_bounds = array<i64: 2, 64, 32>}, {pipeline_mode = #tpu.pipeline_mode<synchronous>, transform_indices = @transform_8, window_bounds = array<i64: 2, 2, 1, 16>}, {pipeline_mode = #tpu.pipeline_mode<synchronous>, transform_indices = @transform_9, window_bounds = array<i64: 2, 2, 32, 16>}, {pipeline_mode = #tpu.pipeline_mode<synchronous>, transform_indices = @transform_10, window_bounds = array<i64: 2, 1, 32>}, {pipeline_mode = #tpu.pipeline_mode<synchronous>, transform_indices = @transform_11, window_bounds = array<i64: 2, 1, 32>}, {pipeline_mode = #tpu.pipeline_mode<synchronous>, transform_indices = @transform_12, window_bounds = array<i64: 2, 1, 32>}, {pipeline_mode = #tpu.pipeline_mode<synchronous>, transform_indices = @transform_13, window_bounds = array<i64: 2, 1, 32>}, {pipeline_mode = #tpu.pipeline_mode<synchronous>, transform_indices = @transform_14, window_bounds = array<i64: 2, 1, 32>}, {pipeline_mode = #tpu.pipeline_mode<synchronous>, transform_indices = @transform_15, window_bounds = array<i64: 2, 2, 16, 32>}, {pipeline_mode = #tpu.pipeline_mode<synchronous>, transform_indices = @transform_16, window_bounds = array<i64: 2, 2, 1, 16>}, {pipeline_mode = #tpu.pipeline_mode<synchronous>, transform_indices = @transform_17, window_bounds = array<i64: 2, 2, 32, 16>}, {pipeline_mode = #tpu.pipeline_mode<synchronous>, transform_indices = @transform_18, window_bounds = array<i64: 2, 2, 1, 16>}, {pipeline_mode = #tpu.pipeline_mode<synchronous>, transform_indices = @transform_19, window_bounds = array<i64: 2, 2, 32, 16>}, {pipeline_mode = #tpu.pipeline_mode<synchronous>, transform_indices = @transform_20, window_bounds = array<i64: 32, 128>}, {pipeline_mode = #tpu.pipeline_mode<synchronous>, transform_indices = @transform_21, window_bounds = array<i64: 16, 32>}, {pipeline_mode = #tpu.pipeline_mode<synchronous>, transform_indices = @transform_22, window_bounds = array<i64: 10, 10>}, {pipeline_mode = #tpu.pipeline_mode<synchronous>, transform_indices = @transform_23, window_bounds = array<i64: 10, 32>}, {pipeline_mode = #tpu.pipeline_mode<synchronous>, transform_indices = @transform_24, window_bounds = array<i64: 1, 32>}, {pipeline_mode = #tpu.pipeline_mode<synchronous>, transform_indices = @transform_25, window_bounds = array<i64: 1, 32>}, {pipeline_mode = #tpu.pipeline_mode<synchronous>, transform_indices = @transform_26, window_bounds = array<i64: 2, 1, 64>}, {pipeline_mode = #tpu.pipeline_mode<synchronous>, transform_indices = @transform_27, window_bounds = array<i64: 2, 32, 64>}, {pipeline_mode = #tpu.pipeline_mode<synchronous>, transform_indices = @transform_28, window_bounds = array<i64: 2, 1, 32>}, {pipeline_mode = #tpu.pipeline_mode<synchronous>, transform_indices = @transform_29, window_bounds = array<i64: 2, 64, 32>}, {pipeline_mode = #tpu.pipeline_mode<synchronous>, transform_indices = @transform_30, window_bounds = array<i64: 2, 2, 1, 16>}, {pipeline_mode = #tpu.pipeline_mode<synchronous>, transform_indices = @transform_31, window_bounds = array<i64: 2, 2, 32, 16>}, {pipeline_mode = #tpu.pipeline_mode<synchronous>, transform_indices = @transform_32, window_bounds = array<i64: 2, 1, 32>}, {pipeline_mode = #tpu.pipeline_mode<synchronous>, transform_indices = @transform_33, window_bounds = array<i64: 2, 1, 32>}, {pipeline_mode = #tpu.pipeline_mode<synchronous>, transform_indices = @transform_34, window_bounds = array<i64: 2, 1, 32>}, {pipeline_mode = #tpu.pipeline_mode<synchronous>, transform_indices = @transform_35, window_bounds = array<i64: 2, 1, 32>}, {pipeline_mode = #tpu.pipeline_mode<synchronous>, transform_indices = @transform_36, window_bounds = array<i64: 2, 1, 32>}, {pipeline_mode = #tpu.pipeline_mode<synchronous>, transform_indices = @transform_37, window_bounds = array<i64: 2, 2, 16, 32>}, {pipeline_mode = #tpu.pipeline_mode<synchronous>, transform_indices = @transform_38, window_bounds = array<i64: 2, 2, 1, 16>}, {pipeline_mode = #tpu.pipeline_mode<synchronous>, transform_indices = @transform_39, window_bounds = array<i64: 2, 2, 32, 16>}, {pipeline_mode = #tpu.pipeline_mode<synchronous>, transform_indices = @transform_40, window_bounds = array<i64: 2, 2, 1, 16>}, {pipeline_mode = #tpu.pipeline_mode<synchronous>, transform_indices = @transform_41, window_bounds = array<i64: 2, 2, 32, 16>}, {pipeline_mode = #tpu.pipeline_mode<synchronous>, transform_indices = @transform_42, window_bounds = array<i64: 192, 32>}, {pipeline_mode = #tpu.pipeline_mode<synchronous>, transform_indices = @transform_43, window_bounds = array<i64: 10, 192>}, {pipeline_mode = #tpu.pipeline_mode<synchronous>, transform_indices = @transform_44, window_bounds = array<i64: 1, 32>}, {pipeline_mode = #tpu.pipeline_mode<synchronous>, transform_indices = @transform_45, window_bounds = array<i64: 1, 32>}, {pipeline_mode = #tpu.pipeline_mode<synchronous>, transform_indices = @transform_46, window_bounds = array<i64: 32, 128>}, {pipeline_mode = #tpu.pipeline_mode<synchronous>, transform_indices = @transform_47, window_bounds = array<i64: 2, 2, 128>}]} {
    %c0 = arith.constant 0 : index
    %c0_0 = arith.constant 0 : index
    %0 = vector.load %arg44[%c0, %c0_0] : memref<10x192xf32, #tpu.memory_space<vmem>>, vector<10x192xf32>
    %c0_1 = arith.constant 0 : index
    %c0_2 = arith.constant 0 : index
    %1 = vector.load %arg43[%c0_1, %c0_2] : memref<192x32xf32, #tpu.memory_space<vmem>>, vector<192x32xf32>
    %cst = arith.constant dense<0.000000e+00> : vector<10x32xf32>
    %2 = tpu.matmul %0, %1, %cst {dimension_numbers = #tpu.dot_dimension_numbers<[1], [0], [0], [1], [0, 0, 1, 1], [], []>} : vector<10x192xf32>, vector<192x32xf32>, vector<10x32xf32> -> vector<10x32xf32>
    %c0_3 = arith.constant 0 : index
    %c0_4 = arith.constant 0 : index
    %3 = vector.load %arg24[%c0_3, %c0_4] : memref<10x32xf32, #tpu.memory_space<vmem>>, vector<10x32xf32>
    %4 = arith.addf %2, %3 : vector<10x32xf32>
    %c0_5 = arith.constant 0 : index
    %c0_6 = arith.constant 0 : index
    %5 = vector.load %arg46[%c0_5, %c0_6] : memref<1x32xf32, #tpu.memory_space<vmem>>, vector<1x32xf32>
    %c0_7 = arith.constant 0 : index
    %c0_8 = arith.constant 0 : index
    %6 = vector.load %arg45[%c0_7, %c0_8] : memref<1x32xf32, #tpu.memory_space<vmem>>, vector<1x32xf32>
    %cst_9 = arith.constant dense<0.000000e+00> : vector<10xf32>
    %7 = vector.multi_reduction <add>, %4, %cst_9 [1] : vector<10x32xf32> to vector<10xf32>
    %8 = vector.shape_cast %7 : vector<10xf32> to vector<10x1xf32>
    %cst_10 = arith.constant 3.200000e+01 : f32
    %9 = vector.broadcast %cst_10 : f32 to vector<10x1xf32>
    %10 = arith.divf %8, %9 : vector<10x1xf32>
    %11 = vector.broadcast %10 : vector<10x1xf32> to vector<10x32xf32>
    %12 = arith.subf %4, %11 : vector<10x32xf32>
    %13 = arith.mulf %12, %12 : vector<10x32xf32>
    %cst_11 = arith.constant dense<0.000000e+00> : vector<10xf32>
    %14 = vector.multi_reduction <add>, %13, %cst_11 [1] : vector<10x32xf32> to vector<10xf32>
    %15 = vector.shape_cast %14 : vector<10xf32> to vector<10x1xf32>
    %cst_12 = arith.constant 3.200000e+01 : f32
    %16 = vector.broadcast %cst_12 : f32 to vector<10x1xf32>
    %17 = arith.divf %15, %16 : vector<10x1xf32>
    %cst_13 = arith.constant 9.99999974E-6 : f32
    %18 = vector.broadcast %cst_13 : f32 to vector<10x1xf32>
    %19 = arith.addf %17, %18 : vector<10x1xf32>
    %20 = math.rsqrt %19 : vector<10x1xf32>
    %21 = vector.broadcast %20 : vector<10x1xf32> to vector<10x32xf32>
    %22 = arith.mulf %12, %21 : vector<10x32xf32>
    %23 = vector.broadcast %5 : vector<1x32xf32> to vector<10x32xf32>
    %24 = arith.mulf %22, %23 : vector<10x32xf32>
    %25 = vector.broadcast %6 : vector<1x32xf32> to vector<10x32xf32>
    %26 = arith.addf %24, %25 : vector<10x32xf32>
    %c0_14 = arith.constant 0 : index
    %c0_15 = arith.constant 0 : index
    %27 = vector.load %arg23[%c0_14, %c0_15] : memref<10x10xf32, #tpu.memory_space<vmem>>, vector<10x10xf32>
    %c0_16 = arith.constant 0 : index
    %c0_17 = arith.constant 0 : index
    %c0_18 = arith.constant 0 : index
    %28 = vector.load %arg34[%c0_16, %c0_17, %c0_18] : memref<2x1x32xf32, #tpu.memory_space<vmem>>, vector<1x1x32xf32>
    %29 = vector.shape_cast %28 : vector<1x1x32xf32> to vector<1x32xf32>
    %c0_19 = arith.constant 0 : index
    %c0_20 = arith.constant 0 : index
    %c0_21 = arith.constant 0 : index
    %30 = vector.load %arg33[%c0_19, %c0_20, %c0_21] : memref<2x1x32xf32, #tpu.memory_space<vmem>>, vector<1x1x32xf32>
    %31 = vector.shape_cast %30 : vector<1x1x32xf32> to vector<1x32xf32>
    %cst_22 = arith.constant dense<0.000000e+00> : vector<10xf32>
    %32 = vector.multi_reduction <add>, %26, %cst_22 [1] : vector<10x32xf32> to vector<10xf32>
    %33 = vector.shape_cast %32 : vector<10xf32> to vector<10x1xf32>
    %cst_23 = arith.constant 3.200000e+01 : f32
    %34 = vector.broadcast %cst_23 : f32 to vector<10x1xf32>
    %35 = arith.divf %33, %34 : vector<10x1xf32>
    %36 = vector.broadcast %35 : vector<10x1xf32> to vector<10x32xf32>
    %37 = arith.subf %26, %36 : vector<10x32xf32>
    %38 = arith.mulf %37, %37 : vector<10x32xf32>
    %cst_24 = arith.constant dense<0.000000e+00> : vector<10xf32>
    %39 = vector.multi_reduction <add>, %38, %cst_24 [1] : vector<10x32xf32> to vector<10xf32>
    %40 = vector.shape_cast %39 : vector<10xf32> to vector<10x1xf32>
    %cst_25 = arith.constant 3.200000e+01 : f32
    %41 = vector.broadcast %cst_25 : f32 to vector<10x1xf32>
    %42 = arith.divf %40, %41 : vector<10x1xf32>
    %cst_26 = arith.constant 9.99999974E-6 : f32
    %43 = vector.broadcast %cst_26 : f32 to vector<10x1xf32>
    %44 = arith.addf %42, %43 : vector<10x1xf32>
    %45 = math.rsqrt %44 : vector<10x1xf32>
    %46 = vector.broadcast %45 : vector<10x1xf32> to vector<10x32xf32>
    %47 = arith.mulf %37, %46 : vector<10x32xf32>
    %48 = vector.broadcast %29 : vector<1x32xf32> to vector<10x32xf32>
    %49 = arith.mulf %47, %48 : vector<10x32xf32>
    %50 = vector.broadcast %31 : vector<1x32xf32> to vector<10x32xf32>
    %51 = arith.addf %49, %50 : vector<10x32xf32>
    %c0_27 = arith.constant 0 : index
    %c0_28 = arith.constant 0 : index
    %c0_29 = arith.constant 0 : index
    %c0_30 = arith.constant 0 : index
    %52 = vector.load %arg40[%c0_27, %c0_28, %c0_29, %c0_30] : memref<2x2x32x16xf32, #tpu.memory_space<vmem>>, vector<1x1x32x16xf32>
    %53 = vector.shape_cast %52 : vector<1x1x32x16xf32> to vector<32x16xf32>
    %cst_31 = arith.constant dense<0.000000e+00> : vector<10x16xf32>
    %54 = tpu.matmul %51, %53, %cst_31 {dimension_numbers = #tpu.dot_dimension_numbers<[1], [0], [0], [1], [0, 0, 1, 1], [], []>} : vector<10x32xf32>, vector<32x16xf32>, vector<10x16xf32> -> vector<10x16xf32>
    %c0_32 = arith.constant 0 : index
    %c0_33 = arith.constant 0 : index
    %c0_34 = arith.constant 0 : index
    %c0_35 = arith.constant 0 : index
    %55 = vector.load %arg39[%c0_32, %c0_33, %c0_34, %c0_35] : memref<2x2x1x16xf32, #tpu.memory_space<vmem>>, vector<1x1x1x16xf32>
    %56 = vector.shape_cast %55 : vector<1x1x1x16xf32> to vector<1x16xf32>
    %57 = vector.broadcast %56 : vector<1x16xf32> to vector<10x16xf32>
    %58 = arith.addf %54, %57 : vector<10x16xf32>
    %c0_36 = arith.constant 0 : index
    %c0_37 = arith.constant 0 : index
    %c0_38 = arith.constant 0 : index
    %c0_39 = arith.constant 0 : index
    %59 = vector.load %arg32[%c0_36, %c0_37, %c0_38, %c0_39] : memref<2x2x32x16xf32, #tpu.memory_space<vmem>>, vector<1x1x32x16xf32>
    %60 = vector.shape_cast %59 : vector<1x1x32x16xf32> to vector<32x16xf32>
    %cst_40 = arith.constant dense<0.000000e+00> : vector<10x16xf32>
    %61 = tpu.matmul %51, %60, %cst_40 {dimension_numbers = #tpu.dot_dimension_numbers<[1], [0], [0], [1], [0, 0, 1, 1], [], []>} : vector<10x32xf32>, vector<32x16xf32>, vector<10x16xf32> -> vector<10x16xf32>
    %c0_41 = arith.constant 0 : index
    %c0_42 = arith.constant 0 : index
    %c0_43 = arith.constant 0 : index
    %c0_44 = arith.constant 0 : index
    %62 = vector.load %arg31[%c0_41, %c0_42, %c0_43, %c0_44] : memref<2x2x1x16xf32, #tpu.memory_space<vmem>>, vector<1x1x1x16xf32>
    %63 = vector.shape_cast %62 : vector<1x1x1x16xf32> to vector<1x16xf32>
    %64 = vector.broadcast %63 : vector<1x16xf32> to vector<10x16xf32>
    %65 = arith.addf %61, %64 : vector<10x16xf32>
    %c0_45 = arith.constant 0 : index
    %c0_46 = arith.constant 0 : index
    %c0_47 = arith.constant 0 : index
    %c0_48 = arith.constant 0 : index
    %66 = vector.load %arg42[%c0_45, %c0_46, %c0_47, %c0_48] : memref<2x2x32x16xf32, #tpu.memory_space<vmem>>, vector<1x1x32x16xf32>
    %67 = vector.shape_cast %66 : vector<1x1x32x16xf32> to vector<32x16xf32>
    %cst_49 = arith.constant dense<0.000000e+00> : vector<10x16xf32>
    %68 = tpu.matmul %51, %67, %cst_49 {dimension_numbers = #tpu.dot_dimension_numbers<[1], [0], [0], [1], [0, 0, 1, 1], [], []>} : vector<10x32xf32>, vector<32x16xf32>, vector<10x16xf32> -> vector<10x16xf32>
    %c0_50 = arith.constant 0 : index
    %c0_51 = arith.constant 0 : index
    %c0_52 = arith.constant 0 : index
    %c0_53 = arith.constant 0 : index
    %69 = vector.load %arg41[%c0_50, %c0_51, %c0_52, %c0_53] : memref<2x2x1x16xf32, #tpu.memory_space<vmem>>, vector<1x1x1x16xf32>
    %70 = vector.shape_cast %69 : vector<1x1x1x16xf32> to vector<1x16xf32>
    %71 = vector.broadcast %70 : vector<1x16xf32> to vector<10x16xf32>
    %72 = arith.addf %68, %71 : vector<10x16xf32>
    %cst_54 = arith.constant dense<0.000000e+00> : vector<10x10xf32>
    %73 = tpu.matmul %58, %65, %cst_54 {dimension_numbers = #tpu.dot_dimension_numbers<[1], [1], [0], [0], [0, 0, 1, 0], [], []>} : vector<10x16xf32>, vector<10x16xf32>, vector<10x10xf32> -> vector<10x10xf32>
    %74 = arith.addf %73, %27 : vector<10x10xf32>
    %cst_55 = arith.constant dense<0xFF800000> : vector<10xf32>
    %75 = vector.multi_reduction <maximumf>, %74, %cst_55 [1] : vector<10x10xf32> to vector<10xf32>
    %76 = vector.shape_cast %75 : vector<10xf32> to vector<10x1xf32>
    %77 = vector.broadcast %76 : vector<10x1xf32> to vector<10x10xf32>
    %78 = arith.subf %74, %77 : vector<10x10xf32>
    %79 = math.exp %78 : vector<10x10xf32>
    %cst_56 = arith.constant dense<0.000000e+00> : vector<10xf32>
    %80 = vector.multi_reduction <add>, %79, %cst_56 [1] : vector<10x10xf32> to vector<10xf32>
    %81 = vector.shape_cast %80 : vector<10xf32> to vector<10x1xf32>
    %82 = tpu.reciprocal %81 {approx = true} : vector<10x1xf32> -> vector<10x1xf32>
    %83 = vector.broadcast %82 : vector<10x1xf32> to vector<10x10xf32>
    %84 = arith.mulf %79, %83 : vector<10x10xf32>
    %cst_57 = arith.constant dense<0.000000e+00> : vector<10x16xf32>
    %85 = tpu.matmul %84, %72, %cst_57 {dimension_numbers = #tpu.dot_dimension_numbers<[1], [0], [0], [1], [0, 0, 1, 1], [], []>} : vector<10x10xf32>, vector<10x16xf32>, vector<10x16xf32> -> vector<10x16xf32>
    %c0_58 = arith.constant 0 : index
    %c0_59 = arith.constant 0 : index
    %c0_60 = arith.constant 0 : index
    %c0_61 = arith.constant 0 : index
    %86 = vector.load %arg38[%c0_58, %c0_59, %c0_60, %c0_61] : memref<2x2x16x32xf32, #tpu.memory_space<vmem>>, vector<1x1x16x32xf32>
    %87 = vector.shape_cast %86 : vector<1x1x16x32xf32> to vector<16x32xf32>
    %cst_62 = arith.constant dense<0.000000e+00> : vector<10x32xf32>
    %88 = tpu.matmul %85, %87, %cst_62 {dimension_numbers = #tpu.dot_dimension_numbers<[1], [0], [0], [1], [0, 0, 1, 1], [], []>} : vector<10x16xf32>, vector<16x32xf32>, vector<10x32xf32> -> vector<10x32xf32>
    %c0_63 = arith.constant 0 : index
    %c1 = arith.constant 1 : index
    %c0_64 = arith.constant 0 : index
    %c0_65 = arith.constant 0 : index
    %89 = vector.load %arg40[%c0_63, %c1, %c0_64, %c0_65] : memref<2x2x32x16xf32, #tpu.memory_space<vmem>>, vector<1x1x32x16xf32>
    %90 = vector.shape_cast %89 : vector<1x1x32x16xf32> to vector<32x16xf32>
    %cst_66 = arith.constant dense<0.000000e+00> : vector<10x16xf32>
    %91 = tpu.matmul %51, %90, %cst_66 {dimension_numbers = #tpu.dot_dimension_numbers<[1], [0], [0], [1], [0, 0, 1, 1], [], []>} : vector<10x32xf32>, vector<32x16xf32>, vector<10x16xf32> -> vector<10x16xf32>
    %c0_67 = arith.constant 0 : index
    %c1_68 = arith.constant 1 : index
    %c0_69 = arith.constant 0 : index
    %c0_70 = arith.constant 0 : index
    %92 = vector.load %arg39[%c0_67, %c1_68, %c0_69, %c0_70] : memref<2x2x1x16xf32, #tpu.memory_space<vmem>>, vector<1x1x1x16xf32>
    %93 = vector.shape_cast %92 : vector<1x1x1x16xf32> to vector<1x16xf32>
    %94 = vector.broadcast %93 : vector<1x16xf32> to vector<10x16xf32>
    %95 = arith.addf %91, %94 : vector<10x16xf32>
    %c0_71 = arith.constant 0 : index
    %c1_72 = arith.constant 1 : index
    %c0_73 = arith.constant 0 : index
    %c0_74 = arith.constant 0 : index
    %96 = vector.load %arg32[%c0_71, %c1_72, %c0_73, %c0_74] : memref<2x2x32x16xf32, #tpu.memory_space<vmem>>, vector<1x1x32x16xf32>
    %97 = vector.shape_cast %96 : vector<1x1x32x16xf32> to vector<32x16xf32>
    %cst_75 = arith.constant dense<0.000000e+00> : vector<10x16xf32>
    %98 = tpu.matmul %51, %97, %cst_75 {dimension_numbers = #tpu.dot_dimension_numbers<[1], [0], [0], [1], [0, 0, 1, 1], [], []>} : vector<10x32xf32>, vector<32x16xf32>, vector<10x16xf32> -> vector<10x16xf32>
    %c0_76 = arith.constant 0 : index
    %c1_77 = arith.constant 1 : index
    %c0_78 = arith.constant 0 : index
    %c0_79 = arith.constant 0 : index
    %99 = vector.load %arg31[%c0_76, %c1_77, %c0_78, %c0_79] : memref<2x2x1x16xf32, #tpu.memory_space<vmem>>, vector<1x1x1x16xf32>
    %100 = vector.shape_cast %99 : vector<1x1x1x16xf32> to vector<1x16xf32>
    %101 = vector.broadcast %100 : vector<1x16xf32> to vector<10x16xf32>
    %102 = arith.addf %98, %101 : vector<10x16xf32>
    %c0_80 = arith.constant 0 : index
    %c1_81 = arith.constant 1 : index
    %c0_82 = arith.constant 0 : index
    %c0_83 = arith.constant 0 : index
    %103 = vector.load %arg42[%c0_80, %c1_81, %c0_82, %c0_83] : memref<2x2x32x16xf32, #tpu.memory_space<vmem>>, vector<1x1x32x16xf32>
    %104 = vector.shape_cast %103 : vector<1x1x32x16xf32> to vector<32x16xf32>
    %cst_84 = arith.constant dense<0.000000e+00> : vector<10x16xf32>
    %105 = tpu.matmul %51, %104, %cst_84 {dimension_numbers = #tpu.dot_dimension_numbers<[1], [0], [0], [1], [0, 0, 1, 1], [], []>} : vector<10x32xf32>, vector<32x16xf32>, vector<10x16xf32> -> vector<10x16xf32>
    %c0_85 = arith.constant 0 : index
    %c1_86 = arith.constant 1 : index
    %c0_87 = arith.constant 0 : index
    %c0_88 = arith.constant 0 : index
    %106 = vector.load %arg41[%c0_85, %c1_86, %c0_87, %c0_88] : memref<2x2x1x16xf32, #tpu.memory_space<vmem>>, vector<1x1x1x16xf32>
    %107 = vector.shape_cast %106 : vector<1x1x1x16xf32> to vector<1x16xf32>
    %108 = vector.broadcast %107 : vector<1x16xf32> to vector<10x16xf32>
    %109 = arith.addf %105, %108 : vector<10x16xf32>
    %cst_89 = arith.constant dense<0.000000e+00> : vector<10x10xf32>
    %110 = tpu.matmul %95, %102, %cst_89 {dimension_numbers = #tpu.dot_dimension_numbers<[1], [1], [0], [0], [0, 0, 1, 0], [], []>} : vector<10x16xf32>, vector<10x16xf32>, vector<10x10xf32> -> vector<10x10xf32>
    %111 = arith.addf %110, %27 : vector<10x10xf32>
    %cst_90 = arith.constant dense<0xFF800000> : vector<10xf32>
    %112 = vector.multi_reduction <maximumf>, %111, %cst_90 [1] : vector<10x10xf32> to vector<10xf32>
    %113 = vector.shape_cast %112 : vector<10xf32> to vector<10x1xf32>
    %114 = vector.broadcast %113 : vector<10x1xf32> to vector<10x10xf32>
    %115 = arith.subf %111, %114 : vector<10x10xf32>
    %116 = math.exp %115 : vector<10x10xf32>
    %cst_91 = arith.constant dense<0.000000e+00> : vector<10xf32>
    %117 = vector.multi_reduction <add>, %116, %cst_91 [1] : vector<10x10xf32> to vector<10xf32>
    %118 = vector.shape_cast %117 : vector<10xf32> to vector<10x1xf32>
    %119 = tpu.reciprocal %118 {approx = true} : vector<10x1xf32> -> vector<10x1xf32>
    %120 = vector.broadcast %119 : vector<10x1xf32> to vector<10x10xf32>
    %121 = arith.mulf %116, %120 : vector<10x10xf32>
    %cst_92 = arith.constant dense<0.000000e+00> : vector<10x16xf32>
    %122 = tpu.matmul %121, %109, %cst_92 {dimension_numbers = #tpu.dot_dimension_numbers<[1], [0], [0], [1], [0, 0, 1, 1], [], []>} : vector<10x10xf32>, vector<10x16xf32>, vector<10x16xf32> -> vector<10x16xf32>
    %c0_93 = arith.constant 0 : index
    %c1_94 = arith.constant 1 : index
    %c0_95 = arith.constant 0 : index
    %c0_96 = arith.constant 0 : index
    %123 = vector.load %arg38[%c0_93, %c1_94, %c0_95, %c0_96] : memref<2x2x16x32xf32, #tpu.memory_space<vmem>>, vector<1x1x16x32xf32>
    %124 = vector.shape_cast %123 : vector<1x1x16x32xf32> to vector<16x32xf32>
    %cst_97 = arith.constant dense<0.000000e+00> : vector<10x32xf32>
    %125 = tpu.matmul %122, %124, %cst_97 {dimension_numbers = #tpu.dot_dimension_numbers<[1], [0], [0], [1], [0, 0, 1, 1], [], []>} : vector<10x16xf32>, vector<16x32xf32>, vector<10x32xf32> -> vector<10x32xf32>
    %126 = arith.addf %88, %125 : vector<10x32xf32>
    %127 = arith.addf %26, %126 : vector<10x32xf32>
    %c0_98 = arith.constant 0 : index
    %c0_99 = arith.constant 0 : index
    %c0_100 = arith.constant 0 : index
    %128 = vector.load %arg37[%c0_98, %c0_99, %c0_100] : memref<2x1x32xf32, #tpu.memory_space<vmem>>, vector<1x1x32xf32>
    %129 = vector.shape_cast %128 : vector<1x1x32xf32> to vector<1x32xf32>
    %130 = vector.broadcast %129 : vector<1x32xf32> to vector<10x32xf32>
    %131 = arith.addf %127, %130 : vector<10x32xf32>
    %c0_101 = arith.constant 0 : index
    %c0_102 = arith.constant 0 : index
    %c0_103 = arith.constant 0 : index
    %132 = vector.load %arg36[%c0_101, %c0_102, %c0_103] : memref<2x1x32xf32, #tpu.memory_space<vmem>>, vector<1x1x32xf32>
    %133 = vector.shape_cast %132 : vector<1x1x32xf32> to vector<1x32xf32>
    %c0_104 = arith.constant 0 : index
    %c0_105 = arith.constant 0 : index
    %c0_106 = arith.constant 0 : index
    %134 = vector.load %arg35[%c0_104, %c0_105, %c0_106] : memref<2x1x32xf32, #tpu.memory_space<vmem>>, vector<1x1x32xf32>
    %135 = vector.shape_cast %134 : vector<1x1x32xf32> to vector<1x32xf32>
    %cst_107 = arith.constant dense<0.000000e+00> : vector<10xf32>
    %136 = vector.multi_reduction <add>, %131, %cst_107 [1] : vector<10x32xf32> to vector<10xf32>
    %137 = vector.shape_cast %136 : vector<10xf32> to vector<10x1xf32>
    %cst_108 = arith.constant 3.200000e+01 : f32
    %138 = vector.broadcast %cst_108 : f32 to vector<10x1xf32>
    %139 = arith.divf %137, %138 : vector<10x1xf32>
    %140 = vector.broadcast %139 : vector<10x1xf32> to vector<10x32xf32>
    %141 = arith.subf %131, %140 : vector<10x32xf32>
    %142 = arith.mulf %141, %141 : vector<10x32xf32>
    %cst_109 = arith.constant dense<0.000000e+00> : vector<10xf32>
    %143 = vector.multi_reduction <add>, %142, %cst_109 [1] : vector<10x32xf32> to vector<10xf32>
    %144 = vector.shape_cast %143 : vector<10xf32> to vector<10x1xf32>
    %cst_110 = arith.constant 3.200000e+01 : f32
    %145 = vector.broadcast %cst_110 : f32 to vector<10x1xf32>
    %146 = arith.divf %144, %145 : vector<10x1xf32>
    %cst_111 = arith.constant 9.99999974E-6 : f32
    %147 = vector.broadcast %cst_111 : f32 to vector<10x1xf32>
    %148 = arith.addf %146, %147 : vector<10x1xf32>
    %149 = math.rsqrt %148 : vector<10x1xf32>
    %150 = vector.broadcast %149 : vector<10x1xf32> to vector<10x32xf32>
    %151 = arith.mulf %141, %150 : vector<10x32xf32>
    %152 = vector.broadcast %133 : vector<1x32xf32> to vector<10x32xf32>
    %153 = arith.mulf %151, %152 : vector<10x32xf32>
    %154 = vector.broadcast %135 : vector<1x32xf32> to vector<10x32xf32>
    %155 = arith.addf %153, %154 : vector<10x32xf32>
    %c0_112 = arith.constant 0 : index
    %c0_113 = arith.constant 0 : index
    %c0_114 = arith.constant 0 : index
    %156 = vector.load %arg28[%c0_112, %c0_113, %c0_114] : memref<2x32x64xf32, #tpu.memory_space<vmem>>, vector<1x32x64xf32>
    %157 = vector.shape_cast %156 : vector<1x32x64xf32> to vector<32x64xf32>
    %cst_115 = arith.constant dense<0.000000e+00> : vector<10x64xf32>
    %158 = tpu.matmul %155, %157, %cst_115 {dimension_numbers = #tpu.dot_dimension_numbers<[1], [0], [0], [1], [0, 0, 1, 1], [], []>} : vector<10x32xf32>, vector<32x64xf32>, vector<10x64xf32> -> vector<10x64xf32>
    %c0_116 = arith.constant 0 : index
    %c0_117 = arith.constant 0 : index
    %c0_118 = arith.constant 0 : index
    %159 = vector.load %arg27[%c0_116, %c0_117, %c0_118] : memref<2x1x64xf32, #tpu.memory_space<vmem>>, vector<1x1x64xf32>
    %160 = vector.shape_cast %159 : vector<1x1x64xf32> to vector<1x64xf32>
    %161 = vector.broadcast %160 : vector<1x64xf32> to vector<10x64xf32>
    %162 = arith.addf %158, %161 : vector<10x64xf32>
    %cst_119 = arith.constant 1.702000e+00 : f32
    %163 = vector.broadcast %cst_119 : f32 to vector<10x64xf32>
    %164 = arith.mulf %163, %162 : vector<10x64xf32>
    %165 = arith.negf %164 : vector<10x64xf32>
    %166 = math.exp %165 : vector<10x64xf32>
    %cst_120 = arith.constant 1.000000e+00 : f32
    %167 = vector.broadcast %cst_120 : f32 to vector<10x64xf32>
    %168 = arith.addf %167, %166 : vector<10x64xf32>
    %169 = arith.divf %167, %168 : vector<10x64xf32>
    %170 = arith.mulf %162, %169 : vector<10x64xf32>
    %c0_121 = arith.constant 0 : index
    %c0_122 = arith.constant 0 : index
    %c0_123 = arith.constant 0 : index
    %171 = vector.load %arg30[%c0_121, %c0_122, %c0_123] : memref<2x64x32xf32, #tpu.memory_space<vmem>>, vector<1x64x32xf32>
    %172 = vector.shape_cast %171 : vector<1x64x32xf32> to vector<64x32xf32>
    %cst_124 = arith.constant dense<0.000000e+00> : vector<10x32xf32>
    %173 = tpu.matmul %170, %172, %cst_124 {dimension_numbers = #tpu.dot_dimension_numbers<[1], [0], [0], [1], [0, 0, 1, 1], [], []>} : vector<10x64xf32>, vector<64x32xf32>, vector<10x32xf32> -> vector<10x32xf32>
    %c0_125 = arith.constant 0 : index
    %c0_126 = arith.constant 0 : index
    %c0_127 = arith.constant 0 : index
    %174 = vector.load %arg29[%c0_125, %c0_126, %c0_127] : memref<2x1x32xf32, #tpu.memory_space<vmem>>, vector<1x1x32xf32>
    %175 = vector.shape_cast %174 : vector<1x1x32xf32> to vector<1x32xf32>
    %176 = vector.broadcast %175 : vector<1x32xf32> to vector<10x32xf32>
    %177 = arith.addf %173, %176 : vector<10x32xf32>
    %178 = arith.addf %131, %177 : vector<10x32xf32>
    %c1_128 = arith.constant 1 : index
    %c0_129 = arith.constant 0 : index
    %c0_130 = arith.constant 0 : index
    %179 = vector.load %arg34[%c1_128, %c0_129, %c0_130] : memref<2x1x32xf32, #tpu.memory_space<vmem>>, vector<1x1x32xf32>
    %180 = vector.shape_cast %179 : vector<1x1x32xf32> to vector<1x32xf32>
    %c1_131 = arith.constant 1 : index
    %c0_132 = arith.constant 0 : index
    %c0_133 = arith.constant 0 : index
    %181 = vector.load %arg33[%c1_131, %c0_132, %c0_133] : memref<2x1x32xf32, #tpu.memory_space<vmem>>, vector<1x1x32xf32>
    %182 = vector.shape_cast %181 : vector<1x1x32xf32> to vector<1x32xf32>
    %cst_134 = arith.constant dense<0.000000e+00> : vector<10xf32>
    %183 = vector.multi_reduction <add>, %178, %cst_134 [1] : vector<10x32xf32> to vector<10xf32>
    %184 = vector.shape_cast %183 : vector<10xf32> to vector<10x1xf32>
    %cst_135 = arith.constant 3.200000e+01 : f32
    %185 = vector.broadcast %cst_135 : f32 to vector<10x1xf32>
    %186 = arith.divf %184, %185 : vector<10x1xf32>
    %187 = vector.broadcast %186 : vector<10x1xf32> to vector<10x32xf32>
    %188 = arith.subf %178, %187 : vector<10x32xf32>
    %189 = arith.mulf %188, %188 : vector<10x32xf32>
    %cst_136 = arith.constant dense<0.000000e+00> : vector<10xf32>
    %190 = vector.multi_reduction <add>, %189, %cst_136 [1] : vector<10x32xf32> to vector<10xf32>
    %191 = vector.shape_cast %190 : vector<10xf32> to vector<10x1xf32>
    %cst_137 = arith.constant 3.200000e+01 : f32
    %192 = vector.broadcast %cst_137 : f32 to vector<10x1xf32>
    %193 = arith.divf %191, %192 : vector<10x1xf32>
    %cst_138 = arith.constant 9.99999974E-6 : f32
    %194 = vector.broadcast %cst_138 : f32 to vector<10x1xf32>
    %195 = arith.addf %193, %194 : vector<10x1xf32>
    %196 = math.rsqrt %195 : vector<10x1xf32>
    %197 = vector.broadcast %196 : vector<10x1xf32> to vector<10x32xf32>
    %198 = arith.mulf %188, %197 : vector<10x32xf32>
    %199 = vector.broadcast %180 : vector<1x32xf32> to vector<10x32xf32>
    %200 = arith.mulf %198, %199 : vector<10x32xf32>
    %201 = vector.broadcast %182 : vector<1x32xf32> to vector<10x32xf32>
    %202 = arith.addf %200, %201 : vector<10x32xf32>
    %c1_139 = arith.constant 1 : index
    %c0_140 = arith.constant 0 : index
    %c0_141 = arith.constant 0 : index
    %c0_142 = arith.constant 0 : index
    %203 = vector.load %arg40[%c1_139, %c0_140, %c0_141, %c0_142] : memref<2x2x32x16xf32, #tpu.memory_space<vmem>>, vector<1x1x32x16xf32>
    %204 = vector.shape_cast %203 : vector<1x1x32x16xf32> to vector<32x16xf32>
    %cst_143 = arith.constant dense<0.000000e+00> : vector<10x16xf32>
    %205 = tpu.matmul %202, %204, %cst_143 {dimension_numbers = #tpu.dot_dimension_numbers<[1], [0], [0], [1], [0, 0, 1, 1], [], []>} : vector<10x32xf32>, vector<32x16xf32>, vector<10x16xf32> -> vector<10x16xf32>
    %c1_144 = arith.constant 1 : index
    %c0_145 = arith.constant 0 : index
    %c0_146 = arith.constant 0 : index
    %c0_147 = arith.constant 0 : index
    %206 = vector.load %arg39[%c1_144, %c0_145, %c0_146, %c0_147] : memref<2x2x1x16xf32, #tpu.memory_space<vmem>>, vector<1x1x1x16xf32>
    %207 = vector.shape_cast %206 : vector<1x1x1x16xf32> to vector<1x16xf32>
    %208 = vector.broadcast %207 : vector<1x16xf32> to vector<10x16xf32>
    %209 = arith.addf %205, %208 : vector<10x16xf32>
    %c1_148 = arith.constant 1 : index
    %c0_149 = arith.constant 0 : index
    %c0_150 = arith.constant 0 : index
    %c0_151 = arith.constant 0 : index
    %210 = vector.load %arg32[%c1_148, %c0_149, %c0_150, %c0_151] : memref<2x2x32x16xf32, #tpu.memory_space<vmem>>, vector<1x1x32x16xf32>
    %211 = vector.shape_cast %210 : vector<1x1x32x16xf32> to vector<32x16xf32>
    %cst_152 = arith.constant dense<0.000000e+00> : vector<10x16xf32>
    %212 = tpu.matmul %202, %211, %cst_152 {dimension_numbers = #tpu.dot_dimension_numbers<[1], [0], [0], [1], [0, 0, 1, 1], [], []>} : vector<10x32xf32>, vector<32x16xf32>, vector<10x16xf32> -> vector<10x16xf32>
    %c1_153 = arith.constant 1 : index
    %c0_154 = arith.constant 0 : index
    %c0_155 = arith.constant 0 : index
    %c0_156 = arith.constant 0 : index
    %213 = vector.load %arg31[%c1_153, %c0_154, %c0_155, %c0_156] : memref<2x2x1x16xf32, #tpu.memory_space<vmem>>, vector<1x1x1x16xf32>
    %214 = vector.shape_cast %213 : vector<1x1x1x16xf32> to vector<1x16xf32>
    %215 = vector.broadcast %214 : vector<1x16xf32> to vector<10x16xf32>
    %216 = arith.addf %212, %215 : vector<10x16xf32>
    %c1_157 = arith.constant 1 : index
    %c0_158 = arith.constant 0 : index
    %c0_159 = arith.constant 0 : index
    %c0_160 = arith.constant 0 : index
    %217 = vector.load %arg42[%c1_157, %c0_158, %c0_159, %c0_160] : memref<2x2x32x16xf32, #tpu.memory_space<vmem>>, vector<1x1x32x16xf32>
    %218 = vector.shape_cast %217 : vector<1x1x32x16xf32> to vector<32x16xf32>
    %cst_161 = arith.constant dense<0.000000e+00> : vector<10x16xf32>
    %219 = tpu.matmul %202, %218, %cst_161 {dimension_numbers = #tpu.dot_dimension_numbers<[1], [0], [0], [1], [0, 0, 1, 1], [], []>} : vector<10x32xf32>, vector<32x16xf32>, vector<10x16xf32> -> vector<10x16xf32>
    %c1_162 = arith.constant 1 : index
    %c0_163 = arith.constant 0 : index
    %c0_164 = arith.constant 0 : index
    %c0_165 = arith.constant 0 : index
    %220 = vector.load %arg41[%c1_162, %c0_163, %c0_164, %c0_165] : memref<2x2x1x16xf32, #tpu.memory_space<vmem>>, vector<1x1x1x16xf32>
    %221 = vector.shape_cast %220 : vector<1x1x1x16xf32> to vector<1x16xf32>
    %222 = vector.broadcast %221 : vector<1x16xf32> to vector<10x16xf32>
    %223 = arith.addf %219, %222 : vector<10x16xf32>
    %cst_166 = arith.constant dense<0.000000e+00> : vector<10x10xf32>
    %224 = tpu.matmul %209, %216, %cst_166 {dimension_numbers = #tpu.dot_dimension_numbers<[1], [1], [0], [0], [0, 0, 1, 0], [], []>} : vector<10x16xf32>, vector<10x16xf32>, vector<10x10xf32> -> vector<10x10xf32>
    %225 = arith.addf %224, %27 : vector<10x10xf32>
    %cst_167 = arith.constant dense<0xFF800000> : vector<10xf32>
    %226 = vector.multi_reduction <maximumf>, %225, %cst_167 [1] : vector<10x10xf32> to vector<10xf32>
    %227 = vector.shape_cast %226 : vector<10xf32> to vector<10x1xf32>
    %228 = vector.broadcast %227 : vector<10x1xf32> to vector<10x10xf32>
    %229 = arith.subf %225, %228 : vector<10x10xf32>
    %230 = math.exp %229 : vector<10x10xf32>
    %cst_168 = arith.constant dense<0.000000e+00> : vector<10xf32>
    %231 = vector.multi_reduction <add>, %230, %cst_168 [1] : vector<10x10xf32> to vector<10xf32>
    %232 = vector.shape_cast %231 : vector<10xf32> to vector<10x1xf32>
    %233 = tpu.reciprocal %232 {approx = true} : vector<10x1xf32> -> vector<10x1xf32>
    %234 = vector.broadcast %233 : vector<10x1xf32> to vector<10x10xf32>
    %235 = arith.mulf %230, %234 : vector<10x10xf32>
    %cst_169 = arith.constant dense<0.000000e+00> : vector<10x16xf32>
    %236 = tpu.matmul %235, %223, %cst_169 {dimension_numbers = #tpu.dot_dimension_numbers<[1], [0], [0], [1], [0, 0, 1, 1], [], []>} : vector<10x10xf32>, vector<10x16xf32>, vector<10x16xf32> -> vector<10x16xf32>
    %c1_170 = arith.constant 1 : index
    %c0_171 = arith.constant 0 : index
    %c0_172 = arith.constant 0 : index
    %c0_173 = arith.constant 0 : index
    %237 = vector.load %arg38[%c1_170, %c0_171, %c0_172, %c0_173] : memref<2x2x16x32xf32, #tpu.memory_space<vmem>>, vector<1x1x16x32xf32>
    %238 = vector.shape_cast %237 : vector<1x1x16x32xf32> to vector<16x32xf32>
    %cst_174 = arith.constant dense<0.000000e+00> : vector<10x32xf32>
    %239 = tpu.matmul %236, %238, %cst_174 {dimension_numbers = #tpu.dot_dimension_numbers<[1], [0], [0], [1], [0, 0, 1, 1], [], []>} : vector<10x16xf32>, vector<16x32xf32>, vector<10x32xf32> -> vector<10x32xf32>
    %c1_175 = arith.constant 1 : index
    %c1_176 = arith.constant 1 : index
    %c0_177 = arith.constant 0 : index
    %c0_178 = arith.constant 0 : index
    %240 = vector.load %arg40[%c1_175, %c1_176, %c0_177, %c0_178] : memref<2x2x32x16xf32, #tpu.memory_space<vmem>>, vector<1x1x32x16xf32>
    %241 = vector.shape_cast %240 : vector<1x1x32x16xf32> to vector<32x16xf32>
    %cst_179 = arith.constant dense<0.000000e+00> : vector<10x16xf32>
    %242 = tpu.matmul %202, %241, %cst_179 {dimension_numbers = #tpu.dot_dimension_numbers<[1], [0], [0], [1], [0, 0, 1, 1], [], []>} : vector<10x32xf32>, vector<32x16xf32>, vector<10x16xf32> -> vector<10x16xf32>
    %c1_180 = arith.constant 1 : index
    %c1_181 = arith.constant 1 : index
    %c0_182 = arith.constant 0 : index
    %c0_183 = arith.constant 0 : index
    %243 = vector.load %arg39[%c1_180, %c1_181, %c0_182, %c0_183] : memref<2x2x1x16xf32, #tpu.memory_space<vmem>>, vector<1x1x1x16xf32>
    %244 = vector.shape_cast %243 : vector<1x1x1x16xf32> to vector<1x16xf32>
    %245 = vector.broadcast %244 : vector<1x16xf32> to vector<10x16xf32>
    %246 = arith.addf %242, %245 : vector<10x16xf32>
    %c1_184 = arith.constant 1 : index
    %c1_185 = arith.constant 1 : index
    %c0_186 = arith.constant 0 : index
    %c0_187 = arith.constant 0 : index
    %247 = vector.load %arg32[%c1_184, %c1_185, %c0_186, %c0_187] : memref<2x2x32x16xf32, #tpu.memory_space<vmem>>, vector<1x1x32x16xf32>
    %248 = vector.shape_cast %247 : vector<1x1x32x16xf32> to vector<32x16xf32>
    %cst_188 = arith.constant dense<0.000000e+00> : vector<10x16xf32>
    %249 = tpu.matmul %202, %248, %cst_188 {dimension_numbers = #tpu.dot_dimension_numbers<[1], [0], [0], [1], [0, 0, 1, 1], [], []>} : vector<10x32xf32>, vector<32x16xf32>, vector<10x16xf32> -> vector<10x16xf32>
    %c1_189 = arith.constant 1 : index
    %c1_190 = arith.constant 1 : index
    %c0_191 = arith.constant 0 : index
    %c0_192 = arith.constant 0 : index
    %250 = vector.load %arg31[%c1_189, %c1_190, %c0_191, %c0_192] : memref<2x2x1x16xf32, #tpu.memory_space<vmem>>, vector<1x1x1x16xf32>
    %251 = vector.shape_cast %250 : vector<1x1x1x16xf32> to vector<1x16xf32>
    %252 = vector.broadcast %251 : vector<1x16xf32> to vector<10x16xf32>
    %253 = arith.addf %249, %252 : vector<10x16xf32>
    %c1_193 = arith.constant 1 : index
    %c1_194 = arith.constant 1 : index
    %c0_195 = arith.constant 0 : index
    %c0_196 = arith.constant 0 : index
    %254 = vector.load %arg42[%c1_193, %c1_194, %c0_195, %c0_196] : memref<2x2x32x16xf32, #tpu.memory_space<vmem>>, vector<1x1x32x16xf32>
    %255 = vector.shape_cast %254 : vector<1x1x32x16xf32> to vector<32x16xf32>
    %cst_197 = arith.constant dense<0.000000e+00> : vector<10x16xf32>
    %256 = tpu.matmul %202, %255, %cst_197 {dimension_numbers = #tpu.dot_dimension_numbers<[1], [0], [0], [1], [0, 0, 1, 1], [], []>} : vector<10x32xf32>, vector<32x16xf32>, vector<10x16xf32> -> vector<10x16xf32>
    %c1_198 = arith.constant 1 : index
    %c1_199 = arith.constant 1 : index
    %c0_200 = arith.constant 0 : index
    %c0_201 = arith.constant 0 : index
    %257 = vector.load %arg41[%c1_198, %c1_199, %c0_200, %c0_201] : memref<2x2x1x16xf32, #tpu.memory_space<vmem>>, vector<1x1x1x16xf32>
    %258 = vector.shape_cast %257 : vector<1x1x1x16xf32> to vector<1x16xf32>
    %259 = vector.broadcast %258 : vector<1x16xf32> to vector<10x16xf32>
    %260 = arith.addf %256, %259 : vector<10x16xf32>
    %cst_202 = arith.constant dense<0.000000e+00> : vector<10x10xf32>
    %261 = tpu.matmul %246, %253, %cst_202 {dimension_numbers = #tpu.dot_dimension_numbers<[1], [1], [0], [0], [0, 0, 1, 0], [], []>} : vector<10x16xf32>, vector<10x16xf32>, vector<10x10xf32> -> vector<10x10xf32>
    %262 = arith.addf %261, %27 : vector<10x10xf32>
    %cst_203 = arith.constant dense<0xFF800000> : vector<10xf32>
    %263 = vector.multi_reduction <maximumf>, %262, %cst_203 [1] : vector<10x10xf32> to vector<10xf32>
    %264 = vector.shape_cast %263 : vector<10xf32> to vector<10x1xf32>
    %265 = vector.broadcast %264 : vector<10x1xf32> to vector<10x10xf32>
    %266 = arith.subf %262, %265 : vector<10x10xf32>
    %267 = math.exp %266 : vector<10x10xf32>
    %cst_204 = arith.constant dense<0.000000e+00> : vector<10xf32>
    %268 = vector.multi_reduction <add>, %267, %cst_204 [1] : vector<10x10xf32> to vector<10xf32>
    %269 = vector.shape_cast %268 : vector<10xf32> to vector<10x1xf32>
    %270 = tpu.reciprocal %269 {approx = true} : vector<10x1xf32> -> vector<10x1xf32>
    %271 = vector.broadcast %270 : vector<10x1xf32> to vector<10x10xf32>
    %272 = arith.mulf %267, %271 : vector<10x10xf32>
    %cst_205 = arith.constant dense<0.000000e+00> : vector<10x16xf32>
    %273 = tpu.matmul %272, %260, %cst_205 {dimension_numbers = #tpu.dot_dimension_numbers<[1], [0], [0], [1], [0, 0, 1, 1], [], []>} : vector<10x10xf32>, vector<10x16xf32>, vector<10x16xf32> -> vector<10x16xf32>
    %c1_206 = arith.constant 1 : index
    %c1_207 = arith.constant 1 : index
    %c0_208 = arith.constant 0 : index
    %c0_209 = arith.constant 0 : index
    %274 = vector.load %arg38[%c1_206, %c1_207, %c0_208, %c0_209] : memref<2x2x16x32xf32, #tpu.memory_space<vmem>>, vector<1x1x16x32xf32>
    %275 = vector.shape_cast %274 : vector<1x1x16x32xf32> to vector<16x32xf32>
    %cst_210 = arith.constant dense<0.000000e+00> : vector<10x32xf32>
    %276 = tpu.matmul %273, %275, %cst_210 {dimension_numbers = #tpu.dot_dimension_numbers<[1], [0], [0], [1], [0, 0, 1, 1], [], []>} : vector<10x16xf32>, vector<16x32xf32>, vector<10x32xf32> -> vector<10x32xf32>
    %277 = arith.addf %239, %276 : vector<10x32xf32>
    %278 = arith.addf %178, %277 : vector<10x32xf32>
    %c1_211 = arith.constant 1 : index
    %c0_212 = arith.constant 0 : index
    %c0_213 = arith.constant 0 : index
    %279 = vector.load %arg37[%c1_211, %c0_212, %c0_213] : memref<2x1x32xf32, #tpu.memory_space<vmem>>, vector<1x1x32xf32>
    %280 = vector.shape_cast %279 : vector<1x1x32xf32> to vector<1x32xf32>
    %281 = vector.broadcast %280 : vector<1x32xf32> to vector<10x32xf32>
    %282 = arith.addf %278, %281 : vector<10x32xf32>
    %c1_214 = arith.constant 1 : index
    %c0_215 = arith.constant 0 : index
    %c0_216 = arith.constant 0 : index
    %283 = vector.load %arg36[%c1_214, %c0_215, %c0_216] : memref<2x1x32xf32, #tpu.memory_space<vmem>>, vector<1x1x32xf32>
    %284 = vector.shape_cast %283 : vector<1x1x32xf32> to vector<1x32xf32>
    %c1_217 = arith.constant 1 : index
    %c0_218 = arith.constant 0 : index
    %c0_219 = arith.constant 0 : index
    %285 = vector.load %arg35[%c1_217, %c0_218, %c0_219] : memref<2x1x32xf32, #tpu.memory_space<vmem>>, vector<1x1x32xf32>
    %286 = vector.shape_cast %285 : vector<1x1x32xf32> to vector<1x32xf32>
    %cst_220 = arith.constant dense<0.000000e+00> : vector<10xf32>
    %287 = vector.multi_reduction <add>, %282, %cst_220 [1] : vector<10x32xf32> to vector<10xf32>
    %288 = vector.shape_cast %287 : vector<10xf32> to vector<10x1xf32>
    %cst_221 = arith.constant 3.200000e+01 : f32
    %289 = vector.broadcast %cst_221 : f32 to vector<10x1xf32>
    %290 = arith.divf %288, %289 : vector<10x1xf32>
    %291 = vector.broadcast %290 : vector<10x1xf32> to vector<10x32xf32>
    %292 = arith.subf %282, %291 : vector<10x32xf32>
    %293 = arith.mulf %292, %292 : vector<10x32xf32>
    %cst_222 = arith.constant dense<0.000000e+00> : vector<10xf32>
    %294 = vector.multi_reduction <add>, %293, %cst_222 [1] : vector<10x32xf32> to vector<10xf32>
    %295 = vector.shape_cast %294 : vector<10xf32> to vector<10x1xf32>
    %cst_223 = arith.constant 3.200000e+01 : f32
    %296 = vector.broadcast %cst_223 : f32 to vector<10x1xf32>
    %297 = arith.divf %295, %296 : vector<10x1xf32>
    %cst_224 = arith.constant 9.99999974E-6 : f32
    %298 = vector.broadcast %cst_224 : f32 to vector<10x1xf32>
    %299 = arith.addf %297, %298 : vector<10x1xf32>
    %300 = math.rsqrt %299 : vector<10x1xf32>
    %301 = vector.broadcast %300 : vector<10x1xf32> to vector<10x32xf32>
    %302 = arith.mulf %292, %301 : vector<10x32xf32>
    %303 = vector.broadcast %284 : vector<1x32xf32> to vector<10x32xf32>
    %304 = arith.mulf %302, %303 : vector<10x32xf32>
    %305 = vector.broadcast %286 : vector<1x32xf32> to vector<10x32xf32>
    %306 = arith.addf %304, %305 : vector<10x32xf32>
    %c1_225 = arith.constant 1 : index
    %c0_226 = arith.constant 0 : index
    %c0_227 = arith.constant 0 : index
    %307 = vector.load %arg28[%c1_225, %c0_226, %c0_227] : memref<2x32x64xf32, #tpu.memory_space<vmem>>, vector<1x32x64xf32>
    %308 = vector.shape_cast %307 : vector<1x32x64xf32> to vector<32x64xf32>
    %cst_228 = arith.constant dense<0.000000e+00> : vector<10x64xf32>
    %309 = tpu.matmul %306, %308, %cst_228 {dimension_numbers = #tpu.dot_dimension_numbers<[1], [0], [0], [1], [0, 0, 1, 1], [], []>} : vector<10x32xf32>, vector<32x64xf32>, vector<10x64xf32> -> vector<10x64xf32>
    %c1_229 = arith.constant 1 : index
    %c0_230 = arith.constant 0 : index
    %c0_231 = arith.constant 0 : index
    %310 = vector.load %arg27[%c1_229, %c0_230, %c0_231] : memref<2x1x64xf32, #tpu.memory_space<vmem>>, vector<1x1x64xf32>
    %311 = vector.shape_cast %310 : vector<1x1x64xf32> to vector<1x64xf32>
    %312 = vector.broadcast %311 : vector<1x64xf32> to vector<10x64xf32>
    %313 = arith.addf %309, %312 : vector<10x64xf32>
    %cst_232 = arith.constant 1.702000e+00 : f32
    %314 = vector.broadcast %cst_232 : f32 to vector<10x64xf32>
    %315 = arith.mulf %314, %313 : vector<10x64xf32>
    %316 = arith.negf %315 : vector<10x64xf32>
    %317 = math.exp %316 : vector<10x64xf32>
    %cst_233 = arith.constant 1.000000e+00 : f32
    %318 = vector.broadcast %cst_233 : f32 to vector<10x64xf32>
    %319 = arith.addf %318, %317 : vector<10x64xf32>
    %320 = arith.divf %318, %319 : vector<10x64xf32>
    %321 = arith.mulf %313, %320 : vector<10x64xf32>
    %c1_234 = arith.constant 1 : index
    %c0_235 = arith.constant 0 : index
    %c0_236 = arith.constant 0 : index
    %322 = vector.load %arg30[%c1_234, %c0_235, %c0_236] : memref<2x64x32xf32, #tpu.memory_space<vmem>>, vector<1x64x32xf32>
    %323 = vector.shape_cast %322 : vector<1x64x32xf32> to vector<64x32xf32>
    %cst_237 = arith.constant dense<0.000000e+00> : vector<10x32xf32>
    %324 = tpu.matmul %321, %323, %cst_237 {dimension_numbers = #tpu.dot_dimension_numbers<[1], [0], [0], [1], [0, 0, 1, 1], [], []>} : vector<10x64xf32>, vector<64x32xf32>, vector<10x32xf32> -> vector<10x32xf32>
    %c1_238 = arith.constant 1 : index
    %c0_239 = arith.constant 0 : index
    %c0_240 = arith.constant 0 : index
    %325 = vector.load %arg29[%c1_238, %c0_239, %c0_240] : memref<2x1x32xf32, #tpu.memory_space<vmem>>, vector<1x1x32xf32>
    %326 = vector.shape_cast %325 : vector<1x1x32xf32> to vector<1x32xf32>
    %327 = vector.broadcast %326 : vector<1x32xf32> to vector<10x32xf32>
    %328 = arith.addf %324, %327 : vector<10x32xf32>
    %329 = arith.addf %282, %328 : vector<10x32xf32>
    %330 = vector.extract_strided_slice %329 {offsets = [0, 0], sizes = [1, 32], strides = [1, 1]} : vector<10x32xf32> to vector<1x32xf32>
    %331 = vector.extract_strided_slice %329 {offsets = [5, 0], sizes = [1, 32], strides = [1, 1]} : vector<10x32xf32> to vector<1x32xf32>
    %332 = tpu.concatenate %330, %331 in 0 : vector<1x32xf32>, vector<1x32xf32> -> vector<2x32xf32>
    %c0_241 = arith.constant 0 : index
    %c0_242 = arith.constant 0 : index
    %333 = vector.load %arg26[%c0_241, %c0_242] : memref<1x32xf32, #tpu.memory_space<vmem>>, vector<1x32xf32>
    %c0_243 = arith.constant 0 : index
    %c0_244 = arith.constant 0 : index
    %334 = vector.load %arg25[%c0_243, %c0_244] : memref<1x32xf32, #tpu.memory_space<vmem>>, vector<1x32xf32>
    %cst_245 = arith.constant dense<0.000000e+00> : vector<2xf32>
    %335 = vector.multi_reduction <add>, %332, %cst_245 [1] : vector<2x32xf32> to vector<2xf32>
    %336 = vector.shape_cast %335 : vector<2xf32> to vector<2x1xf32>
    %cst_246 = arith.constant 3.200000e+01 : f32
    %337 = vector.broadcast %cst_246 : f32 to vector<2x1xf32>
    %338 = arith.divf %336, %337 : vector<2x1xf32>
    %339 = vector.broadcast %338 : vector<2x1xf32> to vector<2x32xf32>
    %340 = arith.subf %332, %339 : vector<2x32xf32>
    %341 = arith.mulf %340, %340 : vector<2x32xf32>
    %cst_247 = arith.constant dense<0.000000e+00> : vector<2xf32>
    %342 = vector.multi_reduction <add>, %341, %cst_247 [1] : vector<2x32xf32> to vector<2xf32>
    %343 = vector.shape_cast %342 : vector<2xf32> to vector<2x1xf32>
    %cst_248 = arith.constant 3.200000e+01 : f32
    %344 = vector.broadcast %cst_248 : f32 to vector<2x1xf32>
    %345 = arith.divf %343, %344 : vector<2x1xf32>
    %cst_249 = arith.constant 9.99999974E-6 : f32
    %346 = vector.broadcast %cst_249 : f32 to vector<2x1xf32>
    %347 = arith.addf %345, %346 : vector<2x1xf32>
    %348 = math.rsqrt %347 : vector<2x1xf32>
    %349 = vector.broadcast %348 : vector<2x1xf32> to vector<2x32xf32>
    %350 = arith.mulf %340, %349 : vector<2x32xf32>
    %351 = vector.broadcast %333 : vector<1x32xf32> to vector<2x32xf32>
    %352 = arith.mulf %350, %351 : vector<2x32xf32>
    %353 = vector.broadcast %334 : vector<1x32xf32> to vector<2x32xf32>
    %354 = arith.addf %352, %353 : vector<2x32xf32>
    %c0_250 = arith.constant 0 : index
    %c0_251 = arith.constant 0 : index
    %355 = vector.load %arg47[%c0_250, %c0_251] : memref<32x128xf32, #tpu.memory_space<vmem>>, vector<32x128xf32>
    %cst_252 = arith.constant dense<0.000000e+00> : vector<2x128xf32>
    %356 = tpu.matmul %354, %355, %cst_252 {dimension_numbers = #tpu.dot_dimension_numbers<[1], [0], [0], [1], [0, 0, 1, 1], [], []>} : vector<2x32xf32>, vector<32x128xf32>, vector<2x128xf32> -> vector<2x128xf32>
    %c0_253 = arith.constant 0 : index
    %c0_254 = arith.constant 0 : index
    %c0_255 = arith.constant 0 : index
    %357 = vector.load %arg48[%c0_253, %c0_254, %c0_255] : memref<2x2x128xf32, #tpu.memory_space<vmem>>, vector<1x2x128xf32>
    %358 = vector.shape_cast %357 : vector<1x2x128xf32> to vector<2x128xf32>
    %359 = vector.shape_cast %356 : vector<2x128xf32> to vector<1x2x128xf32>
    tpu.vector_store %arg48[%c0_253, %c0_254, %c0_255], %359 {strides = array<i32>} : memref<2x2x128xf32, #tpu.memory_space<vmem>>, vector<1x2x128xf32>,
    %c0_256 = arith.constant 0 : index
    %c0_257 = arith.constant 0 : index
    %360 = vector.load %arg22[%c0_256, %c0_257] : memref<16x32xf32, #tpu.memory_space<vmem>>, vector<16x32xf32>
    %c0_258 = arith.constant 0 : index
    %c0_259 = arith.constant 0 : index
    %361 = vector.load %arg2[%c0_258, %c0_259] : memref<16x16xf32, #tpu.memory_space<vmem>>, vector<16x16xf32>
    %c0_260 = arith.constant 0 : index
    %c0_261 = arith.constant 0 : index
    %c0_262 = arith.constant 0 : index
    %362 = vector.load %arg12[%c0_260, %c0_261, %c0_262] : memref<2x1x32xf32, #tpu.memory_space<vmem>>, vector<1x1x32xf32>
    %363 = vector.shape_cast %362 : vector<1x1x32xf32> to vector<1x32xf32>
    %c0_263 = arith.constant 0 : index
    %c0_264 = arith.constant 0 : index
    %c0_265 = arith.constant 0 : index
    %364 = vector.load %arg11[%c0_263, %c0_264, %c0_265] : memref<2x1x32xf32, #tpu.memory_space<vmem>>, vector<1x1x32xf32>
    %365 = vector.shape_cast %364 : vector<1x1x32xf32> to vector<1x32xf32>
    %cst_266 = arith.constant dense<0.000000e+00> : vector<16xf32>
    %366 = vector.multi_reduction <add>, %360, %cst_266 [1] : vector<16x32xf32> to vector<16xf32>
    %367 = vector.shape_cast %366 : vector<16xf32> to vector<16x1xf32>
    %cst_267 = arith.constant 3.200000e+01 : f32
    %368 = vector.broadcast %cst_267 : f32 to vector<16x1xf32>
    %369 = arith.divf %367, %368 : vector<16x1xf32>
    %370 = vector.broadcast %369 : vector<16x1xf32> to vector<16x32xf32>
    %371 = arith.subf %360, %370 : vector<16x32xf32>
    %372 = arith.mulf %371, %371 : vector<16x32xf32>
    %cst_268 = arith.constant dense<0.000000e+00> : vector<16xf32>
    %373 = vector.multi_reduction <add>, %372, %cst_268 [1] : vector<16x32xf32> to vector<16xf32>
    %374 = vector.shape_cast %373 : vector<16xf32> to vector<16x1xf32>
    %cst_269 = arith.constant 3.200000e+01 : f32
    %375 = vector.broadcast %cst_269 : f32 to vector<16x1xf32>
    %376 = arith.divf %374, %375 : vector<16x1xf32>
    %cst_270 = arith.constant 9.99999974E-6 : f32
    %377 = vector.broadcast %cst_270 : f32 to vector<16x1xf32>
    %378 = arith.addf %376, %377 : vector<16x1xf32>
    %379 = math.rsqrt %378 : vector<16x1xf32>
    %380 = vector.broadcast %379 : vector<16x1xf32> to vector<16x32xf32>
    %381 = arith.mulf %371, %380 : vector<16x32xf32>
    %382 = vector.broadcast %363 : vector<1x32xf32> to vector<16x32xf32>
    %383 = arith.mulf %381, %382 : vector<16x32xf32>
    %384 = vector.broadcast %365 : vector<1x32xf32> to vector<16x32xf32>
    %385 = arith.addf %383, %384 : vector<16x32xf32>
    %c0_271 = arith.constant 0 : index
    %c0_272 = arith.constant 0 : index
    %c0_273 = arith.constant 0 : index
    %c0_274 = arith.constant 0 : index
    %386 = vector.load %arg18[%c0_271, %c0_272, %c0_273, %c0_274] : memref<2x2x32x16xf32, #tpu.memory_space<vmem>>, vector<1x1x32x16xf32>
    %387 = vector.shape_cast %386 : vector<1x1x32x16xf32> to vector<32x16xf32>
    %cst_275 = arith.constant dense<0.000000e+00> : vector<16x16xf32>
    %388 = tpu.matmul %385, %387, %cst_275 {dimension_numbers = #tpu.dot_dimension_numbers<[1], [0], [0], [1], [0, 0, 1, 1], [], []>} : vector<16x32xf32>, vector<32x16xf32>, vector<16x16xf32> -> vector<16x16xf32>
    %c0_276 = arith.constant 0 : index
    %c0_277 = arith.constant 0 : index
    %c0_278 = arith.constant 0 : index
    %c0_279 = arith.constant 0 : index
    %389 = vector.load %arg17[%c0_276, %c0_277, %c0_278, %c0_279] : memref<2x2x1x16xf32, #tpu.memory_space<vmem>>, vector<1x1x1x16xf32>
    %390 = vector.shape_cast %389 : vector<1x1x1x16xf32> to vector<1x16xf32>
    %391 = vector.broadcast %390 : vector<1x16xf32> to vector<16x16xf32>
    %392 = arith.addf %388, %391 : vector<16x16xf32>
    %c0_280 = arith.constant 0 : index
    %c0_281 = arith.constant 0 : index
    %c0_282 = arith.constant 0 : index
    %c0_283 = arith.constant 0 : index
    %393 = vector.load %arg10[%c0_280, %c0_281, %c0_282, %c0_283] : memref<2x2x32x16xf32, #tpu.memory_space<vmem>>, vector<1x1x32x16xf32>
    %394 = vector.shape_cast %393 : vector<1x1x32x16xf32> to vector<32x16xf32>
    %cst_284 = arith.constant dense<0.000000e+00> : vector<16x16xf32>
    %395 = tpu.matmul %385, %394, %cst_284 {dimension_numbers = #tpu.dot_dimension_numbers<[1], [0], [0], [1], [0, 0, 1, 1], [], []>} : vector<16x32xf32>, vector<32x16xf32>, vector<16x16xf32> -> vector<16x16xf32>
    %c0_285 = arith.constant 0 : index
    %c0_286 = arith.constant 0 : index
    %c0_287 = arith.constant 0 : index
    %c0_288 = arith.constant 0 : index
    %396 = vector.load %arg9[%c0_285, %c0_286, %c0_287, %c0_288] : memref<2x2x1x16xf32, #tpu.memory_space<vmem>>, vector<1x1x1x16xf32>
    %397 = vector.shape_cast %396 : vector<1x1x1x16xf32> to vector<1x16xf32>
    %398 = vector.broadcast %397 : vector<1x16xf32> to vector<16x16xf32>
    %399 = arith.addf %395, %398 : vector<16x16xf32>
    %c0_289 = arith.constant 0 : index
    %c0_290 = arith.constant 0 : index
    %c0_291 = arith.constant 0 : index
    %c0_292 = arith.constant 0 : index
    %400 = vector.load %arg20[%c0_289, %c0_290, %c0_291, %c0_292] : memref<2x2x32x16xf32, #tpu.memory_space<vmem>>, vector<1x1x32x16xf32>
    %401 = vector.shape_cast %400 : vector<1x1x32x16xf32> to vector<32x16xf32>
    %cst_293 = arith.constant dense<0.000000e+00> : vector<16x16xf32>
    %402 = tpu.matmul %385, %401, %cst_293 {dimension_numbers = #tpu.dot_dimension_numbers<[1], [0], [0], [1], [0, 0, 1, 1], [], []>} : vector<16x32xf32>, vector<32x16xf32>, vector<16x16xf32> -> vector<16x16xf32>
    %c0_294 = arith.constant 0 : index
    %c0_295 = arith.constant 0 : index
    %c0_296 = arith.constant 0 : index
    %c0_297 = arith.constant 0 : index
    %403 = vector.load %arg19[%c0_294, %c0_295, %c0_296, %c0_297] : memref<2x2x1x16xf32, #tpu.memory_space<vmem>>, vector<1x1x1x16xf32>
    %404 = vector.shape_cast %403 : vector<1x1x1x16xf32> to vector<1x16xf32>
    %405 = vector.broadcast %404 : vector<1x16xf32> to vector<16x16xf32>
    %406 = arith.addf %402, %405 : vector<16x16xf32>
    %cst_298 = arith.constant dense<0.000000e+00> : vector<16x16xf32>
    %407 = tpu.matmul %392, %399, %cst_298 {dimension_numbers = #tpu.dot_dimension_numbers<[1], [1], [0], [0], [0, 0, 1, 0], [], []>} : vector<16x16xf32>, vector<16x16xf32>, vector<16x16xf32> -> vector<16x16xf32>
    %408 = arith.addf %407, %361 : vector<16x16xf32>
    %cst_299 = arith.constant dense<0xFF800000> : vector<16xf32>
    %409 = vector.multi_reduction <maximumf>, %408, %cst_299 [1] : vector<16x16xf32> to vector<16xf32>
    %410 = vector.shape_cast %409 : vector<16xf32> to vector<16x1xf32>
    %411 = vector.broadcast %410 : vector<16x1xf32> to vector<16x16xf32>
    %412 = arith.subf %408, %411 : vector<16x16xf32>
    %413 = math.exp %412 : vector<16x16xf32>
    %cst_300 = arith.constant dense<0.000000e+00> : vector<16xf32>
    %414 = vector.multi_reduction <add>, %413, %cst_300 [1] : vector<16x16xf32> to vector<16xf32>
    %415 = vector.shape_cast %414 : vector<16xf32> to vector<16x1xf32>
    %416 = tpu.reciprocal %415 {approx = true} : vector<16x1xf32> -> vector<16x1xf32>
    %417 = vector.broadcast %416 : vector<16x1xf32> to vector<16x16xf32>
    %418 = arith.mulf %413, %417 : vector<16x16xf32>
    %cst_301 = arith.constant dense<0.000000e+00> : vector<16x16xf32>
    %419 = tpu.matmul %418, %406, %cst_301 {dimension_numbers = #tpu.dot_dimension_numbers<[1], [0], [0], [1], [0, 0, 1, 1], [], []>} : vector<16x16xf32>, vector<16x16xf32>, vector<16x16xf32> -> vector<16x16xf32>
    %c0_302 = arith.constant 0 : index
    %c0_303 = arith.constant 0 : index
    %c0_304 = arith.constant 0 : index
    %c0_305 = arith.constant 0 : index
    %420 = vector.load %arg16[%c0_302, %c0_303, %c0_304, %c0_305] : memref<2x2x16x32xf32, #tpu.memory_space<vmem>>, vector<1x1x16x32xf32>
    %421 = vector.shape_cast %420 : vector<1x1x16x32xf32> to vector<16x32xf32>
    %cst_306 = arith.constant dense<0.000000e+00> : vector<16x32xf32>
    %422 = tpu.matmul %419, %421, %cst_306 {dimension_numbers = #tpu.dot_dimension_numbers<[1], [0], [0], [1], [0, 0, 1, 1], [], []>} : vector<16x16xf32>, vector<16x32xf32>, vector<16x32xf32> -> vector<16x32xf32>
    %c0_307 = arith.constant 0 : index
    %c1_308 = arith.constant 1 : index
    %c0_309 = arith.constant 0 : index
    %c0_310 = arith.constant 0 : index
    %423 = vector.load %arg18[%c0_307, %c1_308, %c0_309, %c0_310] : memref<2x2x32x16xf32, #tpu.memory_space<vmem>>, vector<1x1x32x16xf32>
    %424 = vector.shape_cast %423 : vector<1x1x32x16xf32> to vector<32x16xf32>
    %cst_311 = arith.constant dense<0.000000e+00> : vector<16x16xf32>
    %425 = tpu.matmul %385, %424, %cst_311 {dimension_numbers = #tpu.dot_dimension_numbers<[1], [0], [0], [1], [0, 0, 1, 1], [], []>} : vector<16x32xf32>, vector<32x16xf32>, vector<16x16xf32> -> vector<16x16xf32>
    %c0_312 = arith.constant 0 : index
    %c1_313 = arith.constant 1 : index
    %c0_314 = arith.constant 0 : index
    %c0_315 = arith.constant 0 : index
    %426 = vector.load %arg17[%c0_312, %c1_313, %c0_314, %c0_315] : memref<2x2x1x16xf32, #tpu.memory_space<vmem>>, vector<1x1x1x16xf32>
    %427 = vector.shape_cast %426 : vector<1x1x1x16xf32> to vector<1x16xf32>
    %428 = vector.broadcast %427 : vector<1x16xf32> to vector<16x16xf32>
    %429 = arith.addf %425, %428 : vector<16x16xf32>
    %c0_316 = arith.constant 0 : index
    %c1_317 = arith.constant 1 : index
    %c0_318 = arith.constant 0 : index
    %c0_319 = arith.constant 0 : index
    %430 = vector.load %arg10[%c0_316, %c1_317, %c0_318, %c0_319] : memref<2x2x32x16xf32, #tpu.memory_space<vmem>>, vector<1x1x32x16xf32>
    %431 = vector.shape_cast %430 : vector<1x1x32x16xf32> to vector<32x16xf32>
    %cst_320 = arith.constant dense<0.000000e+00> : vector<16x16xf32>
    %432 = tpu.matmul %385, %431, %cst_320 {dimension_numbers = #tpu.dot_dimension_numbers<[1], [0], [0], [1], [0, 0, 1, 1], [], []>} : vector<16x32xf32>, vector<32x16xf32>, vector<16x16xf32> -> vector<16x16xf32>
    %c0_321 = arith.constant 0 : index
    %c1_322 = arith.constant 1 : index
    %c0_323 = arith.constant 0 : index
    %c0_324 = arith.constant 0 : index
    %433 = vector.load %arg9[%c0_321, %c1_322, %c0_323, %c0_324] : memref<2x2x1x16xf32, #tpu.memory_space<vmem>>, vector<1x1x1x16xf32>
    %434 = vector.shape_cast %433 : vector<1x1x1x16xf32> to vector<1x16xf32>
    %435 = vector.broadcast %434 : vector<1x16xf32> to vector<16x16xf32>
    %436 = arith.addf %432, %435 : vector<16x16xf32>
    %c0_325 = arith.constant 0 : index
    %c1_326 = arith.constant 1 : index
    %c0_327 = arith.constant 0 : index
    %c0_328 = arith.constant 0 : index
    %437 = vector.load %arg20[%c0_325, %c1_326, %c0_327, %c0_328] : memref<2x2x32x16xf32, #tpu.memory_space<vmem>>, vector<1x1x32x16xf32>
    %438 = vector.shape_cast %437 : vector<1x1x32x16xf32> to vector<32x16xf32>
    %cst_329 = arith.constant dense<0.000000e+00> : vector<16x16xf32>
    %439 = tpu.matmul %385, %438, %cst_329 {dimension_numbers = #tpu.dot_dimension_numbers<[1], [0], [0], [1], [0, 0, 1, 1], [], []>} : vector<16x32xf32>, vector<32x16xf32>, vector<16x16xf32> -> vector<16x16xf32>
    %c0_330 = arith.constant 0 : index
    %c1_331 = arith.constant 1 : index
    %c0_332 = arith.constant 0 : index
    %c0_333 = arith.constant 0 : index
    %440 = vector.load %arg19[%c0_330, %c1_331, %c0_332, %c0_333] : memref<2x2x1x16xf32, #tpu.memory_space<vmem>>, vector<1x1x1x16xf32>
    %441 = vector.shape_cast %440 : vector<1x1x1x16xf32> to vector<1x16xf32>
    %442 = vector.broadcast %441 : vector<1x16xf32> to vector<16x16xf32>
    %443 = arith.addf %439, %442 : vector<16x16xf32>
    %cst_334 = arith.constant dense<0.000000e+00> : vector<16x16xf32>
    %444 = tpu.matmul %429, %436, %cst_334 {dimension_numbers = #tpu.dot_dimension_numbers<[1], [1], [0], [0], [0, 0, 1, 0], [], []>} : vector<16x16xf32>, vector<16x16xf32>, vector<16x16xf32> -> vector<16x16xf32>
    %445 = arith.addf %444, %361 : vector<16x16xf32>
    %cst_335 = arith.constant dense<0xFF800000> : vector<16xf32>
    %446 = vector.multi_reduction <maximumf>, %445, %cst_335 [1] : vector<16x16xf32> to vector<16xf32>
    %447 = vector.shape_cast %446 : vector<16xf32> to vector<16x1xf32>
    %448 = vector.broadcast %447 : vector<16x1xf32> to vector<16x16xf32>
    %449 = arith.subf %445, %448 : vector<16x16xf32>
    %450 = math.exp %449 : vector<16x16xf32>
    %cst_336 = arith.constant dense<0.000000e+00> : vector<16xf32>
    %451 = vector.multi_reduction <add>, %450, %cst_336 [1] : vector<16x16xf32> to vector<16xf32>
    %452 = vector.shape_cast %451 : vector<16xf32> to vector<16x1xf32>
    %453 = tpu.reciprocal %452 {approx = true} : vector<16x1xf32> -> vector<16x1xf32>
    %454 = vector.broadcast %453 : vector<16x1xf32> to vector<16x16xf32>
    %455 = arith.mulf %450, %454 : vector<16x16xf32>
    %cst_337 = arith.constant dense<0.000000e+00> : vector<16x16xf32>
    %456 = tpu.matmul %455, %443, %cst_337 {dimension_numbers = #tpu.dot_dimension_numbers<[1], [0], [0], [1], [0, 0, 1, 1], [], []>} : vector<16x16xf32>, vector<16x16xf32>, vector<16x16xf32> -> vector<16x16xf32>
    %c0_338 = arith.constant 0 : index
    %c1_339 = arith.constant 1 : index
    %c0_340 = arith.constant 0 : index
    %c0_341 = arith.constant 0 : index
    %457 = vector.load %arg16[%c0_338, %c1_339, %c0_340, %c0_341] : memref<2x2x16x32xf32, #tpu.memory_space<vmem>>, vector<1x1x16x32xf32>
    %458 = vector.shape_cast %457 : vector<1x1x16x32xf32> to vector<16x32xf32>
    %cst_342 = arith.constant dense<0.000000e+00> : vector<16x32xf32>
    %459 = tpu.matmul %456, %458, %cst_342 {dimension_numbers = #tpu.dot_dimension_numbers<[1], [0], [0], [1], [0, 0, 1, 1], [], []>} : vector<16x16xf32>, vector<16x32xf32>, vector<16x32xf32> -> vector<16x32xf32>
    %460 = arith.addf %422, %459 : vector<16x32xf32>
    %461 = arith.addf %360, %460 : vector<16x32xf32>
    %c0_343 = arith.constant 0 : index
    %c0_344 = arith.constant 0 : index
    %c0_345 = arith.constant 0 : index
    %462 = vector.load %arg15[%c0_343, %c0_344, %c0_345] : memref<2x1x32xf32, #tpu.memory_space<vmem>>, vector<1x1x32xf32>
    %463 = vector.shape_cast %462 : vector<1x1x32xf32> to vector<1x32xf32>
    %464 = vector.broadcast %463 : vector<1x32xf32> to vector<16x32xf32>
    %465 = arith.addf %461, %464 : vector<16x32xf32>
    %c0_346 = arith.constant 0 : index
    %c0_347 = arith.constant 0 : index
    %c0_348 = arith.constant 0 : index
    %466 = vector.load %arg14[%c0_346, %c0_347, %c0_348] : memref<2x1x32xf32, #tpu.memory_space<vmem>>, vector<1x1x32xf32>
    %467 = vector.shape_cast %466 : vector<1x1x32xf32> to vector<1x32xf32>
    %c0_349 = arith.constant 0 : index
    %c0_350 = arith.constant 0 : index
    %c0_351 = arith.constant 0 : index
    %468 = vector.load %arg13[%c0_349, %c0_350, %c0_351] : memref<2x1x32xf32, #tpu.memory_space<vmem>>, vector<1x1x32xf32>
    %469 = vector.shape_cast %468 : vector<1x1x32xf32> to vector<1x32xf32>
    %cst_352 = arith.constant dense<0.000000e+00> : vector<16xf32>
    %470 = vector.multi_reduction <add>, %465, %cst_352 [1] : vector<16x32xf32> to vector<16xf32>
    %471 = vector.shape_cast %470 : vector<16xf32> to vector<16x1xf32>
    %cst_353 = arith.constant 3.200000e+01 : f32
    %472 = vector.broadcast %cst_353 : f32 to vector<16x1xf32>
    %473 = arith.divf %471, %472 : vector<16x1xf32>
    %474 = vector.broadcast %473 : vector<16x1xf32> to vector<16x32xf32>
    %475 = arith.subf %465, %474 : vector<16x32xf32>
    %476 = arith.mulf %475, %475 : vector<16x32xf32>
    %cst_354 = arith.constant dense<0.000000e+00> : vector<16xf32>
    %477 = vector.multi_reduction <add>, %476, %cst_354 [1] : vector<16x32xf32> to vector<16xf32>
    %478 = vector.shape_cast %477 : vector<16xf32> to vector<16x1xf32>
    %cst_355 = arith.constant 3.200000e+01 : f32
    %479 = vector.broadcast %cst_355 : f32 to vector<16x1xf32>
    %480 = arith.divf %478, %479 : vector<16x1xf32>
    %cst_356 = arith.constant 9.99999974E-6 : f32
    %481 = vector.broadcast %cst_356 : f32 to vector<16x1xf32>
    %482 = arith.addf %480, %481 : vector<16x1xf32>
    %483 = math.rsqrt %482 : vector<16x1xf32>
    %484 = vector.broadcast %483 : vector<16x1xf32> to vector<16x32xf32>
    %485 = arith.mulf %475, %484 : vector<16x32xf32>
    %486 = vector.broadcast %467 : vector<1x32xf32> to vector<16x32xf32>
    %487 = arith.mulf %485, %486 : vector<16x32xf32>
    %488 = vector.broadcast %469 : vector<1x32xf32> to vector<16x32xf32>
    %489 = arith.addf %487, %488 : vector<16x32xf32>
    %c0_357 = arith.constant 0 : index
    %c0_358 = arith.constant 0 : index
    %c0_359 = arith.constant 0 : index
    %490 = vector.load %arg6[%c0_357, %c0_358, %c0_359] : memref<2x32x64xf32, #tpu.memory_space<vmem>>, vector<1x32x64xf32>
    %491 = vector.shape_cast %490 : vector<1x32x64xf32> to vector<32x64xf32>
    %cst_360 = arith.constant dense<0.000000e+00> : vector<16x64xf32>
    %492 = tpu.matmul %489, %491, %cst_360 {dimension_numbers = #tpu.dot_dimension_numbers<[1], [0], [0], [1], [0, 0, 1, 1], [], []>} : vector<16x32xf32>, vector<32x64xf32>, vector<16x64xf32> -> vector<16x64xf32>
    %c0_361 = arith.constant 0 : index
    %c0_362 = arith.constant 0 : index
    %c0_363 = arith.constant 0 : index
    %493 = vector.load %arg5[%c0_361, %c0_362, %c0_363] : memref<2x1x64xf32, #tpu.memory_space<vmem>>, vector<1x1x64xf32>
    %494 = vector.shape_cast %493 : vector<1x1x64xf32> to vector<1x64xf32>
    %495 = vector.broadcast %494 : vector<1x64xf32> to vector<16x64xf32>
    %496 = arith.addf %492, %495 : vector<16x64xf32>
    %cst_364 = arith.constant 1.702000e+00 : f32
    %497 = vector.broadcast %cst_364 : f32 to vector<16x64xf32>
    %498 = arith.mulf %497, %496 : vector<16x64xf32>
    %499 = arith.negf %498 : vector<16x64xf32>
    %500 = math.exp %499 : vector<16x64xf32>
    %cst_365 = arith.constant 1.000000e+00 : f32
    %501 = vector.broadcast %cst_365 : f32 to vector<16x64xf32>
    %502 = arith.addf %501, %500 : vector<16x64xf32>
    %503 = arith.divf %501, %502 : vector<16x64xf32>
    %504 = arith.mulf %496, %503 : vector<16x64xf32>
    %c0_366 = arith.constant 0 : index
    %c0_367 = arith.constant 0 : index
    %c0_368 = arith.constant 0 : index
    %505 = vector.load %arg8[%c0_366, %c0_367, %c0_368] : memref<2x64x32xf32, #tpu.memory_space<vmem>>, vector<1x64x32xf32>
    %506 = vector.shape_cast %505 : vector<1x64x32xf32> to vector<64x32xf32>
    %cst_369 = arith.constant dense<0.000000e+00> : vector<16x32xf32>
    %507 = tpu.matmul %504, %506, %cst_369 {dimension_numbers = #tpu.dot_dimension_numbers<[1], [0], [0], [1], [0, 0, 1, 1], [], []>} : vector<16x64xf32>, vector<64x32xf32>, vector<16x32xf32> -> vector<16x32xf32>
    %c0_370 = arith.constant 0 : index
    %c0_371 = arith.constant 0 : index
    %c0_372 = arith.constant 0 : index
    %508 = vector.load %arg7[%c0_370, %c0_371, %c0_372] : memref<2x1x32xf32, #tpu.memory_space<vmem>>, vector<1x1x32xf32>
    %509 = vector.shape_cast %508 : vector<1x1x32xf32> to vector<1x32xf32>
    %510 = vector.broadcast %509 : vector<1x32xf32> to vector<16x32xf32>
    %511 = arith.addf %507, %510 : vector<16x32xf32>
    %512 = arith.addf %465, %511 : vector<16x32xf32>
    %c1_373 = arith.constant 1 : index
    %c0_374 = arith.constant 0 : index
    %c0_375 = arith.constant 0 : index
    %513 = vector.load %arg12[%c1_373, %c0_374, %c0_375] : memref<2x1x32xf32, #tpu.memory_space<vmem>>, vector<1x1x32xf32>
    %514 = vector.shape_cast %513 : vector<1x1x32xf32> to vector<1x32xf32>
    %c1_376 = arith.constant 1 : index
    %c0_377 = arith.constant 0 : index
    %c0_378 = arith.constant 0 : index
    %515 = vector.load %arg11[%c1_376, %c0_377, %c0_378] : memref<2x1x32xf32, #tpu.memory_space<vmem>>, vector<1x1x32xf32>
    %516 = vector.shape_cast %515 : vector<1x1x32xf32> to vector<1x32xf32>
    %cst_379 = arith.constant dense<0.000000e+00> : vector<16xf32>
    %517 = vector.multi_reduction <add>, %512, %cst_379 [1] : vector<16x32xf32> to vector<16xf32>
    %518 = vector.shape_cast %517 : vector<16xf32> to vector<16x1xf32>
    %cst_380 = arith.constant 3.200000e+01 : f32
    %519 = vector.broadcast %cst_380 : f32 to vector<16x1xf32>
    %520 = arith.divf %518, %519 : vector<16x1xf32>
    %521 = vector.broadcast %520 : vector<16x1xf32> to vector<16x32xf32>
    %522 = arith.subf %512, %521 : vector<16x32xf32>
    %523 = arith.mulf %522, %522 : vector<16x32xf32>
    %cst_381 = arith.constant dense<0.000000e+00> : vector<16xf32>
    %524 = vector.multi_reduction <add>, %523, %cst_381 [1] : vector<16x32xf32> to vector<16xf32>
    %525 = vector.shape_cast %524 : vector<16xf32> to vector<16x1xf32>
    %cst_382 = arith.constant 3.200000e+01 : f32
    %526 = vector.broadcast %cst_382 : f32 to vector<16x1xf32>
    %527 = arith.divf %525, %526 : vector<16x1xf32>
    %cst_383 = arith.constant 9.99999974E-6 : f32
    %528 = vector.broadcast %cst_383 : f32 to vector<16x1xf32>
    %529 = arith.addf %527, %528 : vector<16x1xf32>
    %530 = math.rsqrt %529 : vector<16x1xf32>
    %531 = vector.broadcast %530 : vector<16x1xf32> to vector<16x32xf32>
    %532 = arith.mulf %522, %531 : vector<16x32xf32>
    %533 = vector.broadcast %514 : vector<1x32xf32> to vector<16x32xf32>
    %534 = arith.mulf %532, %533 : vector<16x32xf32>
    %535 = vector.broadcast %516 : vector<1x32xf32> to vector<16x32xf32>
    %536 = arith.addf %534, %535 : vector<16x32xf32>
    %c1_384 = arith.constant 1 : index
    %c0_385 = arith.constant 0 : index
    %c0_386 = arith.constant 0 : index
    %c0_387 = arith.constant 0 : index
    %537 = vector.load %arg18[%c1_384, %c0_385, %c0_386, %c0_387] : memref<2x2x32x16xf32, #tpu.memory_space<vmem>>, vector<1x1x32x16xf32>
    %538 = vector.shape_cast %537 : vector<1x1x32x16xf32> to vector<32x16xf32>
    %cst_388 = arith.constant dense<0.000000e+00> : vector<16x16xf32>
    %539 = tpu.matmul %536, %538, %cst_388 {dimension_numbers = #tpu.dot_dimension_numbers<[1], [0], [0], [1], [0, 0, 1, 1], [], []>} : vector<16x32xf32>, vector<32x16xf32>, vector<16x16xf32> -> vector<16x16xf32>
    %c1_389 = arith.constant 1 : index
    %c0_390 = arith.constant 0 : index
    %c0_391 = arith.constant 0 : index
    %c0_392 = arith.constant 0 : index
    %540 = vector.load %arg17[%c1_389, %c0_390, %c0_391, %c0_392] : memref<2x2x1x16xf32, #tpu.memory_space<vmem>>, vector<1x1x1x16xf32>
    %541 = vector.shape_cast %540 : vector<1x1x1x16xf32> to vector<1x16xf32>
    %542 = vector.broadcast %541 : vector<1x16xf32> to vector<16x16xf32>
    %543 = arith.addf %539, %542 : vector<16x16xf32>
    %c1_393 = arith.constant 1 : index
    %c0_394 = arith.constant 0 : index
    %c0_395 = arith.constant 0 : index
    %c0_396 = arith.constant 0 : index
    %544 = vector.load %arg10[%c1_393, %c0_394, %c0_395, %c0_396] : memref<2x2x32x16xf32, #tpu.memory_space<vmem>>, vector<1x1x32x16xf32>
    %545 = vector.shape_cast %544 : vector<1x1x32x16xf32> to vector<32x16xf32>
    %cst_397 = arith.constant dense<0.000000e+00> : vector<16x16xf32>
    %546 = tpu.matmul %536, %545, %cst_397 {dimension_numbers = #tpu.dot_dimension_numbers<[1], [0], [0], [1], [0, 0, 1, 1], [], []>} : vector<16x32xf32>, vector<32x16xf32>, vector<16x16xf32> -> vector<16x16xf32>
    %c1_398 = arith.constant 1 : index
    %c0_399 = arith.constant 0 : index
    %c0_400 = arith.constant 0 : index
    %c0_401 = arith.constant 0 : index
    %547 = vector.load %arg9[%c1_398, %c0_399, %c0_400, %c0_401] : memref<2x2x1x16xf32, #tpu.memory_space<vmem>>, vector<1x1x1x16xf32>
    %548 = vector.shape_cast %547 : vector<1x1x1x16xf32> to vector<1x16xf32>
    %549 = vector.broadcast %548 : vector<1x16xf32> to vector<16x16xf32>
    %550 = arith.addf %546, %549 : vector<16x16xf32>
    %c1_402 = arith.constant 1 : index
    %c0_403 = arith.constant 0 : index
    %c0_404 = arith.constant 0 : index
    %c0_405 = arith.constant 0 : index
    %551 = vector.load %arg20[%c1_402, %c0_403, %c0_404, %c0_405] : memref<2x2x32x16xf32, #tpu.memory_space<vmem>>, vector<1x1x32x16xf32>
    %552 = vector.shape_cast %551 : vector<1x1x32x16xf32> to vector<32x16xf32>
    %cst_406 = arith.constant dense<0.000000e+00> : vector<16x16xf32>
    %553 = tpu.matmul %536, %552, %cst_406 {dimension_numbers = #tpu.dot_dimension_numbers<[1], [0], [0], [1], [0, 0, 1, 1], [], []>} : vector<16x32xf32>, vector<32x16xf32>, vector<16x16xf32> -> vector<16x16xf32>
    %c1_407 = arith.constant 1 : index
    %c0_408 = arith.constant 0 : index
    %c0_409 = arith.constant 0 : index
    %c0_410 = arith.constant 0 : index
    %554 = vector.load %arg19[%c1_407, %c0_408, %c0_409, %c0_410] : memref<2x2x1x16xf32, #tpu.memory_space<vmem>>, vector<1x1x1x16xf32>
    %555 = vector.shape_cast %554 : vector<1x1x1x16xf32> to vector<1x16xf32>
    %556 = vector.broadcast %555 : vector<1x16xf32> to vector<16x16xf32>
    %557 = arith.addf %553, %556 : vector<16x16xf32>
    %cst_411 = arith.constant dense<0.000000e+00> : vector<16x16xf32>
    %558 = tpu.matmul %543, %550, %cst_411 {dimension_numbers = #tpu.dot_dimension_numbers<[1], [1], [0], [0], [0, 0, 1, 0], [], []>} : vector<16x16xf32>, vector<16x16xf32>, vector<16x16xf32> -> vector<16x16xf32>
    %559 = arith.addf %558, %361 : vector<16x16xf32>
    %cst_412 = arith.constant dense<0xFF800000> : vector<16xf32>
    %560 = vector.multi_reduction <maximumf>, %559, %cst_412 [1] : vector<16x16xf32> to vector<16xf32>
    %561 = vector.shape_cast %560 : vector<16xf32> to vector<16x1xf32>
    %562 = vector.broadcast %561 : vector<16x1xf32> to vector<16x16xf32>
    %563 = arith.subf %559, %562 : vector<16x16xf32>
    %564 = math.exp %563 : vector<16x16xf32>
    %cst_413 = arith.constant dense<0.000000e+00> : vector<16xf32>
    %565 = vector.multi_reduction <add>, %564, %cst_413 [1] : vector<16x16xf32> to vector<16xf32>
    %566 = vector.shape_cast %565 : vector<16xf32> to vector<16x1xf32>
    %567 = tpu.reciprocal %566 {approx = true} : vector<16x1xf32> -> vector<16x1xf32>
    %568 = vector.broadcast %567 : vector<16x1xf32> to vector<16x16xf32>
    %569 = arith.mulf %564, %568 : vector<16x16xf32>
    %cst_414 = arith.constant dense<0.000000e+00> : vector<16x16xf32>
    %570 = tpu.matmul %569, %557, %cst_414 {dimension_numbers = #tpu.dot_dimension_numbers<[1], [0], [0], [1], [0, 0, 1, 1], [], []>} : vector<16x16xf32>, vector<16x16xf32>, vector<16x16xf32> -> vector<16x16xf32>
    %c1_415 = arith.constant 1 : index
    %c0_416 = arith.constant 0 : index
    %c0_417 = arith.constant 0 : index
    %c0_418 = arith.constant 0 : index
    %571 = vector.load %arg16[%c1_415, %c0_416, %c0_417, %c0_418] : memref<2x2x16x32xf32, #tpu.memory_space<vmem>>, vector<1x1x16x32xf32>
    %572 = vector.shape_cast %571 : vector<1x1x16x32xf32> to vector<16x32xf32>
    %cst_419 = arith.constant dense<0.000000e+00> : vector<16x32xf32>
    %573 = tpu.matmul %570, %572, %cst_419 {dimension_numbers = #tpu.dot_dimension_numbers<[1], [0], [0], [1], [0, 0, 1, 1], [], []>} : vector<16x16xf32>, vector<16x32xf32>, vector<16x32xf32> -> vector<16x32xf32>
    %c1_420 = arith.constant 1 : index
    %c1_421 = arith.constant 1 : index
    %c0_422 = arith.constant 0 : index
    %c0_423 = arith.constant 0 : index
    %574 = vector.load %arg18[%c1_420, %c1_421, %c0_422, %c0_423] : memref<2x2x32x16xf32, #tpu.memory_space<vmem>>, vector<1x1x32x16xf32>
    %575 = vector.shape_cast %574 : vector<1x1x32x16xf32> to vector<32x16xf32>
    %cst_424 = arith.constant dense<0.000000e+00> : vector<16x16xf32>
    %576 = tpu.matmul %536, %575, %cst_424 {dimension_numbers = #tpu.dot_dimension_numbers<[1], [0], [0], [1], [0, 0, 1, 1], [], []>} : vector<16x32xf32>, vector<32x16xf32>, vector<16x16xf32> -> vector<16x16xf32>
    %c1_425 = arith.constant 1 : index
    %c1_426 = arith.constant 1 : index
    %c0_427 = arith.constant 0 : index
    %c0_428 = arith.constant 0 : index
    %577 = vector.load %arg17[%c1_425, %c1_426, %c0_427, %c0_428] : memref<2x2x1x16xf32, #tpu.memory_space<vmem>>, vector<1x1x1x16xf32>
    %578 = vector.shape_cast %577 : vector<1x1x1x16xf32> to vector<1x16xf32>
    %579 = vector.broadcast %578 : vector<1x16xf32> to vector<16x16xf32>
    %580 = arith.addf %576, %579 : vector<16x16xf32>
    %c1_429 = arith.constant 1 : index
    %c1_430 = arith.constant 1 : index
    %c0_431 = arith.constant 0 : index
    %c0_432 = arith.constant 0 : index
    %581 = vector.load %arg10[%c1_429, %c1_430, %c0_431, %c0_432] : memref<2x2x32x16xf32, #tpu.memory_space<vmem>>, vector<1x1x32x16xf32>
    %582 = vector.shape_cast %581 : vector<1x1x32x16xf32> to vector<32x16xf32>
    %cst_433 = arith.constant dense<0.000000e+00> : vector<16x16xf32>
    %583 = tpu.matmul %536, %582, %cst_433 {dimension_numbers = #tpu.dot_dimension_numbers<[1], [0], [0], [1], [0, 0, 1, 1], [], []>} : vector<16x32xf32>, vector<32x16xf32>, vector<16x16xf32> -> vector<16x16xf32>
    %c1_434 = arith.constant 1 : index
    %c1_435 = arith.constant 1 : index
    %c0_436 = arith.constant 0 : index
    %c0_437 = arith.constant 0 : index
    %584 = vector.load %arg9[%c1_434, %c1_435, %c0_436, %c0_437] : memref<2x2x1x16xf32, #tpu.memory_space<vmem>>, vector<1x1x1x16xf32>
    %585 = vector.shape_cast %584 : vector<1x1x1x16xf32> to vector<1x16xf32>
    %586 = vector.broadcast %585 : vector<1x16xf32> to vector<16x16xf32>
    %587 = arith.addf %583, %586 : vector<16x16xf32>
    %c1_438 = arith.constant 1 : index
    %c1_439 = arith.constant 1 : index
    %c0_440 = arith.constant 0 : index
    %c0_441 = arith.constant 0 : index
    %588 = vector.load %arg20[%c1_438, %c1_439, %c0_440, %c0_441] : memref<2x2x32x16xf32, #tpu.memory_space<vmem>>, vector<1x1x32x16xf32>
    %589 = vector.shape_cast %588 : vector<1x1x32x16xf32> to vector<32x16xf32>
    %cst_442 = arith.constant dense<0.000000e+00> : vector<16x16xf32>
    %590 = tpu.matmul %536, %589, %cst_442 {dimension_numbers = #tpu.dot_dimension_numbers<[1], [0], [0], [1], [0, 0, 1, 1], [], []>} : vector<16x32xf32>, vector<32x16xf32>, vector<16x16xf32> -> vector<16x16xf32>
    %c1_443 = arith.constant 1 : index
    %c1_444 = arith.constant 1 : index
    %c0_445 = arith.constant 0 : index
    %c0_446 = arith.constant 0 : index
    %591 = vector.load %arg19[%c1_443, %c1_444, %c0_445, %c0_446] : memref<2x2x1x16xf32, #tpu.memory_space<vmem>>, vector<1x1x1x16xf32>
    %592 = vector.shape_cast %591 : vector<1x1x1x16xf32> to vector<1x16xf32>
    %593 = vector.broadcast %592 : vector<1x16xf32> to vector<16x16xf32>
    %594 = arith.addf %590, %593 : vector<16x16xf32>
    %cst_447 = arith.constant dense<0.000000e+00> : vector<16x16xf32>
    %595 = tpu.matmul %580, %587, %cst_447 {dimension_numbers = #tpu.dot_dimension_numbers<[1], [1], [0], [0], [0, 0, 1, 0], [], []>} : vector<16x16xf32>, vector<16x16xf32>, vector<16x16xf32> -> vector<16x16xf32>
    %596 = arith.addf %595, %361 : vector<16x16xf32>
    %cst_448 = arith.constant dense<0xFF800000> : vector<16xf32>
    %597 = vector.multi_reduction <maximumf>, %596, %cst_448 [1] : vector<16x16xf32> to vector<16xf32>
    %598 = vector.shape_cast %597 : vector<16xf32> to vector<16x1xf32>
    %599 = vector.broadcast %598 : vector<16x1xf32> to vector<16x16xf32>
    %600 = arith.subf %596, %599 : vector<16x16xf32>
    %601 = math.exp %600 : vector<16x16xf32>
    %cst_449 = arith.constant dense<0.000000e+00> : vector<16xf32>
    %602 = vector.multi_reduction <add>, %601, %cst_449 [1] : vector<16x16xf32> to vector<16xf32>
    %603 = vector.shape_cast %602 : vector<16xf32> to vector<16x1xf32>
    %604 = tpu.reciprocal %603 {approx = true} : vector<16x1xf32> -> vector<16x1xf32>
    %605 = vector.broadcast %604 : vector<16x1xf32> to vector<16x16xf32>
    %606 = arith.mulf %601, %605 : vector<16x16xf32>
    %cst_450 = arith.constant dense<0.000000e+00> : vector<16x16xf32>
    %607 = tpu.matmul %606, %594, %cst_450 {dimension_numbers = #tpu.dot_dimension_numbers<[1], [0], [0], [1], [0, 0, 1, 1], [], []>} : vector<16x16xf32>, vector<16x16xf32>, vector<16x16xf32> -> vector<16x16xf32>
    %c1_451 = arith.constant 1 : index
    %c1_452 = arith.constant 1 : index
    %c0_453 = arith.constant 0 : index
    %c0_454 = arith.constant 0 : index
    %608 = vector.load %arg16[%c1_451, %c1_452, %c0_453, %c0_454] : memref<2x2x16x32xf32, #tpu.memory_space<vmem>>, vector<1x1x16x32xf32>
    %609 = vector.shape_cast %608 : vector<1x1x16x32xf32> to vector<16x32xf32>
    %cst_455 = arith.constant dense<0.000000e+00> : vector<16x32xf32>
    %610 = tpu.matmul %607, %609, %cst_455 {dimension_numbers = #tpu.dot_dimension_numbers<[1], [0], [0], [1], [0, 0, 1, 1], [], []>} : vector<16x16xf32>, vector<16x32xf32>, vector<16x32xf32> -> vector<16x32xf32>
    %611 = arith.addf %573, %610 : vector<16x32xf32>
    %612 = arith.addf %512, %611 : vector<16x32xf32>
    %c1_456 = arith.constant 1 : index
    %c0_457 = arith.constant 0 : index
    %c0_458 = arith.constant 0 : index
    %613 = vector.load %arg15[%c1_456, %c0_457, %c0_458] : memref<2x1x32xf32, #tpu.memory_space<vmem>>, vector<1x1x32xf32>
    %614 = vector.shape_cast %613 : vector<1x1x32xf32> to vector<1x32xf32>
    %615 = vector.broadcast %614 : vector<1x32xf32> to vector<16x32xf32>
    %616 = arith.addf %612, %615 : vector<16x32xf32>
    %c1_459 = arith.constant 1 : index
    %c0_460 = arith.constant 0 : index
    %c0_461 = arith.constant 0 : index
    %617 = vector.load %arg14[%c1_459, %c0_460, %c0_461] : memref<2x1x32xf32, #tpu.memory_space<vmem>>, vector<1x1x32xf32>
    %618 = vector.shape_cast %617 : vector<1x1x32xf32> to vector<1x32xf32>
    %c1_462 = arith.constant 1 : index
    %c0_463 = arith.constant 0 : index
    %c0_464 = arith.constant 0 : index
    %619 = vector.load %arg13[%c1_462, %c0_463, %c0_464] : memref<2x1x32xf32, #tpu.memory_space<vmem>>, vector<1x1x32xf32>
    %620 = vector.shape_cast %619 : vector<1x1x32xf32> to vector<1x32xf32>
    %cst_465 = arith.constant dense<0.000000e+00> : vector<16xf32>
    %621 = vector.multi_reduction <add>, %616, %cst_465 [1] : vector<16x32xf32> to vector<16xf32>
    %622 = vector.shape_cast %621 : vector<16xf32> to vector<16x1xf32>
    %cst_466 = arith.constant 3.200000e+01 : f32
    %623 = vector.broadcast %cst_466 : f32 to vector<16x1xf32>
    %624 = arith.divf %622, %623 : vector<16x1xf32>
    %625 = vector.broadcast %624 : vector<16x1xf32> to vector<16x32xf32>
    %626 = arith.subf %616, %625 : vector<16x32xf32>
    %627 = arith.mulf %626, %626 : vector<16x32xf32>
    %cst_467 = arith.constant dense<0.000000e+00> : vector<16xf32>
    %628 = vector.multi_reduction <add>, %627, %cst_467 [1] : vector<16x32xf32> to vector<16xf32>
    %629 = vector.shape_cast %628 : vector<16xf32> to vector<16x1xf32>
    %cst_468 = arith.constant 3.200000e+01 : f32
    %630 = vector.broadcast %cst_468 : f32 to vector<16x1xf32>
    %631 = arith.divf %629, %630 : vector<16x1xf32>
    %cst_469 = arith.constant 9.99999974E-6 : f32
    %632 = vector.broadcast %cst_469 : f32 to vector<16x1xf32>
    %633 = arith.addf %631, %632 : vector<16x1xf32>
    %634 = math.rsqrt %633 : vector<16x1xf32>
    %635 = vector.broadcast %634 : vector<16x1xf32> to vector<16x32xf32>
    %636 = arith.mulf %626, %635 : vector<16x32xf32>
    %637 = vector.broadcast %618 : vector<1x32xf32> to vector<16x32xf32>
    %638 = arith.mulf %636, %637 : vector<16x32xf32>
    %639 = vector.broadcast %620 : vector<1x32xf32> to vector<16x32xf32>
    %640 = arith.addf %638, %639 : vector<16x32xf32>
    %c1_470 = arith.constant 1 : index
    %c0_471 = arith.constant 0 : index
    %c0_472 = arith.constant 0 : index
    %641 = vector.load %arg6[%c1_470, %c0_471, %c0_472] : memref<2x32x64xf32, #tpu.memory_space<vmem>>, vector<1x32x64xf32>
    %642 = vector.shape_cast %641 : vector<1x32x64xf32> to vector<32x64xf32>
    %cst_473 = arith.constant dense<0.000000e+00> : vector<16x64xf32>
    %643 = tpu.matmul %640, %642, %cst_473 {dimension_numbers = #tpu.dot_dimension_numbers<[1], [0], [0], [1], [0, 0, 1, 1], [], []>} : vector<16x32xf32>, vector<32x64xf32>, vector<16x64xf32> -> vector<16x64xf32>
    %c1_474 = arith.constant 1 : index
    %c0_475 = arith.constant 0 : index
    %c0_476 = arith.constant 0 : index
    %644 = vector.load %arg5[%c1_474, %c0_475, %c0_476] : memref<2x1x64xf32, #tpu.memory_space<vmem>>, vector<1x1x64xf32>
    %645 = vector.shape_cast %644 : vector<1x1x64xf32> to vector<1x64xf32>
    %646 = vector.broadcast %645 : vector<1x64xf32> to vector<16x64xf32>
    %647 = arith.addf %643, %646 : vector<16x64xf32>
    %cst_477 = arith.constant 1.702000e+00 : f32
    %648 = vector.broadcast %cst_477 : f32 to vector<16x64xf32>
    %649 = arith.mulf %648, %647 : vector<16x64xf32>
    %650 = arith.negf %649 : vector<16x64xf32>
    %651 = math.exp %650 : vector<16x64xf32>
    %cst_478 = arith.constant 1.000000e+00 : f32
    %652 = vector.broadcast %cst_478 : f32 to vector<16x64xf32>
    %653 = arith.addf %652, %651 : vector<16x64xf32>
    %654 = arith.divf %652, %653 : vector<16x64xf32>
    %655 = arith.mulf %647, %654 : vector<16x64xf32>
    %c1_479 = arith.constant 1 : index
    %c0_480 = arith.constant 0 : index
    %c0_481 = arith.constant 0 : index
    %656 = vector.load %arg8[%c1_479, %c0_480, %c0_481] : memref<2x64x32xf32, #tpu.memory_space<vmem>>, vector<1x64x32xf32>
    %657 = vector.shape_cast %656 : vector<1x64x32xf32> to vector<64x32xf32>
    %cst_482 = arith.constant dense<0.000000e+00> : vector<16x32xf32>
    %658 = tpu.matmul %655, %657, %cst_482 {dimension_numbers = #tpu.dot_dimension_numbers<[1], [0], [0], [1], [0, 0, 1, 1], [], []>} : vector<16x64xf32>, vector<64x32xf32>, vector<16x32xf32> -> vector<16x32xf32>
    %c1_483 = arith.constant 1 : index
    %c0_484 = arith.constant 0 : index
    %c0_485 = arith.constant 0 : index
    %659 = vector.load %arg7[%c1_483, %c0_484, %c0_485] : memref<2x1x32xf32, #tpu.memory_space<vmem>>, vector<1x1x32xf32>
    %660 = vector.shape_cast %659 : vector<1x1x32xf32> to vector<1x32xf32>
    %661 = vector.broadcast %660 : vector<1x32xf32> to vector<16x32xf32>
    %662 = arith.addf %658, %661 : vector<16x32xf32>
    %663 = arith.addf %616, %662 : vector<16x32xf32>
    %c0_486 = arith.constant 0 : index
    %c0_487 = arith.constant 0 : index
    %664 = vector.load %arg49[%c0_486, %c0_487] : memref<16x32xf32, #tpu.memory_space<vmem>>, vector<16x32xf32>
    tpu.vector_store %arg49[%c0_486, %c0_487], %663 {strides = array<i32>} : memref<16x32xf32, #tpu.memory_space<vmem>>, vector<16x32xf32>,
    %c0_488 = arith.constant 0 : index
    %665 = memref.load %arg1[%c0_488] : memref<2xi32, #tpu.memory_space<smem>>
    %666 = arith.index_cast %665 : i32 to index
    %c0_489 = arith.constant 0 : index
    %667 = vector.load %arg49[%666, %c0_489] : memref<16x32xf32, #tpu.memory_space<vmem>>, vector<1x32xf32>
    %c1_490 = arith.constant 1 : index
    %668 = memref.load %arg1[%c1_490] : memref<2xi32, #tpu.memory_space<smem>>
    %669 = arith.index_cast %668 : i32 to index
    %c0_491 = arith.constant 0 : index
    %670 = vector.load %arg49[%669, %c0_491] : memref<16x32xf32, #tpu.memory_space<vmem>>, vector<1x32xf32>
    %671 = tpu.concatenate %667, %670 in 0 : vector<1x32xf32>, vector<1x32xf32> -> vector<2x32xf32>
    %c0_492 = arith.constant 0 : index
    %c0_493 = arith.constant 0 : index
    %672 = vector.load %arg4[%c0_492, %c0_493] : memref<1x32xf32, #tpu.memory_space<vmem>>, vector<1x32xf32>
    %c0_494 = arith.constant 0 : index
    %c0_495 = arith.constant 0 : index
    %673 = vector.load %arg3[%c0_494, %c0_495] : memref<1x32xf32, #tpu.memory_space<vmem>>, vector<1x32xf32>
    %cst_496 = arith.constant dense<0.000000e+00> : vector<2xf32>
    %674 = vector.multi_reduction <add>, %671, %cst_496 [1] : vector<2x32xf32> to vector<2xf32>
    %675 = vector.shape_cast %674 : vector<2xf32> to vector<2x1xf32>
    %cst_497 = arith.constant 3.200000e+01 : f32
    %676 = vector.broadcast %cst_497 : f32 to vector<2x1xf32>
    %677 = arith.divf %675, %676 : vector<2x1xf32>
    %678 = vector.broadcast %677 : vector<2x1xf32> to vector<2x32xf32>
    %679 = arith.subf %671, %678 : vector<2x32xf32>
    %680 = arith.mulf %679, %679 : vector<2x32xf32>
    %cst_498 = arith.constant dense<0.000000e+00> : vector<2xf32>
    %681 = vector.multi_reduction <add>, %680, %cst_498 [1] : vector<2x32xf32> to vector<2xf32>
    %682 = vector.shape_cast %681 : vector<2xf32> to vector<2x1xf32>
    %cst_499 = arith.constant 3.200000e+01 : f32
    %683 = vector.broadcast %cst_499 : f32 to vector<2x1xf32>
    %684 = arith.divf %682, %683 : vector<2x1xf32>
    %cst_500 = arith.constant 9.99999974E-6 : f32
    %685 = vector.broadcast %cst_500 : f32 to vector<2x1xf32>
    %686 = arith.addf %684, %685 : vector<2x1xf32>
    %687 = math.rsqrt %686 : vector<2x1xf32>
    %688 = vector.broadcast %687 : vector<2x1xf32> to vector<2x32xf32>
    %689 = arith.mulf %679, %688 : vector<2x32xf32>
    %690 = vector.broadcast %672 : vector<1x32xf32> to vector<2x32xf32>
    %691 = arith.mulf %689, %690 : vector<2x32xf32>
    %692 = vector.broadcast %673 : vector<1x32xf32> to vector<2x32xf32>
    %693 = arith.addf %691, %692 : vector<2x32xf32>
    %c0_501 = arith.constant 0 : index
    %c0_502 = arith.constant 0 : index
    %694 = vector.load %arg21[%c0_501, %c0_502] : memref<32x128xf32, #tpu.memory_space<vmem>>, vector<32x128xf32>
    %cst_503 = arith.constant dense<0.000000e+00> : vector<2x128xf32>
    %695 = tpu.matmul %693, %694, %cst_503 {dimension_numbers = #tpu.dot_dimension_numbers<[1], [0], [0], [1], [0, 0, 1, 1], [], []>} : vector<2x32xf32>, vector<32x128xf32>, vector<2x128xf32> -> vector<2x128xf32>
    %c1_504 = arith.constant 1 : index
    %c0_505 = arith.constant 0 : index
    %c0_506 = arith.constant 0 : index
    %696 = vector.load %arg48[%c1_504, %c0_505, %c0_506] : memref<2x2x128xf32, #tpu.memory_space<vmem>>, vector<1x2x128xf32>
    %697 = vector.shape_cast %696 : vector<1x2x128xf32> to vector<2x128xf32>
    %698 = vector.shape_cast %695 : vector<2x128xf32> to vector<1x2x128xf32>
    tpu.vector_store %arg48[%c1_504, %c0_505, %c0_506], %698 {strides = array<i32>} : memref<2x2x128xf32, #tpu.memory_space<vmem>>, vector<1x2x128xf32>,
    return
  }
  func.func @transform_0(%arg0: i32) -> i32 {
    %c0_i32 = arith.constant 0 : i32
    %c0_i32_0 = arith.constant 0 : i32
    return %c0_i32 : i32
  }
  func.func @transform_1(%arg0: i32) -> (i32, i32) {
    %c0_i32 = arith.constant 0 : i32
    %c0_i32_0 = arith.constant 0 : i32
    %c0_i32_1 = arith.constant 0 : i32
    return %c0_i32, %c0_i32_0 : i32, i32
  }
  func.func @transform_2(%arg0: i32) -> (i32, i32) {
    %c0_i32 = arith.constant 0 : i32
    %c0_i32_0 = arith.constant 0 : i32
    %c0_i32_1 = arith.constant 0 : i32
    return %c0_i32, %c0_i32_0 : i32, i32
  }
  func.func @transform_3(%arg0: i32) -> (i32, i32) {
    %c0_i32 = arith.constant 0 : i32
    %c0_i32_0 = arith.constant 0 : i32
    %c0_i32_1 = arith.constant 0 : i32
    return %c0_i32, %c0_i32_0 : i32, i32
  }
  func.func @transform_4(%arg0: i32) -> (i32, i32, i32) {
    %c0_i32 = arith.constant 0 : i32
    %c0_i32_0 = arith.constant 0 : i32
    %c0_i32_1 = arith.constant 0 : i32
    %c0_i32_2 = arith.constant 0 : i32
    return %c0_i32, %c0_i32_0, %c0_i32_1 : i32, i32, i32
  }
  func.func @transform_5(%arg0: i32) -> (i32, i32, i32) {
    %c0_i32 = arith.constant 0 : i32
    %c0_i32_0 = arith.constant 0 : i32
    %c0_i32_1 = arith.constant 0 : i32
    %c0_i32_2 = arith.constant 0 : i32
    return %c0_i32, %c0_i32_0, %c0_i32_1 : i32, i32, i32
  }
  func.func @transform_6(%arg0: i32) -> (i32, i32, i32) {
    %c0_i32 = arith.constant 0 : i32
    %c0_i32_0 = arith.constant 0 : i32
    %c0_i32_1 = arith.constant 0 : i32
    %c0_i32_2 = arith.constant 0 : i32
    return %c0_i32, %c0_i32_0, %c0_i32_1 : i32, i32, i32
  }
  func.func @transform_7(%arg0: i32) -> (i32, i32, i32) {
    %c0_i32 = arith.constant 0 : i32
    %c0_i32_0 = arith.constant 0 : i32
    %c0_i32_1 = arith.constant 0 : i32
    %c0_i32_2 = arith.constant 0 : i32
    return %c0_i32, %c0_i32_0, %c0_i32_1 : i32, i32, i32
  }
  func.func @transform_8(%arg0: i32) -> (i32, i32, i32, i32) {
    %c0_i32 = arith.constant 0 : i32
    %c0_i32_0 = arith.constant 0 : i32
    %c0_i32_1 = arith.constant 0 : i32
    %c0_i32_2 = arith.constant 0 : i32
    %c0_i32_3 = arith.constant 0 : i32
    return %c0_i32, %c0_i32_0, %c0_i32_1, %c0_i32_2 : i32, i32, i32, i32
  }
  func.func @transform_9(%arg0: i32) -> (i32, i32, i32, i32) {
    %c0_i32 = arith.constant 0 : i32
    %c0_i32_0 = arith.constant 0 : i32
    %c0_i32_1 = arith.constant 0 : i32
    %c0_i32_2 = arith.constant 0 : i32
    %c0_i32_3 = arith.constant 0 : i32
    return %c0_i32, %c0_i32_0, %c0_i32_1, %c0_i32_2 : i32, i32, i32, i32
  }
  func.func @transform_10(%arg0: i32) -> (i32, i32, i32) {
    %c0_i32 = arith.constant 0 : i32
    %c0_i32_0 = arith.constant 0 : i32
    %c0_i32_1 = arith.constant 0 : i32
    %c0_i32_2 = arith.constant 0 : i32
    return %c0_i32, %c0_i32_0, %c0_i32_1 : i32, i32, i32
  }
  func.func @transform_11(%arg0: i32) -> (i32, i32, i32) {
    %c0_i32 = arith.constant 0 : i32
    %c0_i32_0 = arith.constant 0 : i32
    %c0_i32_1 = arith.constant 0 : i32
    %c0_i32_2 = arith.constant 0 : i32
    return %c0_i32, %c0_i32_0, %c0_i32_1 : i32, i32, i32
  }
  func.func @transform_12(%arg0: i32) -> (i32, i32, i32) {
    %c0_i32 = arith.constant 0 : i32
    %c0_i32_0 = arith.constant 0 : i32
    %c0_i32_1 = arith.constant 0 : i32
    %c0_i32_2 = arith.constant 0 : i32
    return %c0_i32, %c0_i32_0, %c0_i32_1 : i32, i32, i32
  }
  func.func @transform_13(%arg0: i32) -> (i32, i32, i32) {
    %c0_i32 = arith.constant 0 : i32
    %c0_i32_0 = arith.constant 0 : i32
    %c0_i32_1 = arith.constant 0 : i32
    %c0_i32_2 = arith.constant 0 : i32
    return %c0_i32, %c0_i32_0, %c0_i32_1 : i32, i32, i32
  }
  func.func @transform_14(%arg0: i32) -> (i32, i32, i32) {
    %c0_i32 = arith.constant 0 : i32
    %c0_i32_0 = arith.constant 0 : i32
    %c0_i32_1 = arith.constant 0 : i32
    %c0_i32_2 = arith.constant 0 : i32
    return %c0_i32, %c0_i32_0, %c0_i32_1 : i32, i32, i32
  }
  func.func @transform_15(%arg0: i32) -> (i32, i32, i32, i32) {
    %c0_i32 = arith.constant 0 : i32
    %c0_i32_0 = arith.constant 0 : i32
    %c0_i32_1 = arith.constant 0 : i32
    %c0_i32_2 = arith.constant 0 : i32
    %c0_i32_3 = arith.constant 0 : i32
    return %c0_i32, %c0_i32_0, %c0_i32_1, %c0_i32_2 : i32, i32, i32, i32
  }
  func.func @transform_16(%arg0: i32) -> (i32, i32, i32, i32) {
    %c0_i32 = arith.constant 0 : i32
    %c0_i32_0 = arith.constant 0 : i32
    %c0_i32_1 = arith.constant 0 : i32
    %c0_i32_2 = arith.constant 0 : i32
    %c0_i32_3 = arith.constant 0 : i32
    return %c0_i32, %c0_i32_0, %c0_i32_1, %c0_i32_2 : i32, i32, i32, i32
  }
  func.func @transform_17(%arg0: i32) -> (i32, i32, i32, i32) {
    %c0_i32 = arith.constant 0 : i32
    %c0_i32_0 = arith.constant 0 : i32
    %c0_i32_1 = arith.constant 0 : i32
    %c0_i32_2 = arith.constant 0 : i32
    %c0_i32_3 = arith.constant 0 : i32
    return %c0_i32, %c0_i32_0, %c0_i32_1, %c0_i32_2 : i32, i32, i32, i32
  }
  func.func @transform_18(%arg0: i32) -> (i32, i32, i32, i32) {
    %c0_i32 = arith.constant 0 : i32
    %c0_i32_0 = arith.constant 0 : i32
    %c0_i32_1 = arith.constant 0 : i32
    %c0_i32_2 = arith.constant 0 : i32
    %c0_i32_3 = arith.constant 0 : i32
    return %c0_i32, %c0_i32_0, %c0_i32_1, %c0_i32_2 : i32, i32, i32, i32
  }
  func.func @transform_19(%arg0: i32) -> (i32, i32, i32, i32) {
    %c0_i32 = arith.constant 0 : i32
    %c0_i32_0 = arith.constant 0 : i32
    %c0_i32_1 = arith.constant 0 : i32
    %c0_i32_2 = arith.constant 0 : i32
    %c0_i32_3 = arith.constant 0 : i32
    return %c0_i32, %c0_i32_0, %c0_i32_1, %c0_i32_2 : i32, i32, i32, i32
  }
  func.func @transform_20(%arg0: i32) -> (i32, i32) {
    %c0_i32 = arith.constant 0 : i32
    %c0_i32_0 = arith.constant 0 : i32
    %c0_i32_1 = arith.constant 0 : i32
    return %c0_i32, %c0_i32_0 : i32, i32
  }
  func.func @transform_21(%arg0: i32) -> (i32, i32) {
    %c0_i32 = arith.constant 0 : i32
    %c0_i32_0 = arith.constant 0 : i32
    %c0_i32_1 = arith.constant 0 : i32
    return %c0_i32, %c0_i32_0 : i32, i32
  }
  func.func @transform_22(%arg0: i32) -> (i32, i32) {
    %c0_i32 = arith.constant 0 : i32
    %c0_i32_0 = arith.constant 0 : i32
    %c0_i32_1 = arith.constant 0 : i32
    return %c0_i32, %c0_i32_0 : i32, i32
  }
  func.func @transform_23(%arg0: i32) -> (i32, i32) {
    %c0_i32 = arith.constant 0 : i32
    %c0_i32_0 = arith.constant 0 : i32
    %c0_i32_1 = arith.constant 0 : i32
    return %c0_i32, %c0_i32_0 : i32, i32
  }
  func.func @transform_24(%arg0: i32) -> (i32, i32) {
    %c0_i32 = arith.constant 0 : i32
    %c0_i32_0 = arith.constant 0 : i32
    %c0_i32_1 = arith.constant 0 : i32
    return %c0_i32, %c0_i32_0 : i32, i32
  }
  func.func @transform_25(%arg0: i32) -> (i32, i32) {
    %c0_i32 = arith.constant 0 : i32
    %c0_i32_0 = arith.constant 0 : i32
    %c0_i32_1 = arith.constant 0 : i32
    return %c0_i32, %c0_i32_0 : i32, i32
  }
  func.func @transform_26(%arg0: i32) -> (i32, i32, i32) {
    %c0_i32 = arith.constant 0 : i32
    %c0_i32_0 = arith.constant 0 : i32
    %c0_i32_1 = arith.constant 0 : i32
    %c0_i32_2 = arith.constant 0 : i32
    return %c0_i32, %c0_i32_0, %c0_i32_1 : i32, i32, i32
  }
  func.func @transform_27(%arg0: i32) -> (i32, i32, i32) {
    %c0_i32 = arith.constant 0 : i32
    %c0_i32_0 = arith.constant 0 : i32
    %c0_i32_1 = arith.constant 0 : i32
    %c0_i32_2 = arith.constant 0 : i32
    return %c0_i32, %c0_i32_0, %c0_i32_1 : i32, i32, i32
  }
  func.func @transform_28(%arg0: i32) -> (i32, i32, i32) {
    %c0_i32 = arith.constant 0 : i32
    %c0_i32_0 = arith.constant 0 : i32
    %c0_i32_1 = arith.constant 0 : i32
    %c0_i32_2 = arith.constant 0 : i32
    return %c0_i32, %c0_i32_0, %c0_i32_1 : i32, i32, i32
  }
  func.func @transform_29(%arg0: i32) -> (i32, i32, i32) {
    %c0_i32 = arith.constant 0 : i32
    %c0_i32_0 = arith.constant 0 : i32
    %c0_i32_1 = arith.constant 0 : i32
    %c0_i32_2 = arith.constant 0 : i32
    return %c0_i32, %c0_i32_0, %c0_i32_1 : i32, i32, i32
  }
  func.func @transform_30(%arg0: i32) -> (i32, i32, i32, i32) {
    %c0_i32 = arith.constant 0 : i32
    %c0_i32_0 = arith.constant 0 : i32
    %c0_i32_1 = arith.constant 0 : i32
    %c0_i32_2 = arith.constant 0 : i32
    %c0_i32_3 = arith.constant 0 : i32
    return %c0_i32, %c0_i32_0, %c0_i32_1, %c0_i32_2 : i32, i32, i32, i32
  }
  func.func @transform_31(%arg0: i32) -> (i32, i32, i32, i32) {
    %c0_i32 = arith.constant 0 : i32
    %c0_i32_0 = arith.constant 0 : i32
    %c0_i32_1 = arith.constant 0 : i32
    %c0_i32_2 = arith.constant 0 : i32
    %c0_i32_3 = arith.constant 0 : i32
    return %c0_i32, %c0_i32_0, %c0_i32_1, %c0_i32_2 : i32, i32, i32, i32
  }
  func.func @transform_32(%arg0: i32) -> (i32, i32, i32) {
    %c0_i32 = arith.constant 0 : i32
    %c0_i32_0 = arith.constant 0 : i32
    %c0_i32_1 = arith.constant 0 : i32
    %c0_i32_2 = arith.constant 0 : i32
    return %c0_i32, %c0_i32_0, %c0_i32_1 : i32, i32, i32
  }
  func.func @transform_33(%arg0: i32) -> (i32, i32, i32) {
    %c0_i32 = arith.constant 0 : i32
    %c0_i32_0 = arith.constant 0 : i32
    %c0_i32_1 = arith.constant 0 : i32
    %c0_i32_2 = arith.constant 0 : i32
    return %c0_i32, %c0_i32_0, %c0_i32_1 : i32, i32, i32
  }
  func.func @transform_34(%arg0: i32) -> (i32, i32, i32) {
    %c0_i32 = arith.constant 0 : i32
    %c0_i32_0 = arith.constant 0 : i32
    %c0_i32_1 = arith.constant 0 : i32
    %c0_i32_2 = arith.constant 0 : i32
    return %c0_i32, %c0_i32_0, %c0_i32_1 : i32, i32, i32
  }
  func.func @transform_35(%arg0: i32) -> (i32, i32, i32) {
    %c0_i32 = arith.constant 0 : i32
    %c0_i32_0 = arith.constant 0 : i32
    %c0_i32_1 = arith.constant 0 : i32
    %c0_i32_2 = arith.constant 0 : i32
    return %c0_i32, %c0_i32_0, %c0_i32_1 : i32, i32, i32
  }
  func.func @transform_36(%arg0: i32) -> (i32, i32, i32) {
    %c0_i32 = arith.constant 0 : i32
    %c0_i32_0 = arith.constant 0 : i32
    %c0_i32_1 = arith.constant 0 : i32
    %c0_i32_2 = arith.constant 0 : i32
    return %c0_i32, %c0_i32_0, %c0_i32_1 : i32, i32, i32
  }
  func.func @transform_37(%arg0: i32) -> (i32, i32, i32, i32) {
    %c0_i32 = arith.constant 0 : i32
    %c0_i32_0 = arith.constant 0 : i32
    %c0_i32_1 = arith.constant 0 : i32
    %c0_i32_2 = arith.constant 0 : i32
    %c0_i32_3 = arith.constant 0 : i32
    return %c0_i32, %c0_i32_0, %c0_i32_1, %c0_i32_2 : i32, i32, i32, i32
  }
  func.func @transform_38(%arg0: i32) -> (i32, i32, i32, i32) {
    %c0_i32 = arith.constant 0 : i32
    %c0_i32_0 = arith.constant 0 : i32
    %c0_i32_1 = arith.constant 0 : i32
    %c0_i32_2 = arith.constant 0 : i32
    %c0_i32_3 = arith.constant 0 : i32
    return %c0_i32, %c0_i32_0, %c0_i32_1, %c0_i32_2 : i32, i32, i32, i32
  }
  func.func @transform_39(%arg0: i32) -> (i32, i32, i32, i32) {
    %c0_i32 = arith.constant 0 : i32
    %c0_i32_0 = arith.constant 0 : i32
    %c0_i32_1 = arith.constant 0 : i32
    %c0_i32_2 = arith.constant 0 : i32
    %c0_i32_3 = arith.constant 0 : i32
    return %c0_i32, %c0_i32_0, %c0_i32_1, %c0_i32_2 : i32, i32, i32, i32
  }
  func.func @transform_40(%arg0: i32) -> (i32, i32, i32, i32) {
    %c0_i32 = arith.constant 0 : i32
    %c0_i32_0 = arith.constant 0 : i32
    %c0_i32_1 = arith.constant 0 : i32
    %c0_i32_2 = arith.constant 0 : i32
    %c0_i32_3 = arith.constant 0 : i32
    return %c0_i32, %c0_i32_0, %c0_i32_1, %c0_i32_2 : i32, i32, i32, i32
  }
  func.func @transform_41(%arg0: i32) -> (i32, i32, i32, i32) {
    %c0_i32 = arith.constant 0 : i32
    %c0_i32_0 = arith.constant 0 : i32
    %c0_i32_1 = arith.constant 0 : i32
    %c0_i32_2 = arith.constant 0 : i32
    %c0_i32_3 = arith.constant 0 : i32
    return %c0_i32, %c0_i32_0, %c0_i32_1, %c0_i32_2 : i32, i32, i32, i32
  }
  func.func @transform_42(%arg0: i32) -> (i32, i32) {
    %c0_i32 = arith.constant 0 : i32
    %c0_i32_0 = arith.constant 0 : i32
    %c0_i32_1 = arith.constant 0 : i32
    return %c0_i32, %c0_i32_0 : i32, i32
  }
  func.func @transform_43(%arg0: i32) -> (i32, i32) {
    %c0_i32 = arith.constant 0 : i32
    %c0_i32_0 = arith.constant 0 : i32
    %c0_i32_1 = arith.constant 0 : i32
    return %c0_i32, %c0_i32_0 : i32, i32
  }
  func.func @transform_44(%arg0: i32) -> (i32, i32) {
    %c0_i32 = arith.constant 0 : i32
    %c0_i32_0 = arith.constant 0 : i32
    %c0_i32_1 = arith.constant 0 : i32
    return %c0_i32, %c0_i32_0 : i32, i32
  }
  func.func @transform_45(%arg0: i32) -> (i32, i32) {
    %c0_i32 = arith.constant 0 : i32
    %c0_i32_0 = arith.constant 0 : i32
    %c0_i32_1 = arith.constant 0 : i32
    return %c0_i32, %c0_i32_0 : i32, i32
  }
  func.func @transform_46(%arg0: i32) -> (i32, i32) {
    %c0_i32 = arith.constant 0 : i32
    %c0_i32_0 = arith.constant 0 : i32
    %c0_i32_1 = arith.constant 0 : i32
    return %c0_i32, %c0_i32_0 : i32, i32
  }
  func.func @transform_47(%arg0: i32) -> (i32, i32, i32) {
    %c0_i32 = arith.constant 0 : i32
    %c0_i32_0 = arith.constant 0 : i32
    %c0_i32_1 = arith.constant 0 : i32
    %c0_i32_2 = arith.constant 0 : i32
    return %c0_i32, %c0_i32_0, %c0_i32_1 : i32, i32, i32
  }
}

</mosaic_0001>

<bundles_post_ra>
// kernel: tile.9
= control target key start
LH: loop header
LB: loop body
LE: loop exit
PB: predicated region body
PF: predicated region fallthrough
CT: control target
= control target key end

     0   :  { %vm3_vm0 = vcmask 261120   ;;  %s34_s0 = inlined_call_operand.vmem [shape: f32[2,5,32], index: 0, kind: input, shape index: {}]   ;;  %s35_s1 = inlined_call_operand.vmem [shape: f32[10,32], index: 1, kind: output, shape index: {}]  }
   0x1   :  { %v2_v0 = vld [vmem:[%s34_s0] sm:$0x1f]   ;;  %v10_v1 = vld [vmem:[%s34_s0 + $0x8] sm:$0x1f]  }
   0x2   :  { %4 = vst.msk [vmem:[%s35_s1] sm:$0x1f] %vm3_vm0, %v2_v0  }
   0x3   :  { %11 = vst.msk [vmem:[%s35_s1 + $0x5] sm:$0x1f] %vm3_vm0, %v10_v1  }

// kernel: clip_forward.1
= control target key start
LH: loop header
LB: loop body
LE: loop exit
PB: predicated region body
PF: predicated region fallthrough
CT: control target
= control target key end

     0   :  { %s3844_s6 = smov 1   ;;  %s3845_s10 = smov 2   ;;  %s4848_s0 = inlined_call_operand.smem [shape: u32[48], index: -1, kind: input, shape index: {}] }
   0x1   :  { %s3901_s5 = sld [smem:[%s4848_s0]]   ;;  %s3846_s14 = smov 3  }
   0x2   :  { %s3906_s9 = sld [smem:[%s4848_s0 + %s3844_s6]]   ;;  %s3847_s18 = smov 4  }
   0x3   :  { %s3911_s13 = sld [smem:[%s4848_s0 + %s3845_s10]]   ;;  %s3848_s22 = smov 5  }
   0x4   :  { %s3916_s17 = sld [smem:[%s4848_s0 + %s3846_s14]]   ;;  %s3849_s26 = smov 6  }
   0x5   :  { %s3921_s21 = sld [smem:[%s4848_s0 + %s3847_s18]]   ;;  %s3850_s30 = smov 7  }
   0x6   :  { %s3926_s25 = sld [smem:[%s4848_s0 + %s3848_s22]]   ;;  %s3851_s4 = smov 8  }
   0x7   :  { %s3931_s29 = sld [smem:[%s4848_s0 + %s3849_s26]]   ;;  %s3852_s10 = smov 9  }
   0x8   :  { %4875 = sst [smem:[#allocation6_spill]] %s3906_s9  ;;  %s3853_s15 = smov 10  }
   0x9   :  { %4876 = sst [smem:[#allocation7_spill]] %s3911_s13  ;;  %s3854_s20 = smov 11  }
   0xa   :  { %4877 = sst [smem:[#allocation8_spill]] %s3916_s17  ;;  %s3855_s26 = smov 12  }
   0xb   :  { %4878 = sst [smem:[#allocation9_spill]] %s3921_s21  ;;  %s3856_s1 = smov 13  }
   0xc   :  { %4879 = sst [smem:[#allocation10_spill]] %s3926_s25  ;;  %s3857_s7 = smov 14  }
   0xd   :  { %4880 = sst [smem:[#allocation11_spill]] %s3931_s29  ;;  %s3859_s22 = smov 16  }
   0xe   :  { %s3936_s3 = sld [smem:[%s4848_s0 + %s3850_s30]]   ;;  %s3860_s28 = smov 17  }
   0xf   :  { %s3941_s8 = sld [smem:[%s4848_s0 + %s3851_s4]]  }
  0x10   :  { %s3946_s14 = sld [smem:[%s4848_s0 + %s3852_s10]]  }
  0x11   :  { %s3951_s19 = sld [smem:[%s4848_s0 + %s3853_s15]]   ;;  %s3858_s15 = smov 15  }
  0x12   :  { %s3956_s24 = sld [smem:[%s4848_s0 + %s3854_s20]]  }
  0x13   :  { %s3961_s30 = sld [smem:[%s4848_s0 + %s3855_s26]]  }
  0x14   :  { %4881 = sst [smem:[#allocation12_spill]] %s3936_s3 }
  0x15   :  { %4882 = sst [smem:[#allocation13_spill]] %s3941_s8 }
  0x16   :  { %4883 = sst [smem:[#allocation14_spill]] %s3946_s14 }
  0x17   :  { %4884 = sst [smem:[#allocation15_spill]] %s3951_s19 }
  0x18   :  { %4885 = sst [smem:[#allocation16_spill]] %s3956_s24 }
  0x19   :  { %4886 = sst [smem:[#allocation17_spill]] %s3961_s30 }
  0x1a   :  { %s3966_s6 = sld [smem:[%s4848_s0 + %s3856_s1]]  }
  0x1b   :  { %s3971_s12 = sld [smem:[%s4848_s0 + %s3857_s7]]   ;;  %s3861_s7 = smov 18  }
  0x1c   :  { %s3976_s20 = sld [smem:[%s4848_s0 + %s3858_s15]]   ;;  %s3862_s15 = smov 19  }
  0x1d   :  { %s3981_s27 = sld [smem:[%s4848_s0 + %s3859_s22]]   ;;  %s3863_s22 = smov 20  }
  0x1e   :  { %s3986_s4 = sld [smem:[%s4848_s0 + %s3860_s28]]   ;;  %s3864_s28 = smov 21  }
  0x1f   :  { %s3991_s13 = sld [smem:[%s4848_s0 + %s3861_s7]]   ;;  %s3865_s7 = smov 22  }
  0x20   :  { %4887 = sst [smem:[#allocation18_spill]] %s3966_s6 }
  0x21   :  { %4888 = sst [smem:[#allocation19_spill]] %s3971_s12 }
  0x22   :  { %4889 = sst [smem:[#allocation20_spill]] %s3976_s20 }
  0x23   :  { %4890 = sst [smem:[#allocation21_spill]] %s3981_s27 }
  0x24   :  { %4891 = sst [smem:[#allocation22_spill]] %s3986_s4 }
  0x25   :  { %4892 = sst [smem:[#allocation23_spill]] %s3991_s13 }
  0x26   :  { %s3996_s17 = sld [smem:[%s4848_s0 + %s3862_s15]]   ;;  %s3866_s15 = smov 23  }
  0x27   :  { %s4001_s29 = sld [smem:[%s4848_s0 + %s3863_s22]]   ;;  %s3867_s22 = smov 24  }
  0x28   :  { %s4006_s21 = sld [smem:[%s4848_s0 + %s3864_s28]]   ;;  %s3868_s28 = smov 25  }
  0x29   :  { %s4011_s3 = sld [smem:[%s4848_s0 + %s3865_s7]]   ;;  %s3869_s7 = smov 26  }
  0x2a   :  { %s4016_s30 = sld [smem:[%s4848_s0 + %s3866_s15]]   ;;  %s3870_s15 = smov 27  }
  0x2b   :  { %s4026_s6 = sld [smem:[%s4848_s0 + %s3868_s28]]   ;;  %s3872_s28 = smov 29  }
  0x2c   :  { %4893 = sst [smem:[#allocation24_spill]] %s3996_s17 }
  0x2d   :  { %4894 = sst [smem:[#allocation25_spill]] %s4001_s29 }
  0x2e   :  { %4895 = sst [smem:[#allocation26_spill]] %s4006_s21 }
  0x2f   :  { %s4021_s29 = sld [smem:[%s4848_s0 + %s3867_s22]]   ;;  %s3871_s22 = smov 28  }
  0x30   :  { %s4031_s25 = sld [smem:[%s4848_s0 + %s3869_s7]]   ;;  %s3873_s7 = smov 30  }
  0x31   :  { %4897 = sst [smem:[#allocation28_spill]] %s4026_s6 }
  0x32   :  { %s4036_s12 = sld [smem:[%s4848_s0 + %s3870_s15]]   ;;  %s3874_s15 = smov 31  }
  0x33   :  { %s4041_s20 = sld [smem:[%s4848_s0 + %s3871_s22]]   ;;  %s3875_s22 = smov 32  }
  0x34   :  { %s4046_s9 = sld [smem:[%s4848_s0 + %s3872_s28]]   ;;  %s3876_s28 = smov 33  }
  0x35   :  { %4896 = sst [smem:[#allocation27_spill]] %s4021_s29 }
  0x36   :  { %4898 = sst [smem:[#allocation29_spill]] %s4031_s25 }
  0x37   :  { %s4051_s27 = sld [smem:[%s4848_s0 + %s3873_s7]]   ;;  %s3877_s7 = smov 34  }
  0x38   :  { %4899 = sst [smem:[#allocation30_spill]] %s4036_s12 }
  0x39   :  { %4900 = sst [smem:[#allocation31_spill]] %s4041_s20 }
  0x3a   :  { %4901 = sst [smem:[#allocation32_spill]] %s4046_s9 }
  0x3b   :  { %s4056_s13 = sld [smem:[%s4848_s0 + %s3874_s15]]   ;;  %s3878_s15 = smov 35  }
  0x3c   :  { %s4061_s8 = sld [smem:[%s4848_s0 + %s3875_s22]]   ;;  %s3879_s22 = smov 36  }
  0x3d   :  { %s4066_s29 = sld [smem:[%s4848_s0 + %s3876_s28]]   ;;  %s3880_s28 = smov 37  }
  0x3e   :  { %s4071_s6 = sld [smem:[%s4848_s0 + %s3877_s7]]   ;;  %s3881_s7 = smov 38  }
  0x3f   :  { %s4076_s4 = sld [smem:[%s4848_s0 + %s3878_s15]]   ;;  %s3882_s15 = smov 39  }
  0x40   :  { %s4081_s19 = sld [smem:[%s4848_s0 + %s3879_s22]]   ;;  %s3883_s22 = smov 40  }
  0x41   :  { %s4086_s24 = sld [smem:[%s4848_s0 + %s3880_s28]]   ;;  %s3884_s28 = smov 41  }
  0x42   :  { %s4091_s17 = sld [smem:[%s4848_s0 + %s3881_s7]]   ;;  %s3885_s7 = smov 42  }
  0x43   :  { %s4096_s14 = sld [smem:[%s4848_s0 + %s3882_s15]]   ;;  %s3886_s15 = smov 43  }
  0x44   :  { %4902 = sst [smem:[#allocation33_spill]] %s4071_s6 }
  0x45   :  { %4903 = sst [smem:[#allocation34_spill]] %s4076_s4 }
  0x46   :  { %4904 = sst [smem:[#allocation35_spill]] %s4081_s19 }
  0x47   :  { %s4101_s21 = sld [smem:[%s4848_s0 + %s3883_s22]]   ;;  %s3887_s22 = smov 44  }
  0x48   :  { %s4106_s20 = sld [smem:[%s4848_s0 + %s3884_s28]]   ;;  %s3888_s28 = smov 45  }
  0x49   :  { %s4111_s25 = sld [smem:[%s4848_s0 + %s3885_s7]]   ;;  %s3889_s7 = smov 46  }
  0x4a   :  { %s4116_s9 = sld [smem:[%s4848_s0 + %s3886_s15]]   ;;  %s3890_s15 = smov 47  }
  0x4b   :  { %s4121_s6 = sld [smem:[%s4848_s0 + %s3887_s22]]  }
  0x4c   :  { %s4126_s4 = sld [smem:[%s4848_s0 + %s3888_s28]]  }
  0x4d   :  { %s4131_s12 = sld [smem:[%s4848_s0 + %s3889_s7]]  }
  0x4e   :  { %s4136_s19 = sld [smem:[%s4848_s0 + %s3890_s15]]  }
  0x4f   :  { %100 = vsyncpa [#allocation4], 0  ;;  %s106_s22 = sshll.u32 %s3901_s5, 4  ;;  %s3834_s28 = scalar_lea.vmem %s3901_s5, 1  ;;  %s107_s22 = int_to_ptr.vmem [resolvable:$true] %s106_s22 }
  0x50   :  { %s3830_s23 = sshra.s32 %s107_s22, 4  ;;  %s3831_s23 = int_to_ptr.vmem [resolvable:$true] %s3830_s23 }
  0x51   :  { %s3832_s26 = scalar_lea.vmem %s3831_s23, 1  ;;  %p3835_p1 = scmp.lt.s32.totalorder %s3831_s23, %s3901_s5 }
  0x52   :  { %p3833_p0 = scmp.ne.s32.totalorder %s3831_s23, %s3832_s26  ;;  %p3836_p2 = scmp.lt.s32.totalorder %s3834_s28, %s3832_s26 }
  0x54   :  { %p3837_p3 = por %p3836_p2, %p3835_p1 }
  0x56   :  { %p3838_p4 = pnand %p3837_p3, %p3833_p0 }
  0x58   :  { %3841 = shalt.err (!%p3838_p4)
}
  0x59   :  { %s3891_s1 = smov [#allocation3]  }
  0x5a   :  { %109 = dma.vmem_to_smem %s107_s22, 16, %s3891_s1, [#allocation4]  }
  0x5b   :  { %3842 = dma.done.wait [#allocation4], 16  }
  0x5c   :  { %3843 = vsyncadd [#allocation4], 4294967280 }
  0x5d   :  { %206 = sfence }
  0x5e   :  { %v226_v0 = vld [vmem:[%s4111_s25 + $0x78] sm:$0xff]  ;;  %v225_v1 = vld [vmem:[%s4111_s25 + $0x70] sm:$0xff]  ;;  %v224_v2 = vld [vmem:[%s4111_s25 + $0x68] sm:$0xff]  ;;  %vm237_vm0 = vcmask 523264   ;;  %vm292_vm1 = vcmask 261120   ;;  %vm296_vm2 = vcmask 254976  }
  0x5f   :  { %244 = vmatpush.msra.mxu0 %v226_v0  ;;  %v234_v3 = vld [vmem:[%s4111_s25 + $0xb8] sm:$0xff]  ;;  %v223_v4 = vld [vmem:[%s4111_s25 + $0x60] sm:$0xff]  ;;  %v233_v5 = vld [vmem:[%s4111_s25 + $0xb0] sm:$0xff]  ;;  %v3892_v40 = vmov 32.0   ;;  %s4905_s0 = sld [smem:[#allocation35_spill]] }
  0x60   :  { %275 = vmatpush.msra.mxu1 %v234_v3  ;;  %v232_v6 = vld [vmem:[%s4111_s25 + $0xa8] sm:$0xff]  ;;  %v222_v7 = vld [vmem:[%s4111_s25 + $0x58] sm:$0xff]  ;;  %v231_v8 = vld [vmem:[%s4111_s25 + $0xa0] sm:$0xff]  ;;  %3692 = vrcp.f32 %v3892_v40  ;;  %s4906_s5 = sld [smem:[#allocation30_spill]] }
  0x61   :  { %245 = vmatpush.msra.mxu0 %v225_v1  ;;  %v221_v9 = vld [vmem:[%s4111_s25 + $0x50] sm:$0xff]  ;;  %v220_v10 = vld [vmem:[%s4111_s25 + $0x48] sm:$0xff]  ;;  %v230_v11 = vld [vmem:[%s4111_s25 + $0x98] sm:$0xff]  ;;  %s4923_s2 = sld [smem:[#allocation6_spill]] }
  0x62   :  { %276 = vmatpush.msra.mxu1 %v233_v5  ;;  %v229_v12 = vld [vmem:[%s4111_s25 + $0x90] sm:$0xff]  ;;  %v219_v13 = vld [vmem:[%s4111_s25 + $0x40] sm:$0xff]  ;;  %v228_v14 = vld [vmem:[%s4111_s25 + $0x88] sm:$0xff]  ;;  %s4924_s7 = sld [smem:[#allocation20_spill]] }
  0x63   :  { %246 = vmatpush.msra.mxu0 %v224_v2  ;;  %v218_v15 = vld [vmem:[%s4111_s25 + $0x38] sm:$0xff]  ;;  %v227_v16 = vld [vmem:[%s4111_s25 + $0x80] sm:$0xff]  ;;  %v217_v17 = vld [vmem:[%s4111_s25 + $0x30] sm:$0xff]  ;;  %s4925_s10 = sld [smem:[#allocation19_spill]] }
  0x64   :  { %277 = vmatpush.msra.mxu1 %v232_v6  ;;  %v208_v18 = vld [vmem:[%s4116_s9 + $0x8] sm:$0xff]  ;;  %v215_v20 = vld [vmem:[%s4111_s25 + $0x20] sm:$0xff]  ;;  %v214_v21 = vld [vmem:[%s4111_s25 + $0x18] sm:$0xff]  ;;  %s4926_s11 = sld [smem:[#allocation10_spill]] }
  0x65   :  { %247 = vmatpush.msra.mxu0 %v223_v4  ;;  %v216_v19 = vld [vmem:[%s4111_s25 + $0x28] sm:$0xff]  ;;  %v213_v22 = vld [vmem:[%s4111_s25 + $0x10] sm:$0xff]  ;;  %v210_v23 = vld [vmem:[%s4116_s9 + $0x18] sm:$0x3]  ;;  %s4927_s15 = sld [smem:[#allocation18_spill]] }
  0x66   :  { %278 = vmatpush.msra.mxu1 %v231_v8  ;;  %v212_v24 = vld [vmem:[%s4111_s25 + $0x8] sm:$0xff]  ;;  %v211_v25 = vld [vmem:[%s4111_s25] sm:$0xff]  ;;  %v209_v27 = vld [vmem:[%s4116_s9 + $0x10] sm:$0x3]  ;;  %v3693_v41 = vpop.eup %3692  ;;  %s4908_s25 = sld [smem:[#allocation33_spill]] }
  0x67   :  { %248 = vmatpush.msra.mxu0 %v222_v7  ;;  %v207_v26 = vld [vmem:[%s4116_s9] sm:$0xff]  ;;  %v236_v34 = vld [vmem:[%s4016_s30 + $0x8] sm:$0x3]  ;;  %v301_v42 = vmul.f32 32.0, %v3693_v41  ;;  %vm305_vm3 = vweird.f32 %v3693_v41  ;;  %s4907_s9 = sld [smem:[#allocation34_spill]] }
  0x68   :  { %279 = vmatpush.msra.mxu1 %v230_v11  ;;  %v235_v28 = vld [vmem:[%s4016_s30] sm:$0xff]  ;;  %v451_v40 = vld [vmem:[%s4056_s13 + $0x8] sm:$0xff]  ;;  %s4910_s30 = sld [smem:[#allocation29_spill]] }
  0x69   :  { %249 = vmatpush.msra.mxu0 %v221_v9  ;;  %v302_v43 = vsub.f32 1.0, %v301_v42  ;;  %v3634_v7 = vld [vmem:[%s4126_s4] ss:$0 sm:$0xff]  ;;  %s4922_s4 = sld [smem:[#allocation21_spill]] }
  0x6a   :  { %280 = vmatpush.msra.mxu1 %v229_v12  ;;  %v3635_v11 = vld [vmem:[%s4121_s6] ss:$0 sm:$0xff]  ;;  %s4911_s6 = sld [smem:[#allocation31_spill]] }
  0x6b   :  { %250 = vmatpush.msra.mxu0 %v220_v10  ;;  %v303_v44 = vmul.f32 %v3693_v41, %v302_v43  ;;  %v413_v42 = vld [vmem:[%s4096_s14] sm:$0xff]  ;;  %s4928_s16 = sld [smem:[#allocation17_spill]] }
  0x6c   :  { %281 = vmatpush.msra.mxu1 %v228_v14  ;;  %v450_v43 = vld [vmem:[%s4056_s13] sm:$0xff]  ;;  %s4929_s18 = sld [smem:[#allocation12_spill]] }
  0x6d   :  { %251 = vmatpush.msra.mxu0 %v219_v13  ;;  %v304_v45 = vadd.f32 %v3693_v41, %v303_v44  ;;  %v3328_v44 = vld [vmem:[%s4106_s20 + $0x20] sm:$0xff]  ;;  %s4930_s22 = sld [smem:[#allocation9_spill]] }
  0x6e   :  { %282 = vmatpush.msra.mxu1 %v227_v16  ;;  %s4931_s23 = sld [smem:[#allocation11_spill]] }
  0x6f   :  { %252 = vmatpush.msra.mxu0 %v218_v15  ;;  %3299 = vmatmul.msk.f32.vlgmr.msra.gmra.mxu1 %vm237_vm0, %v208_v18  ;;  %v4175_v46 = vsel %vm305_vm3, %v3693_v41, %v304_v45  ;;  %v3329_v41 = vld [vmem:[%s4106_s20 + $0x28] sm:$0xff]  ;;  %vm578_vm3 = vcmask 1041408   ;;  %s3582_s26 = sld [smem:[#allocation3 + $0x1]] }
  0x70   :  { %s3174_s28 = sld [smem:[#allocation3]] }
  0x71   :  { %253 = vmatpush.msra.mxu0 %v217_v17  ;;  %s4932_s1 = sld [smem:[#allocation25_spill]] }
  0x73   :  { %254 = vmatpush.msra.mxu0 %v216_v19 }
  0x75   :  { %255 = vmatpush.msra.mxu0 %v215_v20 }
  0x77   :  { %256 = vmatpush.msra.mxu0 %v214_v21  ;;  %3300 = vmatmul.msk.f32.gmra.mxu1 %vm237_vm0, %v210_v23 }
  0x79   :  { %257 = vmatpush.msra.mxu0 %v213_v22 }
  0x7b   :  { %258 = vmatpush.msra.mxu0 %v212_v24 }
  0x7d   :  { %259 = vmatpush.msra.mxu0 %v211_v25 }
  0x7e   :  { %260 = vmatmul.f32.vlgmr.msra.gmra.mxu0 %v207_v26 }
  0x86   :  { %263 = vmatmul.f32.gmra.mxu0 %v209_v27 }
  0xec   :  { %v284_v29 = vpop.f32.mrf.mxu1 }
  0xf4   :  { %v287_v36 = vpop.f32.mrf.mxu1 }
  0xfb   :  { %v261_v30 = vpop.f32.mrf.mxu0 }
  0xfc   :  { %v262_v31 = vadd.f32 %v261_v30, %v235_v28 }
  0xfe   :  { %v285_v32 = vadd.f32 %v284_v29, %v262_v31 }
 0x100   :  { %v293_v33 = vsel %vm292_vm1, %v285_v32, 0.0 }
 0x101   :  { %294 = vadd.xlane.f32.xlu0 %v293_v33  ;;  %v416_v33 = vld [vmem:[%s4096_s14 + $0x18] sm:$0xff] }
 0x102   :  { %439 = vmatpush.msra.mxu2 %v416_v33  ;;  %v3324_v33 = vld [vmem:[%s4056_s13 + $0x38] sm:$0xff] }
 0x103   :  { %v264_v35 = vpop.f32.mrf.mxu0 }
 0x104   :  { %v265_v37 = vadd.f32 %v264_v35, %v236_v34  ;;  %v453_v34 = vld [vmem:[%s4056_s13 + $0x18] sm:$0xff] }
 0x105   :  { %v3331_v35 = vld [vmem:[%s4106_s20 + $0x38] sm:$0xff]  ;;  %470 = vmatpush.msra.mxu3 %v453_v34 }
 0x106   :  { %v288_v38 = vadd.f32 %v287_v36, %v265_v37  ;;  %695 = vmatpush.msrb.mxu0 %v3331_v35  ;;  %v415_v36 = vld [vmem:[%s4096_s14 + $0x10] sm:$0xff] }
 0x107   :  { %v452_v37 = vld [vmem:[%s4056_s13 + $0x10] sm:$0xff]  ;;  %440 = vmatpush.msra.mxu2 %v415_v36 }
 0x108   :  { %v297_v39 = vsel %vm296_vm2, %v288_v38, 0.0  ;;  %471 = vmatpush.msra.mxu3 %v452_v37  ;;  %v3323_v36 = vld [vmem:[%s4056_s13 + $0x30] sm:$0xff]  ;;  %v3322_v37 = vld [vmem:[%s4056_s13 + $0x28] sm:$0xff] }
 0x109   :  { %298 = vadd.xlane.f32.xlu0 %v297_v39  ;;  %v414_v39 = vld [vmem:[%s4096_s14 + $0x8] sm:$0xff] }
 0x10a   :  { %441 = vmatpush.msra.mxu2 %v414_v39  ;;  %472 = vmatpush.msra.mxu3 %v451_v40  ;;  %v3641_v39 = vld [vmem:[%s4101_s21] ss:$0 sm:$0xff] }
 0x10c   :  { %442 = vmatpush.msra.mxu2 %v413_v42  ;;  %473 = vmatpush.msra.mxu3 %v450_v43 }
 0x174   :  { %v295_v47 = vpop.xlane.xlu0 %294 }
 0x175   :  { %v307_v48 = vmul.f32 %v4175_v46, %v295_v47 }
 0x177   :  { %v309_v49 = vsub.f32 %v285_v32, %v307_v48 }
 0x179   :  { %v311_v50 = vmul.f32 %v309_v49, %v309_v49 }
 0x17b   :  { %v313_v51 = vsel %vm292_vm1, %v311_v50, 0.0  ;;  %v483_v50 = vld [vmem:[%s4106_s20 + $0x10] sm:$0xff] }
 0x17c   :  { %314 = vadd.xlane.f32.xlu1 %v313_v51  ;;  %v299_v52 = vpop.xlane.xlu0 %298 }
 0x17d   :  { %v308_v53 = vmul.f32 %v4175_v46, %v299_v52  ;;  %v482_v52 = vld [vmem:[%s4106_s20 + $0x8] sm:$0xff] }
 0x17f   :  { %v310_v54 = vsub.f32 %v288_v38, %v308_v53  ;;  %v3330_v38 = vld [vmem:[%s4106_s20 + $0x30] sm:$0xff] }
 0x180   :  { %696 = vmatpush.msrb.mxu0 %v3330_v38  ;;  %v3321_v38 = vld [vmem:[%s4056_s13 + $0x20] sm:$0xff] }
 0x181   :  { %v312_v55 = vmul.f32 %v310_v54, %v310_v54 }
 0x182   :  { %697 = vmatpush.msrb.mxu0 %v3329_v41 }
 0x183   :  { %v316_v56 = vsel %vm296_vm2, %v312_v55, 0.0 }
 0x184   :  { %317 = vadd.xlane.f32.xlu1 %v316_v56  ;;  %698 = vmatpush.msrb.mxu0 %v3328_v44  ;;  %v4268_v44 = vld [vmem:[%s4011_s3] sm:$0xff] }
 0x1ef   :  { %v315_v57 = vpop.xlane.xlu1 %314 }
 0x1f0   :  { %v319_v58 = vmul.f32 %v315_v57, %v4175_v46 }
 0x1f2   :  { %v321_v59 = vadd.f32 1e-05, %v319_v58 }
 0x1f4   :  { %3694 = vrsqrt.f32 %v321_v59  ;;  %vm329_vm5 = vweird.f32 %v321_v59 }
 0x1f7   :  { %v318_v60 = vpop.xlane.xlu1 %317 }
 0x1f8   :  { %v320_v61 = vmul.f32 %v318_v60, %v4175_v46 }
 0x1fa   :  { %v3695_v62 = vpop.eup %3694  ;;  %v322_v63 = vadd.f32 1e-05, %v320_v61 }
 0x1fb   :  { %v324_v0 = vmul.f32 %v3695_v62, %v321_v59  ;;  %vm330_vm4 = vweird.f32 %v3695_v62 }
 0x1fc   :  { %3696 = vrsqrt.f32 %v322_v63  ;;  %vm331_vm6 = vmor %vm329_vm5, %vm330_vm4  ;;  %vm339_vm8 = vweird.f32 %v322_v63  ;;  %vm512_vm4 = vcmask 130048   ;;  %vm548_vm5 = vcmask 80896  }
 0x1fd   :  { %v325_v1 = vmul.f32 %v3695_v62, %v324_v0  ;;  %v3636_v0 = vld [vmem:[%s4066_s29] ss:$0 sm:$0xff] }
 0x1ff   :  { %v326_v2 = vmul.f32 0.5, %v325_v1 }
 0x201   :  { %v327_v3 = vsub.f32 1.5, %v326_v2 }
 0x202   :  { %v3697_v4 = vpop.eup %3696 }
 0x203   :  { %v328_v5 = vmul.f32 %v3695_v62, %v327_v3  ;;  %v334_v6 = vmul.f32 %v3697_v4, %v322_v63  ;;  %vm340_vm7 = vweird.f32 %v3697_v4  ;;  %v3637_v3 = vld [vmem:[%s4061_s8] ss:$0 sm:$0xff] }
 0x204   :  { %vm341_vm9 = vmor %vm339_vm8, %vm340_vm7 }
 0x205   :  { %v332_v8 = vsel %vm331_vm6, %v3695_v62, %v328_v5  ;;  %v335_v9 = vmul.f32 %v3697_v4, %v334_v6  ;;  %vm552_vm6 = vcmask 74752  }
 0x206   :  { %v343_v10 = vmul.f32 %v332_v8, %v309_v49  ;;  %v484_v49 = vld [vmem:[%s4106_s20 + $0x18] sm:$0xff] }
 0x207   :  { %v336_v12 = vmul.f32 0.5, %v335_v9  ;;  %501 = vmatpush.msrb.mxu2 %v484_v49  ;;  %v3317_v9 = vld [vmem:[%s4096_s14 + $0x38] sm:$0xff]  ;;  %v4273_v49 = vld [vmem:[%s4011_s3 + $0x8] sm:$0x3]  ;;  %s4909_s3 = sld [smem:[#allocation32_spill]] }
 0x208   :  { %v348_v13 = vmul.f32 %v3634_v7, %v343_v10 }
 0x209   :  { %v337_v14 = vsub.f32 1.5, %v336_v12  ;;  %502 = vmatpush.msrb.mxu2 %v483_v50 }
 0x20a   :  { %v4185_v15 = vadd.f32 %v3635_v11, %v348_v13 }
 0x20b   :  { %v338_v16 = vmul.f32 %v3697_v4, %v337_v14  ;;  %503 = vmatpush.msrb.mxu2 %v482_v52  ;;  %v3315_v14 = vld [vmem:[%s4096_s14 + $0x28] sm:$0xff] }
 0x20c   :  { %v359_v17 = vsel %vm292_vm1, %v4185_v15, 0.0 }
 0x20d   :  { %v342_v18 = vsel %vm341_vm9, %v3697_v4, %v338_v16  ;;  %360 = vadd.xlane.f32.xlu2 %v359_v17  ;;  %v3314_v17 = vld [vmem:[%s4096_s14 + $0x20] sm:$0xff] }
 0x20e   :  { %v344_v19 = vmul.f32 %v342_v18, %v310_v54  ;;  %v481_v54 = vld [vmem:[%s4106_s20] sm:$0xff] }
 0x20f   :  { %504 = vmatpush.msrb.mxu2 %v481_v54  ;;  %v3643_v54 = vld [vmem:[%s4051_s27 + $0x1] ss:$0 sm:$0xff] }
 0x210   :  { %v349_v20 = vmul.f32 %v3634_v7, %v344_v19 }
 0x212   :  { %v4189_v21 = vadd.f32 %v3635_v11, %v349_v20  ;;  %v3316_v11 = vld [vmem:[%s4096_s14 + $0x30] sm:$0xff] }
 0x214   :  { %v362_v22 = vsel %vm296_vm2, %v4189_v21, 0.0 }
 0x215   :  { %363 = vadd.xlane.f32.xlu2 %v362_v22 }
 0x280   :  { %v361_v23 = vpop.xlane.xlu2 %360 }
 0x281   :  { %v365_v24 = vmul.f32 %v361_v23, %v4175_v46  ;;  %v3638_v23 = vld [vmem:[%s4101_s21 + $0x1] ss:$0 sm:$0xff] }
 0x283   :  { %v4195_v25 = vsub.f32 %v4185_v15, %v365_v24 }
 0x285   :  { %v369_v26 = vmul.f32 %v4195_v25, %v4195_v25 }
 0x287   :  { %v371_v27 = vsel %vm292_vm1, %v369_v26, 0.0 }
 0x288   :  { %372 = vadd.xlane.f32.xlu0 %v371_v27  ;;  %v364_v28 = vpop.xlane.xlu2 %363  ;;  %v3640_v27 = vld [vmem:[%s4051_s27] ss:$0 sm:$0xff] }
 0x289   :  { %v366_v29 = vmul.f32 %v364_v28, %v4175_v46 }
 0x28b   :  { %v4202_v30 = vsub.f32 %v4189_v21, %v366_v29 }
 0x28d   :  { %v370_v31 = vmul.f32 %v4202_v30, %v4202_v30 }
 0x28f   :  { %v374_v32 = vsel %vm296_vm2, %v370_v31, 0.0  ;;  %v3639_v31 = vld [vmem:[%s4091_s17] ss:$0 sm:$0xff] }
 0x290   :  { %375 = vadd.xlane.f32.xlu1 %v374_v32 }
 0x2fb   :  { %v373_v45 = vpop.xlane.xlu0 %372 }
 0x2fc   :  { %v377_v47 = vmul.f32 %v373_v45, %v4175_v46 }
 0x2fe   :  { %v379_v48 = vadd.f32 1e-05, %v377_v47 }
 0x300   :  { %3698 = vrsqrt.f32 %v379_v48  ;;  %vm387_vm11 = vweird.f32 %v379_v48 }
 0x303   :  { %v376_v51 = vpop.xlane.xlu1 %375 }
 0x304   :  { %v378_v53 = vmul.f32 %v376_v51, %v4175_v46 }
 0x306   :  { %v3699_v55 = vpop.eup %3698  ;;  %v380_v56 = vadd.f32 1e-05, %v378_v53 }
 0x307   :  { %v382_v57 = vmul.f32 %v3699_v55, %v379_v48  ;;  %vm388_vm10 = vweird.f32 %v3699_v55 }
 0x308   :  { %3700 = vrsqrt.f32 %v380_v56  ;;  %vm389_vm12 = vmor %vm387_vm11, %vm388_vm10  ;;  %vm397_vm14 = vweird.f32 %v380_v56 }
 0x309   :  { %v383_v58 = vmul.f32 %v3699_v55, %v382_v57 }
 0x30b   :  { %v384_v59 = vmul.f32 0.5, %v383_v58 }
 0x30d   :  { %v385_v60 = vsub.f32 1.5, %v384_v59 }
 0x30e   :  { %v3701_v61 = vpop.eup %3700 }
 0x30f   :  { %v386_v62 = vmul.f32 %v3699_v55, %v385_v60  ;;  %v392_v63 = vmul.f32 %v3701_v61, %v380_v56  ;;  %vm398_vm13 = vweird.f32 %v3701_v61 }
 0x310   :  { %vm399_vm15 = vmor %vm397_vm14, %vm398_vm13 }
 0x311   :  { %v390_v1 = vsel %vm389_vm12, %v3699_v55, %v386_v62  ;;  %v393_v2 = vmul.f32 %v3701_v61, %v392_v63 }
 0x312   :  { %v401_v4 = vmul.f32 %v390_v1, %v4195_v25 }
 0x313   :  { %v394_v5 = vmul.f32 0.5, %v393_v2 }
 0x314   :  { %v406_v6 = vmul.f32 %v3636_v0, %v401_v4 }
 0x315   :  { %v395_v7 = vsub.f32 1.5, %v394_v5  ;;  %v606_v5 = vld [vmem:[%s4086_s24 + $0x8] sm:$0xff] }
 0x316   :  { %v4228_v8 = vadd.f32 %v3637_v3, %v406_v6  ;;  %847 = vmatpush.msra.mxu0 %v606_v5 }
 0x317   :  { %v396_v10 = vmul.f32 %v3701_v61, %v395_v7 }
 0x318   :  { %3301 = vmatmul.msk.f32.vlgmr.msra.gmra.mxu2 %vm292_vm1, %v4228_v8  ;;  %3303 = vmatmul.msk.f32.vlgmr.msra.gmra.mxu3 %vm292_vm1, %v4228_v8 }
 0x319   :  { %v400_v12 = vsel %vm399_vm15, %v3701_v61, %v396_v10  ;;  %3333 = vmatmul.msk.f32.vlgmr.msrb.gmra.mxu0 %vm292_vm1, %v4228_v8  ;;  %629 = vmatpush.msra.mxu2 %v3317_v9 }
 0x31a   :  { %v402_v13 = vmul.f32 %v400_v12, %v4202_v30  ;;  %v3642_v12 = vld [vmem:[%s4091_s17 + $0x1] ss:$0 sm:$0xff] }
 0x31b   :  { %630 = vmatpush.msra.mxu2 %v3316_v11 }
 0x31c   :  { %v407_v16 = vmul.f32 %v3636_v0, %v402_v13 }
 0x31d   :  { %631 = vmatpush.msra.mxu2 %v3315_v14 }
 0x31e   :  { %v412_v18 = vadd.f32 %v3637_v3, %v407_v16 }
 0x31f   :  { %632 = vmatpush.msra.mxu2 %v3314_v17  ;;  %v605_v17 = vld [vmem:[%s4086_s24] sm:$0xff] }
 0x320   :  { %3302 = vmatmul.msk.f32.gmra.mxu2 %vm292_vm1, %v412_v18  ;;  %3304 = vmatmul.msk.f32.gmra.mxu3 %vm292_vm1, %v412_v18 }
 0x321   :  { %3334 = vmatmul.msk.f32.gmra.mxu0 %vm292_vm1, %v412_v18 }
 0x322   :  { %848 = vmatpush.msra.mxu0 %v605_v17 }
 0x328   :  { %3305 = vmatmul.msk.f32.vlgmr.msrb.gmra.mxu2 %vm292_vm1, %v4228_v8 }
 0x330   :  { %3306 = vmatmul.msk.f32.gmra.mxu2 %vm292_vm1, %v412_v18 }
 0x338   :  { %3319 = vmatmul.msk.f32.vlgmr.msra.gmra.mxu2 %vm292_vm1, %v4228_v8 }
 0x340   :  { %3320 = vmatmul.msk.f32.gmra.mxu2 %vm292_vm1, %v412_v18 }
 0x396   :  { %v700_v19 = vpop.f32.mrf.mxu0 }
 0x397   :  { %v701_v26 = vadd.f32 %v3638_v23, %v700_v19 }
 0x39b   :  { %v444_v20 = vpop.f32.mrf.mxu2  ;;  %v475_v22 = vpop.f32.mrf.mxu3 }
 0x39c   :  { %v476_v32 = vadd.f32 %v3640_v27, %v475_v22  ;;  %v445_v34 = vadd.f32 %v3639_v31, %v444_v20 }
 0x39e   :  { %v703_v24 = vpop.f32.mrf.mxu0 }
 0x39f   :  { %v704_v25 = vadd.f32 %v3638_v23, %v703_v24 }
 0x3a1   :  { %3339 = vmatpush.msk.msrb.mxu2 %vm578_vm3, %v704_v25 }
 0x3a3   :  { %787 = vmatpush.msrb.mxu2 %v701_v26  ;;  %v447_v28 = vpop.f32.mrf.mxu2  ;;  %v478_v29 = vpop.f32.mrf.mxu3 }
 0x3a4   :  { %v479_v30 = vadd.f32 %v3640_v27, %v478_v29  ;;  %v448_v40 = vadd.f32 %v3639_v31, %v447_v28 }
 0x3a6   :  { %3307 = vmatpush.xpose.msk.msrb.mxu3 %vm512_vm4, %v479_v30 }
 0x3aa   :  { %3308 = vmatpush.xpose.msk.msrb.mxu3 %vm512_vm4, %v476_v32 }
 0x3ab   :  { %v506_v35 = vpop.f32.mrf.mxu2 }
 0x3ac   :  { %v507_v43 = vadd.f32 %v3641_v39, %v506_v35 }
 0x3ad   :  { %3309 = vmatmul.msk.f32.vlgmr.msrb.gmra.mxu3 %vm512_vm4, %v445_v34 }
 0x3ae   :  { %662 = vmatpush.msra.mxu3 %v3324_v33 }
 0x3b0   :  { %663 = vmatpush.msra.mxu3 %v3323_v36 }
 0x3b2   :  { %664 = vmatpush.msra.mxu3 %v3322_v37  ;;  %v3343_v37 = vld [vmem:[%s4086_s24 + $0x18] sm:$0xff] }
 0x3b3   :  { %v509_v41 = vpop.f32.mrf.mxu2 }
 0x3b4   :  { %665 = vmatpush.msra.mxu3 %v3321_v38  ;;  %v510_v42 = vadd.f32 %v3641_v39, %v509_v41 }
 0x3b5   :  { %3310 = vmatmul.msk.f32.gmra.mxu3 %vm512_vm4, %v448_v40 }
 0x3b6   :  { %3311 = vmatpush.msk.msrb.mxu1 %vm578_vm3, %v510_v42  ;;  %818 = vmatpush.msrb.mxu3 %v3343_v37 }
 0x3b8   :  { %597 = vmatpush.msrb.mxu1 %v507_v43 }
 0x3bb   :  { %v634_v11 = vpop.f32.mrf.mxu2 }
 0x3bc   :  { %v635_v13 = vadd.f32 %v3642_v12, %v634_v11 }
 0x3bd   :  { %3326 = vmatmul.msk.f32.vlgmr.msra.gmra.mxu3 %vm292_vm1, %v4228_v8 }
 0x3c3   :  { %v637_v14 = vpop.f32.mrf.mxu2 }
 0x3c4   :  { %v638_v16 = vadd.f32 %v3642_v12, %v637_v14 }
 0x3c5   :  { %3327 = vmatmul.msk.f32.gmra.mxu3 %vm292_vm1, %v412_v18 }
 0x430   :  { %v542_v45 = vpop.f32.mrf.mxu3 }
 0x431   :  { %v543_v47 = vadd.f32 %v542_v45, %v4268_v44  ;;  %v3342_v45 = vld [vmem:[%s4086_s24 + $0x10] sm:$0xff] }
 0x432   :  { %819 = vmatpush.msrb.mxu3 %v3342_v45  ;;  %v1003_v45 = vld [vmem:[%s4909_s3 + $0x20] sm:$0xff] }
 0x433   :  { %v549_v48 = vsel %vm548_vm5, %v543_v47, -inf }
 0x434   :  { %550 = vmax.xlane.f32.xlu2 %v549_v48 }
 0x438   :  { %v545_v50 = vpop.f32.mrf.mxu3 }
 0x439   :  { %v546_v51 = vadd.f32 %v545_v50, %v4273_v49 }
 0x43b   :  { %v553_v52 = vsel %vm552_vm6, %v546_v51, -inf }
 0x43c   :  { %554 = vmax.xlane.f32.xlu0 %v553_v52 }
 0x440   :  { %v667_v53 = vpop.f32.mrf.mxu3 }
 0x441   :  { %v668_v57 = vadd.f32 %v3643_v54, %v667_v53  ;;  %v3644_v53 = vld [vmem:[%s4905_s0] ss:$0 sm:$0xff] }
 0x448   :  { %v670_v55 = vpop.f32.mrf.mxu3 }
 0x449   :  { %v671_v56 = vadd.f32 %v3643_v54, %v670_v55 }
 0x44b   :  { %3335 = vmatpush.xpose.msk.msra.mxu1 %vm512_vm4, %v671_v56 }
 0x44f   :  { %3336 = vmatpush.xpose.msk.msra.mxu1 %vm512_vm4, %v668_v57 }
 0x4a7   :  { %v551_v58 = vpop.xlane.xlu2 %550 }
 0x4a8   :  { %v556_v59 = vsub.f32 %v543_v47, %v551_v58 }
 0x4aa   :  { %v558_v60 = vmul.f32 1.442695, %v556_v59 }
 0x4ac   :  { %3702 = vpow2.f32 %v558_v60 }
 0x4af   :  { %v555_v61 = vpop.xlane.xlu0 %554 }
 0x4b0   :  { %v557_v62 = vsub.f32 %v546_v51, %v555_v61 }
 0x4b2   :  { %v3703_v63 = vpop.eup %3702  ;;  %v560_v0 = vmul.f32 1.442695, %v557_v62 }
 0x4b3   :  { %v562_v1 = vsel %vm548_vm5, %v3703_v63, 0.0 }
 0x4b4   :  { %3704 = vpow2.f32 %v560_v0  ;;  %563 = vadd.xlane.f32.xlu1 %v562_v1 }
 0x4ba   :  { %v3705_v2 = vpop.eup %3704 }
 0x4bb   :  { %v565_v3 = vsel %vm552_vm6, %v3705_v2, 0.0 }
 0x4bc   :  { %566 = vadd.xlane.f32.xlu2 %v565_v3 }
 0x527   :  { %v564_v4 = vpop.xlane.xlu1 %563 }
 0x528   :  { %3706 = vrcp.f32 %v564_v4 }
 0x52e   :  { %v3707_v6 = vpop.eup %3706 }
 0x52f   :  { %v567_v7 = vpop.xlane.xlu2 %566  ;;  %v570_v8 = vmul.f32 %v3707_v6, %v3703_v63 }
 0x530   :  { %3708 = vrcp.f32 %v567_v7  ;;  %v923_v7 = vld [vmem:[%s4906_s5 + $0x18] sm:$0xff] }
 0x531   :  { %3312 = vmatmul.msk.f32.vlgmr.msrb.gmra.mxu1 %vm548_vm5, %v570_v8  ;;  %v922_v8 = vld [vmem:[%s4906_s5 + $0x10] sm:$0xff] }
 0x532   :  { %946 = vmatpush.msrb.mxu1 %v923_v7 }
 0x534   :  { %947 = vmatpush.msrb.mxu1 %v922_v8 }
 0x536   :  { %v3709_v9 = vpop.eup %3708 }
 0x537   :  { %v571_v10 = vmul.f32 %v3709_v9, %v3705_v2  ;;  %v921_v9 = vld [vmem:[%s4906_s5 + $0x8] sm:$0xff] }
 0x538   :  { %948 = vmatpush.msrb.mxu1 %v921_v9 }
 0x539   :  { %3313 = vmatmul.msk.f32.gmra.mxu1 %vm548_vm5, %v571_v10  ;;  %v920_v10 = vld [vmem:[%s4906_s5] sm:$0xff] }
 0x53a   :  { %949 = vmatpush.msrb.mxu1 %v920_v10 }
 0x541   :  { %3337 = vmatmul.msk.f32.vlgmr.msra.gmra.mxu1 %vm512_vm4, %v635_v13 }
 0x549   :  { %3338 = vmatmul.msk.f32.gmra.mxu1 %vm512_vm4, %v638_v16 }
 0x5ae   :  { %v599_v18 = vpop.f32.mrf.mxu1 }
 0x5af   :  { %3346 = vmatmul.msk.f32.vlgmr.msra.gmra.mxu0 %vm512_vm4, %v599_v18 }
 0x5b6   :  { %v602_v19 = vpop.f32.mrf.mxu1 }
 0x5b7   :  { %3347 = vmatmul.msk.f32.gmra.mxu0 %vm512_vm4, %v602_v19 }
 0x5be   :  { %v735_v20 = vpop.f32.mrf.mxu1 }
 0x5bf   :  { %v736_v22 = vadd.f32 %v735_v20, %v4268_v44 }
 0x5c1   :  { %v741_v23 = vsel %vm548_vm5, %v736_v22, -inf }
 0x5c2   :  { %742 = vmax.xlane.f32.xlu0 %v741_v23 }
 0x5c6   :  { %v738_v24 = vpop.f32.mrf.mxu1 }
 0x5c7   :  { %v739_v25 = vadd.f32 %v738_v24, %v4273_v49 }
 0x5c9   :  { %v744_v26 = vsel %vm552_vm6, %v739_v25, -inf }
 0x5ca   :  { %745 = vmax.xlane.f32.xlu1 %v744_v26 }
 0x62c   :  { %v850_v50 = vpop.f32.mrf.mxu0 }
 0x634   :  { %v853_v57 = vpop.f32.mrf.mxu0 }
 0x635   :  { %v743_v27 = vpop.xlane.xlu0 %742 }
 0x636   :  { %v747_v28 = vsub.f32 %v736_v22, %v743_v27  ;;  %v3645_v27 = vld [vmem:[%s4907_s9] ss:$0 sm:$0xff] }
 0x638   :  { %v749_v29 = vmul.f32 1.442695, %v747_v28 }
 0x63a   :  { %3710 = vpow2.f32 %v749_v29 }
 0x63d   :  { %v746_v30 = vpop.xlane.xlu1 %745 }
 0x63e   :  { %v748_v31 = vsub.f32 %v739_v25, %v746_v30 }
 0x640   :  { %v3711_v32 = vpop.eup %3710  ;;  %v751_v33 = vmul.f32 1.442695, %v748_v31  ;;  %v3646_v31 = vld [vmem:[%s4908_s25] ss:$0 sm:$0xff] }
 0x641   :  { %v753_v34 = vsel %vm548_vm5, %v3711_v32, 0.0 }
 0x642   :  { %3712 = vpow2.f32 %v751_v33  ;;  %754 = vadd.xlane.f32.xlu2 %v753_v34 }
 0x648   :  { %v3713_v35 = vpop.eup %3712 }
 0x649   :  { %v756_v36 = vsel %vm552_vm6, %v3713_v35, 0.0 }
 0x64a   :  { %757 = vadd.xlane.f32.xlu0 %v756_v36 }
 0x6b5   :  { %v755_v38 = vpop.xlane.xlu2 %754 }
 0x6b6   :  { %3714 = vrcp.f32 %v755_v38 }
 0x6bc   :  { %v3715_v39 = vpop.eup %3714 }
 0x6bd   :  { %v761_v40 = vmul.f32 %v3715_v39, %v3711_v32  ;;  %v758_v41 = vpop.xlane.xlu0 %757 }
 0x6be   :  { %3716 = vrcp.f32 %v758_v41  ;;  %v1006_v41 = vld [vmem:[%s4909_s3 + $0x38] sm:$0xff] }
 0x6bf   :  { %3340 = vmatmul.msk.f32.vlgmr.msrb.gmra.mxu2 %vm548_vm5, %v761_v40 }
 0x6c0   :  { %1025 = vmatpush.msra.mxu2 %v1006_v41 }
 0x6c4   :  { %v3717_v42 = vpop.eup %3716 }
 0x6c5   :  { %v762_v43 = vmul.f32 %v3717_v42, %v3713_v35  ;;  %v1005_v42 = vld [vmem:[%s4909_s3 + $0x30] sm:$0xff] }
 0x6c6   :  { %1026 = vmatpush.msra.mxu2 %v1005_v42  ;;  %v3359_v42 = vld [vmem:[%s4096_s14 + $0x58] sm:$0xff] }
 0x6c7   :  { %3341 = vmatmul.msk.f32.gmra.mxu2 %vm548_vm5, %v762_v43  ;;  %v1004_v43 = vld [vmem:[%s4909_s3 + $0x28] sm:$0xff]  ;;  %1128 = vmatpush.msra.mxu3 %v3359_v42 }
 0x6c8   :  { %1027 = vmatpush.msra.mxu2 %v1004_v43  ;;  %v3366_v43 = vld [vmem:[%s4056_s13 + $0x58] sm:$0xff] }
 0x6c9   :  { %1161 = vmatpush.msrb.mxu0 %v3366_v43  ;;  %v3403_v43 = vld [vmem:[%s4106_s20 + $0x78] sm:$0xff] }
 0x6ca   :  { %1028 = vmatpush.msra.mxu2 %v1003_v45  ;;  %v3373_v45 = vld [vmem:[%s4106_s20 + $0x58] sm:$0xff] }
 0x6cb   :  { %1194 = vmatpush.msra.mxu1 %v3373_v45 }
 0x742   :  { %v789_v47 = vpop.f32.mrf.mxu2 }
 0x743   :  { %3344 = vmatmul.msk.f32.vlgmr.msrb.gmra.mxu3 %vm512_vm4, %v789_v47  ;;  %v1002_v47 = vld [vmem:[%s4909_s3 + $0x18] sm:$0xff] }
 0x744   :  { %1029 = vmatpush.msra.mxu2 %v1002_v47  ;;  %v3358_v47 = vld [vmem:[%s4096_s14 + $0x50] sm:$0xff] }
 0x745   :  { %1129 = vmatpush.msra.mxu3 %v3358_v47  ;;  %v3402_v47 = vld [vmem:[%s4106_s20 + $0x70] sm:$0xff] }
 0x74a   :  { %v792_v48 = vpop.f32.mrf.mxu2 }
 0x74b   :  { %3345 = vmatmul.msk.f32.gmra.mxu3 %vm512_vm4, %v792_v48  ;;  %v3647_v48 = vld [vmem:[%s4910_s30] ss:$0 sm:$0xff] }
 0x7c6   :  { %v821_v51 = vpop.f32.mrf.mxu3 }
 0x7c7   :  { %v851_v52 = vadd.f32 %v850_v50, %v821_v51  ;;  %v1001_v50 = vld [vmem:[%s4909_s3 + $0x10] sm:$0xff] }
 0x7c8   :  { %1030 = vmatpush.msra.mxu2 %v1001_v50  ;;  %v3372_v50 = vld [vmem:[%s4106_s20 + $0x50] sm:$0xff] }
 0x7c9   :  { %v856_v54 = vadd.f32 %v851_v52, %v4185_v15  ;;  %v1000_v52 = vld [vmem:[%s4909_s3 + $0x8] sm:$0xff]  ;;  %1195 = vmatpush.msra.mxu1 %v3372_v50 }
 0x7ca   :  { %1031 = vmatpush.msra.mxu2 %v1000_v52  ;;  %v3364_v52 = vld [vmem:[%s4056_s13 + $0x48] sm:$0xff] }
 0x7cb   :  { %v4305_v55 = vadd.f32 %v3644_v53, %v856_v54  ;;  %v999_v54 = vld [vmem:[%s4909_s3] sm:$0xff]  ;;  %v3401_v50 = vld [vmem:[%s4106_s20 + $0x68] sm:$0xff] }
 0x7cc   :  { %1032 = vmatpush.msra.mxu2 %v999_v54  ;;  %v3356_v54 = vld [vmem:[%s4096_s14 + $0x40] sm:$0xff] }
 0x7cd   :  { %v866_v56 = vsel %vm292_vm1, %v4305_v55, 0.0 }
 0x7ce   :  { %867 = vadd.xlane.f32.xlu1 %v866_v56  ;;  %v824_v58 = vpop.f32.mrf.mxu3 }
 0x7cf   :  { %v854_v59 = vadd.f32 %v853_v57, %v824_v58 }
 0x7d1   :  { %v857_v60 = vadd.f32 %v854_v59, %v4189_v21 }
 0x7d3   :  { %v4310_v61 = vadd.f32 %v3644_v53, %v857_v60 }
 0x7d5   :  { %v869_v62 = vsel %vm296_vm2, %v4310_v61, 0.0 }
 0x7d6   :  { %870 = vadd.xlane.f32.xlu2 %v869_v62 }
 0x841   :  { %v868_v15 = vpop.xlane.xlu1 %867 }
 0x842   :  { %v872_v63 = vmul.f32 %v868_v15, %v4175_v46 }
 0x844   :  { %v874_v0 = vsub.f32 %v4305_v55, %v872_v63 }
 0x846   :  { %v876_v1 = vmul.f32 %v874_v0, %v874_v0 }
 0x848   :  { %v878_v2 = vsel %vm292_vm1, %v876_v1, 0.0 }
 0x849   :  { %879 = vadd.xlane.f32.xlu0 %v878_v2  ;;  %v871_v21 = vpop.xlane.xlu2 %870 }
 0x84a   :  { %v873_v3 = vmul.f32 %v871_v21, %v4175_v46 }
 0x84c   :  { %v875_v4 = vsub.f32 %v4310_v61, %v873_v3 }
 0x84e   :  { %v877_v5 = vmul.f32 %v875_v4, %v875_v4 }
 0x850   :  { %v881_v6 = vsel %vm296_vm2, %v877_v5, 0.0 }
 0x851   :  { %882 = vadd.xlane.f32.xlu1 %v881_v6 }
 0x8bc   :  { %v880_v11 = vpop.xlane.xlu0 %879 }
 0x8bd   :  { %v884_v12 = vmul.f32 %v880_v11, %v4175_v46 }
 0x8bf   :  { %v886_v13 = vadd.f32 1e-05, %v884_v12 }
 0x8c1   :  { %3718 = vrsqrt.f32 %v886_v13  ;;  %vm894_vm8 = vweird.f32 %v886_v13 }
 0x8c4   :  { %v883_v14 = vpop.xlane.xlu1 %882 }
 0x8c5   :  { %v885_v16 = vmul.f32 %v883_v14, %v4175_v46 }
 0x8c7   :  { %v3719_v17 = vpop.eup %3718  ;;  %v887_v18 = vadd.f32 1e-05, %v885_v16 }
 0x8c8   :  { %v889_v19 = vmul.f32 %v3719_v17, %v886_v13  ;;  %vm895_vm7 = vweird.f32 %v3719_v17 }
 0x8c9   :  { %3720 = vrsqrt.f32 %v887_v18  ;;  %vm896_vm9 = vmor %vm894_vm8, %vm895_vm7  ;;  %vm904_vm11 = vweird.f32 %v887_v18 }
 0x8ca   :  { %v890_v20 = vmul.f32 %v3719_v17, %v889_v19 }
 0x8cc   :  { %v891_v22 = vmul.f32 0.5, %v890_v20 }
 0x8ce   :  { %v892_v23 = vsub.f32 1.5, %v891_v22 }
 0x8cf   :  { %v3721_v24 = vpop.eup %3720 }
 0x8d0   :  { %v893_v25 = vmul.f32 %v3719_v17, %v892_v23  ;;  %v899_v26 = vmul.f32 %v3721_v24, %v887_v18  ;;  %vm905_vm10 = vweird.f32 %v3721_v24 }
 0x8d1   :  { %vm906_vm12 = vmor %vm904_vm11, %vm905_vm10 }
 0x8d2   :  { %v897_v28 = vsel %vm896_vm9, %v3719_v17, %v893_v25  ;;  %v900_v29 = vmul.f32 %v3721_v24, %v899_v26  ;;  %v3648_v25 = vld [vmem:[%s4911_s6] ss:$0 sm:$0xff] }
 0x8d3   :  { %v908_v30 = vmul.f32 %v897_v28, %v874_v0 }
 0x8d4   :  { %v901_v32 = vmul.f32 0.5, %v900_v29 }
 0x8d5   :  { %v913_v33 = vmul.f32 %v3645_v27, %v908_v30 }
 0x8d6   :  { %v902_v34 = vsub.f32 1.5, %v901_v32 }
 0x8d7   :  { %v918_v35 = vadd.f32 %v3646_v31, %v913_v33 }
 0x8d8   :  { %v903_v36 = vmul.f32 %v3721_v24, %v902_v34 }
 0x8d9   :  { %3348 = vmatmul.msk.f32.vlgmr.msrb.gmra.mxu1 %vm292_vm1, %v918_v35 }
 0x8da   :  { %v907_v37 = vsel %vm906_vm12, %v3721_v24, %v903_v36 }
 0x8db   :  { %v909_v38 = vmul.f32 %v907_v37, %v875_v4 }
 0x8dd   :  { %v914_v39 = vmul.f32 %v3645_v27, %v909_v38 }
 0x8df   :  { %v919_v40 = vadd.f32 %v3646_v31, %v914_v39 }
 0x8e1   :  { %3349 = vmatmul.msk.f32.gmra.mxu1 %vm292_vm1, %v919_v40 }
 0x956   :  { %v951_v51 = vpop.f32.mrf.mxu1 }
 0x957   :  { %v952_v53 = vadd.f32 %v3647_v48, %v951_v51  ;;  %v3357_v51 = vld [vmem:[%s4096_s14 + $0x48] sm:$0xff] }
 0x958   :  { %1130 = vmatpush.msra.mxu3 %v3357_v51  ;;  %v3400_v51 = vld [vmem:[%s4106_s20 + $0x60] sm:$0xff] }
 0x959   :  { %v3350_v56 = vmul.f32 -1.702, %v952_v53 }
 0x95a   :  { %1131 = vmatpush.msra.mxu3 %v3356_v54  ;;  %v3655_v54 = vld [vmem:[%s4051_s27 + $0x3] ss:$0 sm:$0xff] }
 0x95b   :  { %v961_v57 = vmul.f32 1.442695, %v3350_v56  ;;  %v3363_v56 = vld [vmem:[%s4056_s13 + $0x40] sm:$0xff] }
 0x95d   :  { %3722 = vpow2.f32 %v961_v57  ;;  %v3370_v57 = vld [vmem:[%s4106_s20 + $0x40] sm:$0xff] }
 0x95e   :  { %v954_v58 = vpop.f32.mrf.mxu1 }
 0x95f   :  { %v955_v59 = vadd.f32 %v3647_v48, %v954_v58  ;;  %v3365_v48 = vld [vmem:[%s4056_s13 + $0x50] sm:$0xff] }
 0x960   :  { %1162 = vmatpush.msrb.mxu0 %v3365_v48 }
 0x961   :  { %v3351_v60 = vmul.f32 -1.702, %v955_v59 }
 0x962   :  { %1163 = vmatpush.msrb.mxu0 %v3364_v52 }
 0x963   :  { %v3723_v62 = vpop.eup %3722  ;;  %v963_v15 = vmul.f32 1.442695, %v3351_v60 }
 0x964   :  { %v965_v63 = vadd.f32 1.0, %v3723_v62  ;;  %1164 = vmatpush.msrb.mxu0 %v3363_v56  ;;  %v3389_v62 = vld [vmem:[%s4096_s14 + $0x78] sm:$0xff] }
 0x965   :  { %3724 = vpow2.f32 %v963_v15  ;;  %v3396_v15 = vld [vmem:[%s4056_s13 + $0x78] sm:$0xff] }
 0x966   :  { %3726 = vrcp.f32 %v965_v63  ;;  %v978_v4 = vand.u32 2147483648, %v965_v63  ;;  %v976_v6 = vand.u32 2147483647, %v965_v63  ;;  %vm972_vm14 = vweird.f32 %v965_v63  ;;  %1319 = vmatpush.msra.mxu0 %v3389_v62 }
 0x968   :  { %v979_v9 = vor.u32 1.1754944e-38, %v978_v4  ;;  %vm977_vm7 = vcmp.eq.f32.partialorder %v976_v6, 8.507059e+37  ;;  %v3386_v4 = vld [vmem:[%s4096_s14 + $0x60] sm:$0xff] }
 0x96b   :  { %v3725_v0 = vpop.eup %3724 }
 0x96c   :  { %v3727_v1 = vpop.eup %3726  ;;  %v966_v2 = vadd.f32 1.0, %v3725_v0  ;;  %v3395_v0 = vld [vmem:[%s4056_s13 + $0x70] sm:$0xff] }
 0x96d   :  { %v968_v21 = vmul.f32 %v3727_v1, %v965_v63  ;;  %vm973_vm13 = vweird.f32 %v3727_v1  ;;  %v3388_v63 = vld [vmem:[%s4096_s14 + $0x70] sm:$0xff] }
 0x96e   :  { %3728 = vrcp.f32 %v966_v2  ;;  %vm974_vm15 = vmor %vm972_vm14, %vm973_vm13  ;;  %v993_v16 = vand.u32 2147483648, %v966_v2  ;;  %v991_v18 = vand.u32 2147483647, %v966_v2  ;;  %vm987_vm9 = vweird.f32 %v966_v2  ;;  %1320 = vmatpush.msra.mxu0 %v3388_v63 }
 0x96f   :  { %v969_v3 = vsub.f32 1.0, %v968_v21  ;;  %v3394_v21 = vld [vmem:[%s4056_s13 + $0x68] sm:$0xff] }
 0x970   :  { %v994_v20 = vor.u32 1.1754944e-38, %v993_v16  ;;  %vm992_vm11 = vcmp.eq.f32.partialorder %v991_v18, 8.507059e+37  ;;  %v3649_v16 = vld [vmem:[%s4066_s29 + $0x1] ss:$0 sm:$0xff]  ;;  %s4915_s29 = sld [smem:[#allocation16_spill]] }
 0x971   :  { %v970_v5 = vmul.f32 %v3727_v1, %v969_v3 }
 0x973   :  { %v971_v7 = vadd.f32 %v3727_v1, %v970_v5  ;;  %v3393_v5 = vld [vmem:[%s4056_s13 + $0x60] sm:$0xff]  ;;  %s4912_s13 = sld [smem:[#allocation26_spill]] }
 0x974   :  { %v3729_v8 = vpop.eup %3728 }
 0x975   :  { %v975_v10 = vsel %vm974_vm15, %v3727_v1, %v971_v7  ;;  %v983_v11 = vmul.f32 %v3729_v8, %v966_v2  ;;  %vm988_vm8 = vweird.f32 %v3729_v8  ;;  %v3387_v2 = vld [vmem:[%s4096_s14 + $0x68] sm:$0xff]  ;;  %s4917_s14 = sld [smem:[#allocation22_spill]] }
 0x976   :  { %v980_v12 = vsel %vm977_vm7, %v979_v9, %v975_v10  ;;  %vm989_vm10 = vmor %vm987_vm9, %vm988_vm8  ;;  %1321 = vmatpush.msra.mxu0 %v3387_v2  ;;  %v3656_v2 = vld [vmem:[%s4101_s21 + $0x3] ss:$0 sm:$0xff] }
 0x977   :  { %v997_v13 = vmul.f32 %v980_v12, %v952_v53  ;;  %v984_v14 = vsub.f32 1.0, %v983_v11  ;;  %v3371_v53 = vld [vmem:[%s4106_s20 + $0x48] sm:$0xff]  ;;  %s4920_s20 = sld [smem:[#allocation13_spill]] }
 0x978   :  { %1196 = vmatpush.msra.mxu1 %v3371_v53  ;;  %1322 = vmatpush.msra.mxu0 %v3386_v4 }
 0x979   :  { %v985_v17 = vmul.f32 %v3729_v8, %v984_v14  ;;  %3352 = vmatmul.msk.f32.vlgmr.msra.gmra.mxu2 %vm237_vm0, %v997_v13 }
 0x97a   :  { %1197 = vmatpush.msra.mxu1 %v3370_v57 }
 0x97b   :  { %v986_v19 = vadd.f32 %v3729_v8, %v985_v17 }
 0x97c   :  { %1352 = vmatpush.msrb.mxu1 %v3396_v15 }
 0x97d   :  { %v990_v22 = vsel %vm989_vm10, %v3729_v8, %v986_v19  ;;  %v3650_v19 = vld [vmem:[%s4061_s8 + $0x1] ss:$0 sm:$0xff]  ;;  %s4916_s8 = sld [smem:[#allocation15_spill]] }
 0x97e   :  { %v995_v23 = vsel %vm992_vm11, %v994_v20, %v990_v22  ;;  %1353 = vmatpush.msrb.mxu1 %v3395_v0 }
 0x97f   :  { %v998_v24 = vmul.f32 %v995_v23, %v955_v59 }
 0x980   :  { %1354 = vmatpush.msrb.mxu1 %v3394_v21 }
 0x981   :  { %3353 = vmatmul.msk.f32.gmra.mxu2 %vm237_vm0, %v998_v24 }
 0x982   :  { %1355 = vmatpush.msrb.mxu1 %v3393_v5 }
 0x9fc   :  { %v1034_v26 = vpop.f32.mrf.mxu2 }
 0x9fd   :  { %v1035_v27 = vadd.f32 %v3648_v25, %v1034_v26 }
 0x9ff   :  { %v4343_v28 = vadd.f32 %v1035_v27, %v4305_v55 }
 0xa01   :  { %v1046_v29 = vsel %vm292_vm1, %v4343_v28, 0.0 }
 0xa02   :  { %1047 = vadd.xlane.f32.xlu2 %v1046_v29 }
 0xa04   :  { %v1037_v30 = vpop.f32.mrf.mxu2 }
 0xa05   :  { %v1038_v31 = vadd.f32 %v3648_v25, %v1037_v30 }
 0xa07   :  { %v4348_v32 = vadd.f32 %v1038_v31, %v4310_v61 }
 0xa09   :  { %v1049_v33 = vsel %vm296_vm2, %v4348_v32, 0.0 }
 0xa0a   :  { %1050 = vadd.xlane.f32.xlu0 %v1049_v33 }
 0xa75   :  { %v1048_v34 = vpop.xlane.xlu2 %1047 }
 0xa76   :  { %v1052_v55 = vmul.f32 %v1048_v34, %v4175_v46 }
 0xa78   :  { %v4354_v35 = vsub.f32 %v4343_v28, %v1052_v55  ;;  %v3651_v55 = vld [vmem:[%s4051_s27 + $0x2] ss:$0 sm:$0xff]  ;;  %s4921_s27 = sld [smem:[#allocation23_spill]] }
 0xa7a   :  { %v1056_v36 = vmul.f32 %v4354_v35, %v4354_v35 }
 0xa7c   :  { %v1058_v61 = vsel %vm292_vm1, %v1056_v36, 0.0 }
 0xa7d   :  { %v1051_v37 = vpop.xlane.xlu0 %1050  ;;  %1059 = vadd.xlane.f32.xlu1 %v1058_v61 }
 0xa7e   :  { %v1053_v38 = vmul.f32 %v1051_v37, %v4175_v46 }
 0xa80   :  { %v4361_v39 = vsub.f32 %v4348_v32, %v1053_v38 }
 0xa82   :  { %v1057_v40 = vmul.f32 %v4361_v39, %v4361_v39 }
 0xa84   :  { %v1061_v41 = vsel %vm296_vm2, %v1057_v40, 0.0 }
 0xa85   :  { %1062 = vadd.xlane.f32.xlu2 %v1061_v41  ;;  %v3653_v41 = vld [vmem:[%s4091_s17 + $0x2] ss:$0 sm:$0xff] }
 0xaf0   :  { %v1060_v58 = vpop.xlane.xlu1 %1059 }
 0xaf1   :  { %v1064_v59 = vmul.f32 %v1060_v58, %v4175_v46 }
 0xaf3   :  { %v1066_v60 = vadd.f32 1e-05, %v1064_v59 }
 0xaf5   :  { %3730 = vrsqrt.f32 %v1066_v60  ;;  %vm1074_vm13 = vweird.f32 %v1066_v60 }
 0xaf8   :  { %v1063_v1 = vpop.xlane.xlu2 %1062 }
 0xaf9   :  { %v1065_v3 = vmul.f32 %v1063_v1, %v4175_v46 }
 0xafb   :  { %v3731_v6 = vpop.eup %3730  ;;  %v1067_v7 = vadd.f32 1e-05, %v1065_v3 }
 0xafc   :  { %v1069_v8 = vmul.f32 %v3731_v6, %v1066_v60  ;;  %vm1075_vm12 = vweird.f32 %v3731_v6 }
 0xafd   :  { %3732 = vrsqrt.f32 %v1067_v7  ;;  %vm1076_vm14 = vmor %vm1074_vm13, %vm1075_vm12  ;;  %vm1084_vm7 = vweird.f32 %v1067_v7  ;;  %vm1740_vm13 = vcmask 1040384  }
 0xafe   :  { %v1070_v9 = vmul.f32 %v3731_v6, %v1069_v8 }
 0xb00   :  { %v1071_v10 = vmul.f32 0.5, %v1070_v9 }
 0xb02   :  { %v1072_v11 = vsub.f32 1.5, %v1071_v10 }
 0xb03   :  { %v3733_v12 = vpop.eup %3732 }
 0xb04   :  { %v1073_v13 = vmul.f32 %v3731_v6, %v1072_v11  ;;  %v1079_v14 = vmul.f32 %v3733_v12, %v1067_v7  ;;  %vm1085_vm15 = vweird.f32 %v3733_v12 }
 0xb05   :  { %vm1086_vm8 = vmor %vm1084_vm7, %vm1085_vm15 }
 0xb06   :  { %v1077_v17 = vsel %vm1076_vm14, %v3731_v6, %v1073_v13  ;;  %v1080_v18 = vmul.f32 %v3733_v12, %v1079_v14 }
 0xb07   :  { %v1088_v20 = vmul.f32 %v1077_v17, %v4354_v35  ;;  %v3652_v35 = vld [vmem:[%s4101_s21 + $0x2] ss:$0 sm:$0xff]  ;;  %v3385_v17 = vld [vmem:[%s4086_s24 + $0x28] sm:$0xff]  ;;  %s4914_s21 = sld [smem:[#allocation24_spill]] }
 0xb08   :  { %v1081_v22 = vmul.f32 0.5, %v1080_v18 }
 0xb09   :  { %v1093_v23 = vmul.f32 %v3649_v16, %v1088_v20 }
 0xb0a   :  { %v1082_v24 = vsub.f32 1.5, %v1081_v22 }
 0xb0b   :  { %v1098_v25 = vadd.f32 %v3650_v19, %v1093_v23 }
 0xb0c   :  { %v1083_v26 = vmul.f32 %v3733_v12, %v1082_v24 }
 0xb0d   :  { %3361 = vmatmul.msk.f32.vlgmr.msra.gmra.mxu3 %vm292_vm1, %v1098_v25  ;;  %3368 = vmatmul.msk.f32.vlgmr.msrb.gmra.mxu0 %vm292_vm1, %v1098_v25 }
 0xb0e   :  { %v1087_v27 = vsel %vm1086_vm8, %v3733_v12, %v1083_v26  ;;  %3375 = vmatmul.msk.f32.vlgmr.msra.gmra.mxu1 %vm292_vm1, %v1098_v25 }
 0xb0f   :  { %v1089_v29 = vmul.f32 %v1087_v27, %v4361_v39 }
 0xb11   :  { %v1094_v30 = vmul.f32 %v3649_v16, %v1089_v29 }
 0xb13   :  { %v1099_v31 = vadd.f32 %v3650_v19, %v1094_v30  ;;  %v3384_v30 = vld [vmem:[%s4086_s24 + $0x20] sm:$0xff] }
 0xb15   :  { %3362 = vmatmul.msk.f32.gmra.mxu3 %vm292_vm1, %v1099_v31  ;;  %3369 = vmatmul.msk.f32.gmra.mxu0 %vm292_vm1, %v1099_v31 }
 0xb16   :  { %3376 = vmatmul.msk.f32.gmra.mxu1 %vm292_vm1, %v1099_v31 }
 0xb1d   :  { %3391 = vmatmul.msk.f32.vlgmr.msra.gmra.mxu0 %vm292_vm1, %v1098_v25 }
 0xb1e   :  { %3398 = vmatmul.msk.f32.vlgmr.msrb.gmra.mxu1 %vm292_vm1, %v1098_v25 }
 0xb25   :  { %3392 = vmatmul.msk.f32.gmra.mxu0 %vm292_vm1, %v1099_v31 }
 0xb26   :  { %3399 = vmatmul.msk.f32.gmra.mxu1 %vm292_vm1, %v1099_v31 }
 0xb8a   :  { %v1166_v33 = vpop.f32.mrf.mxu0 }
 0xb8b   :  { %v1199_v34 = vpop.f32.mrf.mxu1  ;;  %v1167_v42 = vadd.f32 %v3651_v55, %v1166_v33 }
 0xb8c   :  { %v1200_v40 = vadd.f32 %v3652_v35, %v1199_v34 }
 0xb90   :  { %v1133_v39 = vpop.f32.mrf.mxu3 }
 0xb91   :  { %v1134_v45 = vadd.f32 %v3653_v41, %v1133_v39 }
 0xb92   :  { %v1169_v36 = vpop.f32.mrf.mxu0 }
 0xb93   :  { %v1170_v61 = vadd.f32 %v3651_v55, %v1169_v36  ;;  %v1202_v37 = vpop.f32.mrf.mxu1 }
 0xb94   :  { %v1203_v38 = vadd.f32 %v3652_v35, %v1202_v37 }
 0xb95   :  { %3377 = vmatpush.xpose.msk.msrb.mxu2 %vm512_vm4, %v1170_v61 }
 0xb96   :  { %3381 = vmatpush.msk.msrb.mxu3 %vm578_vm3, %v1203_v38 }
 0xb98   :  { %1286 = vmatpush.msrb.mxu3 %v1200_v40  ;;  %v1136_v52 = vpop.f32.mrf.mxu3 }
 0xb99   :  { %3378 = vmatpush.xpose.msk.msrb.mxu2 %vm512_vm4, %v1167_v42  ;;  %v1137_v53 = vadd.f32 %v3653_v41, %v1136_v52 }
 0xb9a   :  { %v1324_v24 = vpop.f32.mrf.mxu0 }
 0xb9b   :  { %v1357_v48 = vpop.f32.mrf.mxu1 }
 0xb9c   :  { %3379 = vmatmul.msk.f32.vlgmr.msrb.gmra.mxu2 %vm512_vm4, %v1134_v45  ;;  %v1358_v58 = vadd.f32 %v3655_v54, %v1357_v48 }
 0xb9d   :  { %1385 = vmatpush.msra.mxu2 %v3403_v43  ;;  %v3415_v43 = vld [vmem:[%s4086_s24 + $0x38] sm:$0xff] }
 0xb9e   :  { %1508 = vmatpush.msra.mxu1 %v3415_v43 }
 0xb9f   :  { %1386 = vmatpush.msra.mxu2 %v3402_v47 }
 0xba1   :  { %1387 = vmatpush.msra.mxu2 %v3401_v50 }
 0xba2   :  { %v1327_v27 = vpop.f32.mrf.mxu0 }
 0xba3   :  { %1388 = vmatpush.msra.mxu2 %v3400_v51  ;;  %v1360_v56 = vpop.f32.mrf.mxu1 }
 0xba4   :  { %v1361_v57 = vadd.f32 %v3655_v54, %v1360_v56  ;;  %3380 = vmatmul.msk.f32.gmra.mxu2 %vm512_vm4, %v1137_v53  ;;  %v3657_v56 = vld [vmem:[%s4905_s0 + $0x1] ss:$0 sm:$0xff]  ;;  %s3178_s0 = scalar_lea.vmem [#allocation2], %s3582_s26 }
 0xba5   :  { %1537 = vmatpush.msrb.mxu2 %v3385_v17 }
 0xba6   :  { %3407 = vmatpush.xpose.msk.msra.mxu3 %vm512_vm4, %v1361_v57 }
 0xba7   :  { %1538 = vmatpush.msrb.mxu2 %v3384_v30 }
 0xbaa   :  { %3408 = vmatpush.xpose.msk.msra.mxu3 %vm512_vm4, %v1358_v58 }
 0xbac   :  { %3405 = vmatmul.msk.f32.vlgmr.msra.gmra.mxu2 %vm292_vm1, %v1098_v25  ;;  %v3654_v25 = vld [vmem:[%s4091_s17 + $0x3] ss:$0 sm:$0xff]  ;;  %s4913_s17 = sld [smem:[#allocation14_spill]] }
 0xbad   :  { %v1325_v26 = vadd.f32 %v3654_v25, %v1324_v24  ;;  %v1328_v29 = vadd.f32 %v3654_v25, %v1327_v27  ;;  %v4466_v24 = vld [vmem:[%s4908_s25 + $0x1] ss:$0 sm:$0xff]  ;;  %s4934_s25 = sld [smem:[#allocation7_spill]] }
 0xbae   :  { %v4472_v27 = vld [vmem:[%s4912_s13] sm:$0xff] }
 0xbb4   :  { %3406 = vmatmul.msk.f32.gmra.mxu2 %vm292_vm1, %v1099_v31 }
 0xc1f   :  { %v1234_v59 = vpop.f32.mrf.mxu2 }
 0xc20   :  { %v1235_v60 = vadd.f32 %v1234_v59, %v4268_v44 }
 0xc22   :  { %v1240_v62 = vsel %vm548_vm5, %v1235_v60, -inf }
 0xc23   :  { %1241 = vmax.xlane.f32.xlu0 %v1240_v62 }
 0xc27   :  { %v1237_v15 = vpop.f32.mrf.mxu2 }
 0xc28   :  { %v1238_v63 = vadd.f32 %v1237_v15, %v4273_v49 }
 0xc2a   :  { %v1243_v0 = vsel %vm552_vm6, %v1238_v63, -inf }
 0xc2b   :  { %1244 = vmax.xlane.f32.xlu1 %v1243_v0 }
 0xc2f   :  { %v1390_v1 = vpop.f32.mrf.mxu2 }
 0xc30   :  { %v1391_v4 = vadd.f32 %v3656_v2, %v1390_v1 }
 0xc37   :  { %v1393_v21 = vpop.f32.mrf.mxu2 }
 0xc38   :  { %v1394_v3 = vadd.f32 %v3656_v2, %v1393_v21 }
 0xc3a   :  { %3411 = vmatpush.msk.msrb.mxu0 %vm578_vm3, %v1394_v3 }
 0xc3c   :  { %1477 = vmatpush.msrb.mxu0 %v1391_v4 }
 0xc96   :  { %v1242_v5 = vpop.xlane.xlu0 %1241 }
 0xc97   :  { %v1246_v6 = vsub.f32 %v1235_v60, %v1242_v5  ;;  %v3426_v5 = vld [vmem:[%s4906_s5 + $0x38] sm:$0xff] }
 0xc99   :  { %v1248_v7 = vmul.f32 1.442695, %v1246_v6  ;;  %v3425_v6 = vld [vmem:[%s4906_s5 + $0x30] sm:$0xff] }
 0xc9b   :  { %3734 = vpow2.f32 %v1248_v7  ;;  %v3424_v7 = vld [vmem:[%s4906_s5 + $0x28] sm:$0xff] }
 0xc9e   :  { %v1245_v8 = vpop.xlane.xlu1 %1244 }
 0xc9f   :  { %v1247_v9 = vsub.f32 %v1238_v63, %v1245_v8  ;;  %v3423_v8 = vld [vmem:[%s4906_s5 + $0x20] sm:$0xff]  ;;  %s3175_s5 = scalar_lea.vmem [#allocation2], %s3174_s28 }
 0xca1   :  { %v3735_v10 = vpop.eup %3734  ;;  %v1250_v11 = vmul.f32 1.442695, %v1247_v9 }
 0xca2   :  { %v1252_v12 = vsel %vm548_vm5, %v3735_v10, 0.0 }
 0xca3   :  { %3736 = vpow2.f32 %v1250_v11  ;;  %1253 = vadd.xlane.f32.xlu2 %v1252_v12 }
 0xca9   :  { %v3737_v13 = vpop.eup %3736 }
 0xcaa   :  { %v1255_v14 = vsel %vm552_vm6, %v3737_v13, 0.0 }
 0xcab   :  { %1256 = vadd.xlane.f32.xlu0 %v1255_v14 }
 0xd16   :  { %v1254_v16 = vpop.xlane.xlu2 %1253 }
 0xd17   :  { %3738 = vrcp.f32 %v1254_v16 }
 0xd1d   :  { %v3739_v18 = vpop.eup %3738 }
 0xd1e   :  { %v1260_v19 = vmul.f32 %v3739_v18, %v3735_v10  ;;  %v1257_v20 = vpop.xlane.xlu0 %1256 }
 0xd1f   :  { %3740 = vrcp.f32 %v1257_v20  ;;  %v4462_v20 = vld [vmem:[%s4907_s9 + $0x1] ss:$0 sm:$0xff]  ;;  %s4933_s9 = sld [smem:[#allocation8_spill]] }
 0xd20   :  { %3382 = vmatmul.msk.f32.vlgmr.msrb.gmra.mxu3 %vm548_vm5, %v1260_v19 }
 0xd21   :  { %1641 = vmatpush.msrb.mxu3 %v3426_v5 }
 0xd23   :  { %1642 = vmatpush.msrb.mxu3 %v3425_v6 }
 0xd25   :  { %v3741_v22 = vpop.eup %3740  ;;  %1643 = vmatpush.msrb.mxu3 %v3424_v7 }
 0xd26   :  { %v1261_v23 = vmul.f32 %v3741_v22, %v3737_v13 }
 0xd27   :  { %1644 = vmatpush.msrb.mxu3 %v3423_v8 }
 0xd28   :  { %3383 = vmatmul.msk.f32.gmra.mxu3 %vm548_vm5, %v1261_v23 }
 0xd30   :  { %3409 = vmatmul.msk.f32.vlgmr.msra.gmra.mxu3 %vm512_vm4, %v1325_v26 }
 0xd38   :  { %3410 = vmatmul.msk.f32.gmra.mxu3 %vm512_vm4, %v1328_v29  ;;  %v1808_v29 = vsel %vm292_vm1, %v4472_v27, 0.0 }
 0xda3   :  { %v1288_v31 = vpop.f32.mrf.mxu3 }
 0xda4   :  { %3418 = vmatmul.msk.f32.vlgmr.msrb.gmra.mxu2 %vm512_vm4, %v1288_v31 }
 0xdab   :  { %v1291_v33 = vpop.f32.mrf.mxu3 }
 0xdac   :  { %3419 = vmatmul.msk.f32.gmra.mxu2 %vm512_vm4, %v1291_v33 }
 0xdb3   :  { %v1425_v34 = vpop.f32.mrf.mxu3 }
 0xdb4   :  { %v1426_v55 = vadd.f32 %v1425_v34, %v4268_v44  ;;  %v3439_v34 = vld [vmem:[%s4909_s3 + $0x78] sm:$0xff] }
 0xdb5   :  { %1722 = vmatpush.msra.mxu0 %v3439_v34  ;;  %v1900_v34 = vld [vmem:[%s4913_s17 + $0x8] sm:$0xff] }
 0xdb6   :  { %v1431_v35 = vsel %vm548_vm5, %v1426_v55, -inf }
 0xdb7   :  { %1432 = vmax.xlane.f32.xlu1 %v1431_v35  ;;  %v3438_v35 = vld [vmem:[%s4909_s3 + $0x70] sm:$0xff] }
 0xdb8   :  { %1723 = vmatpush.msra.mxu0 %v3438_v35 }
 0xdbb   :  { %v1428_v36 = vpop.f32.mrf.mxu3 }
 0xdbc   :  { %v1429_v61 = vadd.f32 %v1428_v36, %v4273_v49  ;;  %v3414_v49 = vld [vmem:[%s4086_s24 + $0x30] sm:$0xff]  ;;  %s4918_s24 = sld [smem:[#allocation28_spill]] }
 0xdbd   :  { %1509 = vmatpush.msra.mxu1 %v3414_v49 }
 0xdbe   :  { %v1434_v37 = vsel %vm552_vm6, %v1429_v61, -inf }
 0xdbf   :  { %1435 = vmax.xlane.f32.xlu1 %v1434_v37 }
 0xe27   :  { %v1540_v52 = vpop.f32.mrf.mxu2 }
 0xe2a   :  { %v1433_v38 = vpop.xlane.xlu1 %1432 }
 0xe2b   :  { %v1437_v39 = vsub.f32 %v1426_v55, %v1433_v38  ;;  %v3436_v38 = vld [vmem:[%s4909_s3 + $0x60] sm:$0xff] }
 0xe2d   :  { %v1439_v40 = vmul.f32 1.442695, %v1437_v39  ;;  %v3435_v39 = vld [vmem:[%s4909_s3 + $0x58] sm:$0xff] }
 0xe2f   :  { %3742 = vpow2.f32 %v1439_v40  ;;  %v1543_v30 = vpop.f32.mrf.mxu2  ;;  %v4484_v40 = vld [vmem:[%s4910_s30 + $0x1] ss:$0 sm:$0xff] }
 0xe32   :  { %v1436_v50 = vpop.xlane.xlu1 %1435 }
 0xe33   :  { %v1438_v51 = vsub.f32 %v1429_v61, %v1436_v50  ;;  %v3437_v61 = vld [vmem:[%s4909_s3 + $0x68] sm:$0xff] }
 0xe34   :  { %1724 = vmatpush.msra.mxu0 %v3437_v61 }
 0xe35   :  { %v3743_v41 = vpop.eup %3742  ;;  %v1441_v57 = vmul.f32 1.442695, %v1438_v51 }
 0xe36   :  { %v1443_v42 = vsel %vm548_vm5, %v3743_v41, 0.0  ;;  %1725 = vmatpush.msra.mxu0 %v3436_v38  ;;  %v1930_v38 = vld [vmem:[%s4914_s21] sm:$0xff] }
 0xe37   :  { %1444 = vadd.xlane.f32.xlu2 %v1443_v42  ;;  %v3433_v42 = vld [vmem:[%s4909_s3 + $0x48] sm:$0xff] }
 0xe38   :  { %1726 = vmatpush.msra.mxu0 %v3435_v39 }
 0xeaa   :  { %v1445_v44 = vpop.xlane.xlu2 %1444 }
 0xeab   :  { %3744 = vrcp.f32 %v1445_v44  ;;  %v3432_v44 = vld [vmem:[%s4909_s3 + $0x40] sm:$0xff] }
 0xeac   :  { %3746 = vpow2.f32 %v1441_v57 }
 0xeb1   :  { %v3745_v45 = vpop.eup %3744 }
 0xeb2   :  { %v1451_v47 = vmul.f32 %v3745_v45, %v3743_v41  ;;  %v3747_v62 = vpop.eup %3746  ;;  %v3434_v41 = vld [vmem:[%s4909_s3 + $0x50] sm:$0xff] }
 0xeb3   :  { %v1446_v15 = vsel %vm552_vm6, %v3747_v62, 0.0  ;;  %1727 = vmatpush.msra.mxu0 %v3434_v41 }
 0xeb4   :  { %3412 = vmatmul.msk.f32.vlgmr.msrb.gmra.mxu0 %vm548_vm5, %v1451_v47  ;;  %v4491_v47 = vld [vmem:[%s4912_s13 + $0x8] sm:$0xff] }
 0xeb5   :  { %1728 = vmatpush.msra.mxu0 %v3433_v42  ;;  %v1811_v49 = vsel %vm292_vm1, %v4491_v47, 0.0 }
 0xeb7   :  { %1729 = vmatpush.msra.mxu0 %v3432_v44 }
 0xf31   :  { %v1479_v48 = vpop.f32.mrf.mxu0 }
 0xf32   :  { %3416 = vmatmul.msk.f32.vlgmr.msra.gmra.mxu1 %vm512_vm4, %v1479_v48 }
 0xfaf   :  { %v1511_v53 = vpop.f32.mrf.mxu1 }
 0xfb0   :  { %v1541_v54 = vadd.f32 %v1540_v52, %v1511_v53 }
 0xfb2   :  { %v1546_v58 = vadd.f32 %v1541_v54, %v4343_v28 }
 0xfb4   :  { %v4447_v59 = vadd.f32 %v3657_v56, %v1546_v58 }
 0xfb6   :  { %v1559_v60 = vsel %vm292_vm1, %v4447_v59, 0.0 }
 0xfb7   :  { %1560 = vadd.xlane.f32.xlu0 %v1559_v60 }
 0xfbf   :  { %1447 = vadd.xlane.f32.xlu0 %v1446_v15 }
 0xfc7   :  { %1812 = vadd.xlane.f32.xlu0 %v1811_v49  ;;  %v3662_v49 = vld [vmem:[%s4915_s29] ss:$0 sm:$0xff] }
0x102a   :  { %v1561_v63 = vpop.xlane.xlu0 %1560 }
0x102b   :  { %v1565_v0 = vmul.f32 %v1561_v63, %v4175_v46 }
0x102d   :  { %v1567_v28 = vsub.f32 %v4447_v59, %v1565_v0 }
0x102f   :  { %v1569_v1 = vmul.f32 %v1567_v28, %v1567_v28 }
0x1031   :  { %v1571_v2 = vsel %vm292_vm1, %v1569_v1, 0.0 }
0x1032   :  { %1572 = vadd.xlane.f32.xlu2 %v1571_v2  ;;  %v1448_v21 = vpop.xlane.xlu0 %1447 }
0x1033   :  { %3748 = vrcp.f32 %v1448_v21 }
0x1039   :  { %v3749_v3 = vpop.eup %3748 }
0x103a   :  { %v1452_v4 = vmul.f32 %v3749_v3, %v3747_v62  ;;  %1809 = vadd.xlane.f32.xlu2 %v1808_v29  ;;  %v1902_v29 = vld [vmem:[%s4913_s17 + $0x18] sm:$0xff] }
0x103b   :  { %1919 = vmatpush.msra.mxu2 %v1902_v29 }
0x103c   :  { %3413 = vmatmul.msk.f32.gmra.mxu0 %vm548_vm5, %v1452_v4 }
0x10a5   :  { %v1573_v9 = vpop.xlane.xlu2 %1572 }
0x10a6   :  { %v1577_v10 = vmul.f32 %v1573_v9, %v4175_v46  ;;  %v3661_v9 = vld [vmem:[%s4911_s6 + $0x1] ss:$0 sm:$0xff] }
0x10a8   :  { %v1579_v11 = vadd.f32 1e-05, %v1577_v10  ;;  %v1813_v10 = vpop.xlane.xlu0 %1812 }
0x10aa   :  { %3750 = vrsqrt.f32 %v1579_v11  ;;  %vm1587_vm5 = vweird.f32 %v1579_v11 }
0x10b0   :  { %v3751_v12 = vpop.eup %3750 }
0x10b1   :  { %v1582_v13 = vmul.f32 %v3751_v12, %v1579_v11  ;;  %vm1588_vm3 = vweird.f32 %v3751_v12 }
0x10b2   :  { %vm1589_vm6 = vmor %vm1587_vm5, %vm1588_vm3 }
0x10b3   :  { %v1583_v14 = vmul.f32 %v3751_v12, %v1582_v13  ;;  %v1815_v13 = vmul.f32 %v1813_v10, %v4175_v46  ;;  %v3456_v10 = vld [vmem:[%s4917_s14 + $0x20] sm:$0xff] }
0x10b5   :  { %v1584_v16 = vmul.f32 0.5, %v1583_v14 }
0x10b7   :  { %v1585_v17 = vsub.f32 1.5, %v1584_v16 }
0x10b9   :  { %v1586_v18 = vmul.f32 %v3751_v12, %v1585_v17  ;;  %v1482_v19 = vpop.f32.mrf.mxu0  ;;  %v4513_v17 = vsub.f32 %v4491_v47, %v1815_v13 }
0x10ba   :  { %3417 = vmatmul.msk.f32.gmra.mxu1 %vm512_vm4, %v1482_v19 }
0x10bb   :  { %v1590_v22 = vsel %vm1589_vm6, %v3751_v12, %v1586_v18 }
0x10bc   :  { %v1601_v23 = vmul.f32 %v1590_v22, %v1567_v28  ;;  %v1810_v28 = vpop.xlane.xlu2 %1809  ;;  %v1819_v22 = vmul.f32 %v4513_v17, %v4513_v17 }
0x10bd   :  { %v1814_v1 = vmul.f32 %v1810_v28, %v4175_v46 }
0x10be   :  { %v1606_v25 = vmul.f32 %v4462_v20, %v1601_v23 }
0x10bf   :  { %v4498_v2 = vsub.f32 %v4472_v27, %v1814_v1 }
0x10c0   :  { %v1611_v26 = vadd.f32 %v4466_v24, %v1606_v25 }
0x10c1   :  { %v1818_v21 = vmul.f32 %v4498_v2, %v4498_v2 }
0x10c2   :  { %3428 = vmatmul.msk.f32.vlgmr.msrb.gmra.mxu3 %vm292_vm1, %v1611_v26 }
0x10c3   :  { %v1820_v3 = vsel %vm292_vm1, %v1818_v21, 0.0 }
0x10c4   :  { %1821 = vadd.xlane.f32.xlu0 %v1820_v3  ;;  %v3459_v3 = vld [vmem:[%s4917_s14 + $0x38] sm:$0xff] }
0x1137   :  { %v1514_v31 = vpop.f32.mrf.mxu1  ;;  %v1822_v23 = vpop.xlane.xlu0 %1821 }
0x1138   :  { %v1544_v33 = vadd.f32 %v1543_v30, %v1514_v31  ;;  %v1826_v25 = vmul.f32 %v1822_v23, %v4175_v46  ;;  %v1933_v30 = vld [vmem:[%s4914_s21 + $0x18] sm:$0xff]  ;;  %v1901_v31 = vld [vmem:[%s4913_s17 + $0x10] sm:$0xff] }
0x1139   :  { %1950 = vmatpush.msra.mxu3 %v1933_v30  ;;  %1920 = vmatpush.msra.mxu2 %v1901_v31 }
0x113a   :  { %v1547_v55 = vadd.f32 %v1544_v33, %v4348_v32  ;;  %v1828_v26 = vadd.f32 1e-05, %v1826_v25  ;;  %v1932_v33 = vld [vmem:[%s4914_s21 + $0x10] sm:$0xff] }
0x113b   :  { %1951 = vmatpush.msra.mxu3 %v1932_v33  ;;  %1921 = vmatpush.msra.mxu2 %v1900_v34  ;;  %v1777_v33 = vld [vmem:[%s4131_s12 + $0x18] sm:$0xff]  ;;  %v1776_v34 = vld [vmem:[%s4131_s12 + $0x10] sm:$0xff] }
0x113c   :  { %v1554_v36 = vadd.f32 %v3657_v56, %v1547_v55  ;;  %v1931_v55 = vld [vmem:[%s4914_s21 + $0x8] sm:$0xff]  ;;  %vm1836_vm14 = vweird.f32 %v1828_v26  ;;  %1793 = vmatpush.msrb.mxu1 %v1777_v33 }
0x113d   :  { %1952 = vmatpush.msra.mxu3 %v1931_v55  ;;  %v1775_v55 = vld [vmem:[%s4131_s12 + $0x8] sm:$0xff] }
0x113e   :  { %v1562_v37 = vsel %vm296_vm2, %v1554_v36, 0.0  ;;  %1794 = vmatpush.msrb.mxu1 %v1776_v34 }
0x113f   :  { %1563 = vadd.xlane.f32.xlu1 %v1562_v37  ;;  %v1899_v37 = vld [vmem:[%s4913_s17] sm:$0xff]  ;;  %1953 = vmatpush.msra.mxu3 %v1930_v38 }
0x1140   :  { %1922 = vmatpush.msra.mxu2 %v1899_v37  ;;  %1795 = vmatpush.msrb.mxu1 %v1775_v55  ;;  %v1864_v37 = vld [vmem:[%s4917_s14 + $0x10] sm:$0xff] }
0x1142   :  { %2071 = vmatpush.msrb.mxu2 %v3459_v3 }
0x1145   :  { %v1646_v32 = vpop.f32.mrf.mxu3 }
0x1146   :  { %v1647_v43 = vadd.f32 %v4484_v40, %v1646_v32 }
0x1148   :  { %v3430_v45 = vmul.f32 -1.702, %v1647_v43 }
0x114a   :  { %v1656_v48 = vmul.f32 1.442695, %v3430_v45 }
0x114c   :  { %3752 = vpow2.f32 %v1656_v48 }
0x1152   :  { %v3753_v50 = vpop.eup %3752 }
0x1153   :  { %v1660_v51 = vadd.f32 1.0, %v3753_v50 }
0x1155   :  { %3754 = vrcp.f32 %v1660_v51  ;;  %v1673_v56 = vand.u32 2147483648, %v1660_v51  ;;  %v1671_v58 = vand.u32 2147483647, %v1660_v51  ;;  %vm1667_vm10 = vweird.f32 %v1660_v51 }
0x1156   :  { %3756 = vrsqrt.f32 %v1828_v26 }
0x1157   :  { %v1674_v62 = vor.u32 1.1754944e-38, %v1673_v56  ;;  %vm1672_vm12 = vcmp.eq.f32.partialorder %v1671_v58, 8.507059e+37 }
0x115b   :  { %v3755_v52 = vpop.eup %3754 }
0x115c   :  { %v1663_v53 = vmul.f32 %v3755_v52, %v1660_v51  ;;  %vm1668_vm9 = vweird.f32 %v3755_v52  ;;  %v3663_v51 = vld [vmem:[%s4916_s8] ss:$0 sm:$0xff] }
0x115d   :  { %vm1669_vm11 = vmor %vm1667_vm10, %vm1668_vm9 }
0x115e   :  { %v1664_v54 = vsub.f32 1.0, %v1663_v53 }
0x1160   :  { %v1665_v57 = vmul.f32 %v3755_v52, %v1664_v54 }
0x1162   :  { %v1666_v60 = vadd.f32 %v3755_v52, %v1665_v57 }
0x1164   :  { %v1670_v15 = vsel %vm1669_vm11, %v3755_v52, %v1666_v60 }
0x1165   :  { %v1675_v63 = vsel %vm1672_vm12, %v1674_v62, %v1670_v15 }
0x1166   :  { %v1692_v0 = vmul.f32 %v1675_v63, %v1647_v43 }
0x1168   :  { %3441 = vmatmul.msk.f32.vlgmr.msra.gmra.mxu0 %vm237_vm0, %v1692_v0 }
0x11b2   :  { %v1564_v4 = vpop.xlane.xlu1 %1563 }
0x11b3   :  { %v1566_v5 = vmul.f32 %v1564_v4, %v4175_v46  ;;  %v3465_v4 = vld [vmem:[%s4913_s17 + $0x30] sm:$0xff] }
0x11b5   :  { %v4504_v6 = vsub.f32 %v1554_v36, %v1566_v5  ;;  %v3757_v36 = vpop.eup %3756 }
0x11b6   :  { %v1831_v39 = vmul.f32 %v3757_v36, %v1828_v26  ;;  %vm1837_vm15 = vweird.f32 %v3757_v36 }
0x11b7   :  { %v1570_v7 = vmul.f32 %v4504_v6, %v4504_v6  ;;  %vm1838_vm7 = vmor %vm1836_vm14, %vm1837_vm15 }
0x11b8   :  { %v1832_v32 = vmul.f32 %v3757_v36, %v1831_v39 }
0x11b9   :  { %v1574_v8 = vsel %vm296_vm2, %v1570_v7, 0.0 }
0x11ba   :  { %1575 = vadd.xlane.f32.xlu2 %v1574_v8  ;;  %v1833_v42 = vmul.f32 0.5, %v1832_v32  ;;  %v3464_v8 = vld [vmem:[%s4913_s17 + $0x28] sm:$0xff]  ;;  %v1862_v32 = vld [vmem:[%s4917_s14] sm:$0xff] }
0x11bc   :  { %v1834_v43 = vsub.f32 1.5, %v1833_v42 }
0x11be   :  { %v1835_v44 = vmul.f32 %v3757_v36, %v1834_v43 }
0x11c0   :  { %v1839_v50 = vsel %vm1838_vm7, %v3757_v36, %v1835_v44 }
0x11c1   :  { %v1850_v52 = vmul.f32 %v1839_v50, %v4498_v2 }
0x11c3   :  { %v1855_v54 = vmul.f32 %v3662_v49, %v1850_v52 }
0x11c5   :  { %v4536_v57 = vadd.f32 %v3663_v51, %v1855_v54 }
0x11c7   :  { %3446 = vmatmul.msk.f32.vlgmr.msra.gmra.mxu2 %vm292_vm1, %v4536_v57 }
0x11e5   :  { %v1731_v11 = vpop.f32.mrf.mxu0 }
0x11e6   :  { %v1732_v12 = vadd.f32 %v3661_v9, %v1731_v11  ;;  %v3463_v11 = vld [vmem:[%s4913_s17 + $0x20] sm:$0xff] }
0x11e8   :  { %v1736_v14 = vadd.f32 %v1732_v12, %v4447_v59  ;;  %v1823_v59 = vsel %vm292_vm1, %v1819_v22, 0.0 }
0x11ea   :  { %v1738_v16 = vrot.slane %v1736_v14, 4 }
0x11ec   :  { %v4516_v18 = vsel %vm1740_vm13, %v1736_v14, %v1738_v16 }
0x11ed   :  { %v1744_v19 = vsel %vm296_vm2, %v4516_v18, 0.0 }
0x11ee   :  { %1745 = vadd.xlane.f32.xlu1 %v1744_v19 }
0x11f6   :  { %1824 = vadd.xlane.f32.xlu1 %v1823_v59 }
0x122d   :  { %v1576_v35 = vpop.xlane.xlu2 %1575 }
0x122e   :  { %v1578_v61 = vmul.f32 %v1576_v35, %v4175_v46  ;;  %v1774_v35 = vld [vmem:[%s4131_s12] sm:$0xff]  ;;  %s4919_s12 = sld [smem:[#allocation27_spill]] }
0x122f   :  { %1796 = vmatpush.msrb.mxu1 %v1774_v35  ;;  %v4616_v35 = vld [vmem:[%s4923_s2] sm:$0xff] }
0x1230   :  { %v1580_v41 = vadd.f32 1e-05, %v1578_v61  ;;  %v1865_v61 = vld [vmem:[%s4917_s14 + $0x18] sm:$0xff] }
0x1231   :  { %1888 = vmatpush.msra.mxu1 %v1865_v61 }
0x1232   :  { %3758 = vrsqrt.f32 %v1580_v41  ;;  %vm1597_vm3 = vweird.f32 %v1580_v41 }
0x1233   :  { %1889 = vmatpush.msra.mxu1 %v1864_v37 }
0x1234   :  { %v3667_v3 = vld [vmem:[%s4919_s12] ss:$0 sm:$0xff] }
0x1238   :  { %v3759_v45 = vpop.eup %3758 }
0x1239   :  { %v1592_v48 = vmul.f32 %v3759_v45, %v1580_v41  ;;  %vm1598_vm8 = vweird.f32 %v3759_v45 }
0x123a   :  { %vm1599_vm5 = vmor %vm1597_vm3, %vm1598_vm8 }
0x123b   :  { %v1593_v53 = vmul.f32 %v3759_v45, %v1592_v48 }
0x123d   :  { %v1594_v56 = vmul.f32 0.5, %v1593_v53 }
0x123f   :  { %v1595_v58 = vsub.f32 1.5, %v1594_v56 }
0x1241   :  { %v1596_v60 = vmul.f32 %v3759_v45, %v1595_v58 }
0x1243   :  { %v1600_v62 = vsel %vm1599_vm5, %v3759_v45, %v1596_v60 }
0x1244   :  { %v1602_v15 = vmul.f32 %v1600_v62, %v4504_v6  ;;  %v3457_v6 = vld [vmem:[%s4917_s14 + $0x28] sm:$0xff] }
0x1246   :  { %v1607_v63 = vmul.f32 %v4462_v20, %v1602_v15  ;;  %v3466_v20 = vld [vmem:[%s4913_s17 + $0x38] sm:$0xff] }
0x1247   :  { %2104 = vmatpush.msrb.mxu3 %v3466_v20 }
0x1248   :  { %v1612_v0 = vadd.f32 %v4466_v24, %v1607_v63  ;;  %v3458_v24 = vld [vmem:[%s4917_s14 + $0x30] sm:$0xff] }
0x1249   :  { %2072 = vmatpush.msrb.mxu2 %v3458_v24  ;;  %2105 = vmatpush.msrb.mxu3 %v3465_v4 }
0x124a   :  { %3429 = vmatmul.msk.f32.gmra.mxu3 %vm292_vm1, %v1612_v0  ;;  %v1924_v4 = vpop.f32.mrf.mxu2 }
0x124b   :  { %2073 = vmatpush.msrb.mxu2 %v3457_v6  ;;  %2106 = vmatpush.msrb.mxu3 %v3464_v8  ;;  %v3665_v6 = vld [vmem:[%s4920_s20] ss:$0 sm:$0xff] }
0x124d   :  { %2074 = vmatpush.msrb.mxu2 %v3456_v10  ;;  %2107 = vmatpush.msrb.mxu3 %v3463_v11 }
0x1252   :  { %3448 = vmatmul.msk.f32.vlgmr.msra.gmra.mxu3 %vm292_vm1, %v4536_v57 }
0x1261   :  { %v1746_v28 = vpop.xlane.xlu1 %1745 }
0x1262   :  { %v1747_v1 = vmul.f32 %v1746_v28, %v4175_v46  ;;  %v3664_v28 = vld [vmem:[%s4918_s24] ss:$0 sm:$0xff] }
0x1264   :  { %v4548_v2 = vsub.f32 %v4516_v18, %v1747_v1 }
0x1266   :  { %v1749_v21 = vmul.f32 %v4548_v2, %v4548_v2 }
0x1268   :  { %v1750_v5 = vsel %vm296_vm2, %v1749_v21, 0.0 }
0x1269   :  { %1751 = vadd.xlane.f32.xlu2 %v1750_v5  ;;  %v1825_v7 = vpop.xlane.xlu1 %1824 }
0x126a   :  { %v1827_v9 = vmul.f32 %v1825_v7, %v4175_v46  ;;  %v3666_v7 = vld [vmem:[%s4921_s27] ss:$0 sm:$0xff] }
0x126c   :  { %v1829_v12 = vadd.f32 1e-05, %v1827_v9 }
0x126e   :  { %3760 = vrsqrt.f32 %v1829_v12  ;;  %vm1846_vm6 = vweird.f32 %v1829_v12 }
0x1274   :  { %v3761_v13 = vpop.eup %3760 }
0x1275   :  { %v1841_v14 = vmul.f32 %v3761_v13, %v1829_v12  ;;  %vm1847_vm9 = vweird.f32 %v3761_v13  ;;  %v1925_v12 = vadd.f32 %v3665_v6, %v1924_v4  ;;  %v2047_v4 = vld [vmem:[%s4924_s7] sm:$0xff] }
0x1276   :  { %vm1848_vm10 = vmor %vm1846_vm6, %vm1847_vm9 }
0x1277   :  { %v1842_v16 = vmul.f32 %v3761_v13, %v1841_v14  ;;  %v3669_v14 = vld [vmem:[%s4920_s20 + $0x1] ss:$0 sm:$0xff] }
0x1279   :  { %v1843_v18 = vmul.f32 0.5, %v1842_v16 }
0x127b   :  { %v1844_v19 = vsub.f32 1.5, %v1843_v18 }
0x127d   :  { %v1845_v22 = vmul.f32 %v3761_v13, %v1844_v19 }
0x127f   :  { %v1849_v59 = vsel %vm1848_vm10, %v3761_v13, %v1845_v22  ;;  %v3473_v22 = vld [vmem:[%s4914_s21 + $0x38] sm:$0xff] }
0x1280   :  { %v1851_v23 = vmul.f32 %v1849_v59, %v4513_v17  ;;  %v3472_v59 = vld [vmem:[%s4914_s21 + $0x30] sm:$0xff] }
0x1282   :  { %v1856_v25 = vmul.f32 %v3662_v49, %v1851_v23  ;;  %v3471_v23 = vld [vmem:[%s4914_s21 + $0x28] sm:$0xff] }
0x1284   :  { %v4563_v26 = vadd.f32 %v3663_v51, %v1856_v25 }
0x1286   :  { %3447 = vmatmul.msk.f32.gmra.mxu2 %vm292_vm1, %v4563_v26  ;;  %3449 = vmatmul.msk.f32.gmra.mxu3 %vm292_vm1, %v4563_v26 }
0x128e   :  { %3461 = vmatmul.msk.f32.vlgmr.msrb.gmra.mxu2 %vm292_vm1, %v4536_v57  ;;  %3468 = vmatmul.msk.f32.vlgmr.msrb.gmra.mxu3 %vm292_vm1, %v4536_v57 }
0x1296   :  { %3462 = vmatmul.msk.f32.gmra.mxu2 %vm292_vm1, %v4563_v26  ;;  %3469 = vmatmul.msk.f32.gmra.mxu3 %vm292_vm1, %v4563_v26 }
0x12cd   :  { %v1649_v17 = vpop.f32.mrf.mxu3 }
0x12ce   :  { %v1650_v29 = vadd.f32 %v4484_v40, %v1649_v17  ;;  %v1863_v40 = vld [vmem:[%s4917_s14 + $0x8] sm:$0xff]  ;;  %v3470_v17 = vld [vmem:[%s4914_s21 + $0x20] sm:$0xff] }
0x12cf   :  { %1890 = vmatpush.msra.mxu1 %v1863_v40 }
0x12d0   :  { %v3431_v30 = vmul.f32 -1.702, %v1650_v29 }
0x12d1   :  { %1891 = vmatpush.msra.mxu1 %v1862_v32  ;;  %v3671_v32 = vld [vmem:[%s4921_s27 + $0x1] ss:$0 sm:$0xff] }
0x12d2   :  { %v1658_v31 = vmul.f32 1.442695, %v3431_v30  ;;  %v3670_v30 = vld [vmem:[%s4922_s4] ss:$0 sm:$0xff] }
0x12d4   :  { %3762 = vpow2.f32 %v1658_v31 }
0x12d5   :  { %v1955_v5 = vpop.f32.mrf.mxu3 }
0x12d6   :  { %v1956_v11 = vadd.f32 %v3666_v7, %v1955_v5 }
0x12da   :  { %v3763_v36 = vpop.eup %3762 }
0x12db   :  { %v1661_v38 = vadd.f32 1.0, %v3763_v36 }
0x12dc   :  { %v1752_v39 = vpop.xlane.xlu2 %1751 }
0x12dd   :  { %3764 = vrcp.f32 %v1661_v38  ;;  %v1753_v41 = vmul.f32 %v1752_v39, %v4175_v46  ;;  %v1688_v49 = vand.u32 2147483648, %v1661_v38  ;;  %v1686_v51 = vand.u32 2147483647, %v1661_v38 }
0x12de   :  { %vm1682_vm12 = vweird.f32 %v1661_v38 }
0x12df   :  { %v1754_v42 = vadd.f32 1e-05, %v1753_v41  ;;  %v1689_v54 = vor.u32 1.1754944e-38, %v1688_v49  ;;  %vm1687_vm15 = vcmp.eq.f32.partialorder %v1686_v51, 8.507059e+37 }
0x12e1   :  { %3766 = vrsqrt.f32 %v1754_v42  ;;  %vm1761_vm8 = vweird.f32 %v1754_v42 }
0x12e3   :  { %v3765_v43 = vpop.eup %3764 }
0x12e4   :  { %v1678_v44 = vmul.f32 %v3765_v43, %v1661_v38  ;;  %vm1683_vm11 = vweird.f32 %v3765_v43  ;;  %v4621_v38 = vld [vmem:[%s4923_s2 + $0x8] sm:$0xff] }
0x12e5   :  { %vm1684_vm14 = vmor %vm1682_vm12, %vm1683_vm11 }
0x12e6   :  { %v1679_v45 = vsub.f32 1.0, %v1678_v44 }
0x12e7   :  { %v3767_v48 = vpop.eup %3766 }
0x12e8   :  { %v1680_v50 = vmul.f32 %v3765_v43, %v1679_v45  ;;  %v1756_v52 = vmul.f32 %v3767_v48, %v1754_v42  ;;  %vm1762_vm7 = vweird.f32 %v3767_v48 }
0x12e9   :  { %vm1763_vm3 = vmor %vm1761_vm8, %vm1762_vm7 }
0x12ea   :  { %v1681_v53 = vadd.f32 %v3765_v43, %v1680_v50  ;;  %v1757_v56 = vmul.f32 %v3767_v48, %v1756_v52 }
0x12ec   :  { %v1685_v58 = vsel %vm1684_vm14, %v3765_v43, %v1681_v53  ;;  %v1758_v62 = vmul.f32 0.5, %v1757_v56 }
0x12ed   :  { %v1690_v60 = vsel %vm1687_vm15, %v1689_v54, %v1685_v58 }
0x12ee   :  { %v1693_v15 = vmul.f32 %v1690_v60, %v1650_v29  ;;  %v1759_v63 = vsub.f32 1.5, %v1758_v62  ;;  %v2048_v60 = vld [vmem:[%s4924_s7 + $0x8] sm:$0xff] }
0x12f0   :  { %3442 = vmatmul.msk.f32.gmra.mxu0 %vm237_vm0, %v1693_v15  ;;  %v1760_v0 = vmul.f32 %v3767_v48, %v1759_v63 }
0x12f2   :  { %v1764_v1 = vsel %vm1763_vm3, %v3767_v48, %v1760_v0 }
0x12f3   :  { %v1765_v21 = vmul.f32 %v1764_v1, %v4548_v2 }
0x12f5   :  { %v1769_v20 = vmul.f32 %v3664_v28, %v1765_v21  ;;  %v3668_v21 = vld [vmem:[%s4922_s4 + $0x1] ss:$0 sm:$0xff] }
0x12f7   :  { %v1773_v24 = vadd.f32 %v3667_v3, %v1769_v20 }
0x12f9   :  { %3443 = vmatmul.msk.f32.vlgmr.msrb.gmra.mxu1 %vm292_vm1, %v1773_v24 }
0x1301   :  { %3444 = vmatmul.msk.f32.vlgmr.msra.gmra.mxu1 %vm292_vm1, %v4536_v57 }
0x1309   :  { %v1927_v8 = vpop.f32.mrf.mxu2  ;;  %v1958_v9 = vpop.f32.mrf.mxu3  ;;  %3445 = vmatmul.msk.f32.gmra.mxu1 %vm292_vm1, %v4563_v26 }
0x130a   :  { %v1928_v2 = vadd.f32 %v3665_v6, %v1927_v8  ;;  %v1959_v10 = vadd.f32 %v3666_v7, %v1958_v9 }
0x130c   :  { %3450 = vmatpush.xpose.msk.msrb.mxu0 %vm512_vm4, %v1928_v2  ;;  %2038 = vmatpush.msrb.mxu1 %v1959_v10 }
0x130e   :  { %2039 = vmatpush.msrb.mxu1 %v1956_v11 }
0x1310   :  { %3451 = vmatpush.xpose.msk.msrb.mxu0 %vm512_vm4, %v1925_v12 }
0x1311   :  { %v2109_v13 = vpop.f32.mrf.mxu3  ;;  %v2076_v1 = vpop.f32.mrf.mxu2 }
0x1312   :  { %v2110_v19 = vadd.f32 %v3669_v14, %v2109_v13  ;;  %v2077_v3 = vadd.f32 %v3668_v21, %v2076_v1 }
0x1314   :  { %2137 = vmatpush.msra.mxu0 %v3473_v22 }
0x1316   :  { %2138 = vmatpush.msra.mxu0 %v3472_v59 }
0x1318   :  { %2139 = vmatpush.msra.mxu0 %v3471_v23 }
0x1319   :  { %v2112_v16 = vpop.f32.mrf.mxu3  ;;  %v2079_v20 = vpop.f32.mrf.mxu2 }
0x131a   :  { %v2113_v18 = vadd.f32 %v3669_v14, %v2112_v16  ;;  %2140 = vmatpush.msra.mxu0 %v3470_v17  ;;  %v2080_v24 = vadd.f32 %v3668_v21, %v2079_v20  ;;  %v3484_v17 = vld [vmem:[%s4924_s7 + $0x18] sm:$0xff] }
0x131b   :  { %2257 = vmatpush.msra.mxu3 %v3484_v17 }
0x131c   :  { %3477 = vmatpush.xpose.msk.msra.mxu1 %vm512_vm4, %v2113_v18 }
0x1320   :  { %3478 = vmatpush.xpose.msk.msra.mxu1 %vm512_vm4, %v2110_v19 }
0x136d   :  { %v1734_v25 = vpop.f32.mrf.mxu0 }
0x1376   :  { %v1798_v29 = vpop.f32.mrf.mxu1 }
0x1377   :  { %1801 = vst [vmem:[%s4136_s19] sm:$0x3] %v1798_v29 }
0x137e   :  { %v1893_v31 = vpop.f32.mrf.mxu1 }
0x137f   :  { %v1894_v33 = vadd.f32 %v3670_v30, %v1893_v31 }
0x1381   :  { %3452 = vmatmul.msk.f32.vlgmr.msrb.gmra.mxu0 %vm512_vm4, %v1894_v33 }
0x1382   :  { %2286 = vmatpush.msrb.mxu0 %v2048_v60 }
0x1384   :  { %2287 = vmatpush.msrb.mxu0 %v2047_v4 }
0x1386   :  { %v1896_v34 = vpop.f32.mrf.mxu1 }
0x1387   :  { %v1897_v55 = vadd.f32 %v3670_v30, %v1896_v34 }
0x1389   :  { %3453 = vmatmul.msk.f32.gmra.mxu0 %vm512_vm4, %v1897_v55 }
0x1391   :  { %3475 = vmatmul.msk.f32.vlgmr.msra.gmra.mxu0 %vm292_vm1, %v4536_v57 }
0x1399   :  { %3476 = vmatmul.msk.f32.gmra.mxu0 %vm292_vm1, %v4563_v26 }
0x13fe   :  { %v1990_v36 = vpop.f32.mrf.mxu0 }
0x13ff   :  { %v1991_v61 = vadd.f32 %v1990_v36, %v4616_v35  ;;  %v3483_v36 = vld [vmem:[%s4924_s7 + $0x10] sm:$0xff] }
0x1400   :  { %2258 = vmatpush.msra.mxu3 %v3483_v36  ;;  %v2442_v36 = vld [vmem:[%s4929_s18 + $0x20] sm:$0xff] }
0x1401   :  { %v1996_v37 = vsel %vm512_vm4, %v1991_v61, -inf }
0x1402   :  { %1997 = vmax.xlane.f32.xlu0 %v1996_v37 }
0x1406   :  { %v1993_v39 = vpop.f32.mrf.mxu0 }
0x1407   :  { %v1994_v40 = vadd.f32 %v1993_v39, %v4621_v38 }
0x1409   :  { %v1999_v41 = vsel %vm512_vm4, %v1994_v40, -inf }
0x140a   :  { %2000 = vmax.xlane.f32.xlu1 %v1999_v41 }
0x140e   :  { %v2142_v57 = vpop.f32.mrf.mxu0 }
0x140f   :  { %v2143_v43 = vadd.f32 %v3671_v32, %v2142_v57  ;;  %v3672_v57 = vld [vmem:[%s4925_s10] ss:$0 sm:$0xff] }
0x1416   :  { %v2145_v42 = vpop.f32.mrf.mxu0 }
0x1417   :  { %v2146_v26 = vadd.f32 %v3671_v32, %v2145_v42 }
0x1419   :  { %2225 = vmatpush.msra.mxu2 %v2146_v26 }
0x141b   :  { %2226 = vmatpush.msra.mxu2 %v2143_v43 }
0x1475   :  { %v1998_v44 = vpop.xlane.xlu0 %1997 }
0x1476   :  { %v2002_v45 = vsub.f32 %v1991_v61, %v1998_v44 }
0x1478   :  { %v2004_v49 = vmul.f32 1.442695, %v2002_v45 }
0x147a   :  { %3768 = vpow2.f32 %v2004_v49 }
0x147d   :  { %v2001_v48 = vpop.xlane.xlu1 %2000 }
0x147e   :  { %v2003_v50 = vsub.f32 %v1994_v40, %v2001_v48 }
0x1480   :  { %v3769_v51 = vpop.eup %3768  ;;  %v2006_v52 = vmul.f32 1.442695, %v2003_v50 }
0x1481   :  { %v2008_v53 = vsel %vm512_vm4, %v3769_v51, 0.0 }
0x1482   :  { %3770 = vpow2.f32 %v2006_v52  ;;  %2009 = vadd.xlane.f32.xlu2 %v2008_v53 }
0x1488   :  { %v3771_v54 = vpop.eup %3770 }
0x1489   :  { %v2011_v56 = vsel %vm512_vm4, %v3771_v54, 0.0 }
0x148a   :  { %2012 = vadd.xlane.f32.xlu0 %v2011_v56 }
0x14f5   :  { %v2010_v58 = vpop.xlane.xlu2 %2009 }
0x14f6   :  { %3772 = vrcp.f32 %v2010_v58 }
0x14fc   :  { %v3773_v62 = vpop.eup %3772 }
0x14fd   :  { %v2016_v15 = vmul.f32 %v3773_v62, %v3769_v51  ;;  %v2013_v63 = vpop.xlane.xlu0 %2012 }
0x14fe   :  { %3774 = vrcp.f32 %v2013_v63  ;;  %v2361_v63 = vld [vmem:[%s4926_s11 + $0x10] sm:$0xff] }
0x14ff   :  { %3454 = vmatmul.msk.f32.vlgmr.msrb.gmra.mxu1 %vm512_vm4, %v2016_v15  ;;  %v2362_v15 = vld [vmem:[%s4926_s11 + $0x18] sm:$0xff] }
0x1500   :  { %2385 = vmatpush.msrb.mxu1 %v2362_v15 }
0x1502   :  { %2386 = vmatpush.msrb.mxu1 %v2361_v63 }
0x1504   :  { %v3775_v0 = vpop.eup %3774 }
0x1505   :  { %v2017_v28 = vmul.f32 %v3775_v0, %v3771_v54  ;;  %v2360_v0 = vld [vmem:[%s4926_s11 + $0x8] sm:$0xff] }
0x1506   :  { %2387 = vmatpush.msrb.mxu1 %v2360_v0 }
0x1507   :  { %3455 = vmatmul.msk.f32.gmra.mxu1 %vm512_vm4, %v2017_v28  ;;  %v2359_v28 = vld [vmem:[%s4926_s11] sm:$0xff] }
0x1508   :  { %2388 = vmatpush.msrb.mxu1 %v2359_v28 }
0x150f   :  { %3479 = vmatmul.msk.f32.vlgmr.msra.gmra.mxu1 %vm512_vm4, %v2077_v3 }
0x1517   :  { %3480 = vmatmul.msk.f32.gmra.mxu1 %vm512_vm4, %v2080_v24 }
0x157c   :  { %v2041_v5 = vpop.f32.mrf.mxu1 }
0x157d   :  { %3487 = vmatmul.msk.f32.vlgmr.msrb.gmra.mxu0 %vm512_vm4, %v2041_v5 }
0x1584   :  { %v2044_v6 = vpop.f32.mrf.mxu1 }
0x1585   :  { %3488 = vmatmul.msk.f32.gmra.mxu0 %vm512_vm4, %v2044_v6 }
0x158c   :  { %v2177_v7 = vpop.f32.mrf.mxu1 }
0x158d   :  { %v2178_v8 = vadd.f32 %v2177_v7, %v4616_v35 }
0x158f   :  { %v2183_v9 = vsel %vm512_vm4, %v2178_v8, -inf }
0x1590   :  { %2184 = vmax.xlane.f32.xlu1 %v2183_v9 }
0x1594   :  { %v2180_v2 = vpop.f32.mrf.mxu1 }
0x1595   :  { %v2181_v10 = vadd.f32 %v2180_v2, %v4621_v38 }
0x1597   :  { %v2186_v11 = vsel %vm512_vm4, %v2181_v10, -inf }
0x1598   :  { %2187 = vmax.xlane.f32.xlu2 %v2186_v11 }
0x15fa   :  { %v2289_v39 = vpop.f32.mrf.mxu0 }
0x1602   :  { %v2292_v43 = vpop.f32.mrf.mxu0 }
0x1603   :  { %v2185_v12 = vpop.xlane.xlu1 %2184 }
0x1604   :  { %v2189_v13 = vsub.f32 %v2178_v8, %v2185_v12  ;;  %v3673_v12 = vld [vmem:[%s4927_s15] ss:$0 sm:$0xff] }
0x1606   :  { %v2191_v14 = vmul.f32 1.442695, %v2189_v13 }
0x1608   :  { %3776 = vpow2.f32 %v2191_v14 }
0x160b   :  { %v2188_v16 = vpop.xlane.xlu2 %2187 }
0x160c   :  { %v2190_v18 = vsub.f32 %v2181_v10, %v2188_v16 }
0x160e   :  { %v3777_v19 = vpop.eup %3776  ;;  %v2193_v22 = vmul.f32 1.442695, %v2190_v18  ;;  %v3674_v18 = vld [vmem:[%s4928_s16] ss:$0 sm:$0xff] }
0x160f   :  { %v2195_v59 = vsel %vm512_vm4, %v3777_v19, 0.0 }
0x1610   :  { %3778 = vpow2.f32 %v2193_v22  ;;  %2196 = vadd.xlane.f32.xlu0 %v2195_v59 }
0x1616   :  { %v3779_v23 = vpop.eup %3778 }
0x1617   :  { %v2198_v25 = vsel %vm512_vm4, %v3779_v23, 0.0 }
0x1618   :  { %2199 = vadd.xlane.f32.xlu1 %v2198_v25 }
0x1683   :  { %v2197_v29 = vpop.xlane.xlu0 %2196 }
0x1684   :  { %3780 = vrcp.f32 %v2197_v29 }
0x168a   :  { %v3781_v30 = vpop.eup %3780 }
0x168b   :  { %v2203_v31 = vmul.f32 %v3781_v30, %v3777_v19  ;;  %v2200_v33 = vpop.xlane.xlu1 %2199 }
0x168c   :  { %3782 = vrcp.f32 %v2200_v33  ;;  %v2445_v33 = vld [vmem:[%s4929_s18 + $0x38] sm:$0xff] }
0x168d   :  { %3481 = vmatmul.msk.f32.vlgmr.msra.gmra.mxu2 %vm512_vm4, %v2203_v31 }
0x168e   :  { %2464 = vmatpush.msrb.mxu2 %v2445_v33 }
0x1692   :  { %v3783_v34 = vpop.eup %3782 }
0x1693   :  { %v2204_v55 = vmul.f32 %v3783_v34, %v3779_v23  ;;  %v2444_v34 = vld [vmem:[%s4929_s18 + $0x30] sm:$0xff] }
0x1694   :  { %2465 = vmatpush.msrb.mxu2 %v2444_v34  ;;  %v3500_v34 = vld [vmem:[%s4917_s14 + $0x58] sm:$0xff] }
0x1695   :  { %3482 = vmatmul.msk.f32.gmra.mxu2 %vm512_vm4, %v2204_v55  ;;  %v2443_v55 = vld [vmem:[%s4929_s18 + $0x28] sm:$0xff]  ;;  %2567 = vmatpush.msrb.mxu3 %v3500_v34 }
0x1696   :  { %2466 = vmatpush.msrb.mxu2 %v2443_v55  ;;  %v3507_v55 = vld [vmem:[%s4913_s17 + $0x58] sm:$0xff] }
0x1697   :  { %2600 = vmatpush.msra.mxu0 %v3507_v55  ;;  %v3543_v55 = vld [vmem:[%s4914_s21 + $0x78] sm:$0xff] }
0x1698   :  { %2467 = vmatpush.msrb.mxu2 %v2442_v36  ;;  %v3514_v36 = vld [vmem:[%s4914_s21 + $0x58] sm:$0xff] }
0x1699   :  { %2633 = vmatpush.msra.mxu1 %v3514_v36 }
0x1710   :  { %v2228_v61 = vpop.f32.mrf.mxu2 }
0x1711   :  { %3485 = vmatmul.msk.f32.vlgmr.msra.gmra.mxu3 %vm512_vm4, %v2228_v61  ;;  %v2441_v61 = vld [vmem:[%s4929_s18 + $0x18] sm:$0xff] }
0x1712   :  { %2468 = vmatpush.msrb.mxu2 %v2441_v61  ;;  %v3499_v61 = vld [vmem:[%s4917_s14 + $0x50] sm:$0xff] }
0x1713   :  { %2568 = vmatpush.msrb.mxu3 %v3499_v61  ;;  %v3542_v61 = vld [vmem:[%s4914_s21 + $0x70] sm:$0xff] }
0x1718   :  { %v2231_v37 = vpop.f32.mrf.mxu2 }
0x1719   :  { %3486 = vmatmul.msk.f32.gmra.mxu3 %vm512_vm4, %v2231_v37  ;;  %v3675_v37 = vld [vmem:[%s4930_s22] ss:$0 sm:$0xff] }
0x1794   :  { %v2260_v40 = vpop.f32.mrf.mxu3 }
0x1795   :  { %v2290_v41 = vadd.f32 %v2289_v39, %v2260_v40  ;;  %v2440_v39 = vld [vmem:[%s4929_s18 + $0x10] sm:$0xff]  ;;  %v2439_v40 = vld [vmem:[%s4929_s18 + $0x8] sm:$0xff] }
0x1796   :  { %2469 = vmatpush.msrb.mxu2 %v2440_v39  ;;  %v3513_v39 = vld [vmem:[%s4914_s21 + $0x50] sm:$0xff] }
0x1797   :  { %v2295_v32 = vadd.f32 %v2290_v41, %v4472_v27  ;;  %2634 = vmatpush.msra.mxu1 %v3513_v39  ;;  %v3541_v39 = vld [vmem:[%s4914_s21 + $0x68] sm:$0xff] }
0x1798   :  { %2470 = vmatpush.msrb.mxu2 %v2439_v40  ;;  %v3498_v40 = vld [vmem:[%s4917_s14 + $0x48] sm:$0xff] }
0x1799   :  { %v4651_v42 = vadd.f32 %v3672_v57, %v2295_v32  ;;  %v2438_v32 = vld [vmem:[%s4929_s18] sm:$0xff]  ;;  %2569 = vmatpush.msrb.mxu3 %v3498_v40 }
0x179a   :  { %2471 = vmatpush.msrb.mxu2 %v2438_v32  ;;  %v3497_v32 = vld [vmem:[%s4917_s14 + $0x40] sm:$0xff] }
0x179b   :  { %v2305_v26 = vsel %vm292_vm1, %v4651_v42, 0.0  ;;  %2570 = vmatpush.msrb.mxu3 %v3497_v32  ;;  %v3540_v40 = vld [vmem:[%s4914_s21 + $0x60] sm:$0xff] }
0x179c   :  { %2306 = vadd.xlane.f32.xlu2 %v2305_v26  ;;  %v2263_v44 = vpop.f32.mrf.mxu3  ;;  %v3683_v32 = vld [vmem:[%s4920_s20 + $0x3] ss:$0 sm:$0xff] }
0x179d   :  { %v2293_v45 = vadd.f32 %v2292_v43, %v2263_v44 }
0x179f   :  { %v2296_v49 = vadd.f32 %v2293_v45, %v4491_v47 }
0x17a1   :  { %v4656_v48 = vadd.f32 %v3672_v57, %v2296_v49 }
0x17a3   :  { %v2308_v50 = vsel %vm292_vm1, %v4656_v48, 0.0 }
0x17a4   :  { %2309 = vadd.xlane.f32.xlu0 %v2308_v50 }
0x180f   :  { %v2307_v27 = vpop.xlane.xlu2 %2306 }
0x1810   :  { %v2311_v51 = vmul.f32 %v2307_v27, %v4175_v46 }
0x1812   :  { %v2313_v52 = vsub.f32 %v4651_v42, %v2311_v51 }
0x1814   :  { %v2315_v53 = vmul.f32 %v2313_v52, %v2313_v52 }
0x1816   :  { %v2317_v54 = vsel %vm292_vm1, %v2315_v53, 0.0 }
0x1817   :  { %2318 = vadd.xlane.f32.xlu1 %v2317_v54  ;;  %v2310_v47 = vpop.xlane.xlu0 %2309 }
0x1818   :  { %v2312_v56 = vmul.f32 %v2310_v47, %v4175_v46 }
0x181a   :  { %v2314_v58 = vsub.f32 %v4656_v48, %v2312_v56 }
0x181c   :  { %v2316_v60 = vmul.f32 %v2314_v58, %v2314_v58 }
0x181e   :  { %v2320_v62 = vsel %vm292_vm1, %v2316_v60, 0.0 }
0x181f   :  { %2321 = vadd.xlane.f32.xlu2 %v2320_v62 }
0x188a   :  { %v2319_v1 = vpop.xlane.xlu1 %2318 }
0x188b   :  { %v2323_v21 = vmul.f32 %v2319_v1, %v4175_v46 }
0x188d   :  { %v2325_v3 = vadd.f32 1e-05, %v2323_v21 }
0x188f   :  { %3784 = vrsqrt.f32 %v2325_v3  ;;  %vm2333_vm6 = vweird.f32 %v2325_v3 }
0x1892   :  { %v2322_v20 = vpop.xlane.xlu2 %2321 }
0x1893   :  { %v2324_v24 = vmul.f32 %v2322_v20, %v4175_v46 }
0x1895   :  { %v3785_v4 = vpop.eup %3784  ;;  %v2326_v5 = vadd.f32 1e-05, %v2324_v24 }
0x1896   :  { %v2328_v6 = vmul.f32 %v3785_v4, %v2325_v3  ;;  %vm2334_vm5 = vweird.f32 %v3785_v4 }
0x1897   :  { %3786 = vrsqrt.f32 %v2326_v5  ;;  %vm2335_vm9 = vmor %vm2333_vm6, %vm2334_vm5  ;;  %vm2343_vm11 = vweird.f32 %v2326_v5 }
0x1898   :  { %v2329_v7 = vmul.f32 %v3785_v4, %v2328_v6 }
0x189a   :  { %v2330_v8 = vmul.f32 0.5, %v2329_v7 }
0x189c   :  { %v2331_v9 = vsub.f32 1.5, %v2330_v8 }
0x189d   :  { %v3787_v2 = vpop.eup %3786 }
0x189e   :  { %v2332_v10 = vmul.f32 %v3785_v4, %v2331_v9  ;;  %v2338_v11 = vmul.f32 %v3787_v2, %v2326_v5  ;;  %vm2344_vm10 = vweird.f32 %v3787_v2 }
0x189f   :  { %vm2345_vm12 = vmor %vm2343_vm11, %vm2344_vm10 }
0x18a0   :  { %v2336_v13 = vsel %vm2335_vm9, %v3785_v4, %v2332_v10  ;;  %v2339_v14 = vmul.f32 %v3787_v2, %v2338_v11  ;;  %v3676_v10 = vld [vmem:[%s4931_s23] ss:$0 sm:$0xff] }
0x18a1   :  { %v2347_v16 = vmul.f32 %v2336_v13, %v2313_v52 }
0x18a2   :  { %v2340_v19 = vmul.f32 0.5, %v2339_v14 }
0x18a3   :  { %v2352_v22 = vmul.f32 %v3673_v12, %v2347_v16 }
0x18a4   :  { %v2341_v59 = vsub.f32 1.5, %v2340_v19 }
0x18a5   :  { %v2357_v23 = vadd.f32 %v3674_v18, %v2352_v22 }
0x18a6   :  { %v2342_v25 = vmul.f32 %v3787_v2, %v2341_v59 }
0x18a7   :  { %3489 = vmatmul.msk.f32.vlgmr.msrb.gmra.mxu1 %vm292_vm1, %v2357_v23 }
0x18a8   :  { %v2346_v17 = vsel %vm2345_vm12, %v3787_v2, %v2342_v25 }
0x18a9   :  { %v2348_v29 = vmul.f32 %v2346_v17, %v2314_v58 }
0x18ab   :  { %v2353_v30 = vmul.f32 %v3673_v12, %v2348_v29 }
0x18ad   :  { %v2358_v31 = vadd.f32 %v3674_v18, %v2353_v30 }
0x18af   :  { %3490 = vmatmul.msk.f32.gmra.mxu1 %vm292_vm1, %v2358_v31 }
0x1924   :  { %v2390_v41 = vpop.f32.mrf.mxu1 }
0x1925   :  { %v2391_v57 = vadd.f32 %v3675_v37, %v2390_v41  ;;  %v3505_v41 = vld [vmem:[%s4913_s17 + $0x48] sm:$0xff] }
0x1927   :  { %v3491_v26 = vmul.f32 -1.702, %v2391_v57 }
0x1929   :  { %v2400_v43 = vmul.f32 1.442695, %v3491_v26  ;;  %v3504_v26 = vld [vmem:[%s4913_s17 + $0x40] sm:$0xff] }
0x192b   :  { %3788 = vpow2.f32 %v2400_v43  ;;  %v3511_v43 = vld [vmem:[%s4914_s21 + $0x40] sm:$0xff] }
0x192c   :  { %v2393_v44 = vpop.f32.mrf.mxu1 }
0x192d   :  { %v2394_v45 = vadd.f32 %v3675_v37, %v2393_v44  ;;  %v3506_v37 = vld [vmem:[%s4913_s17 + $0x50] sm:$0xff] }
0x192e   :  { %2601 = vmatpush.msra.mxu0 %v3506_v37 }
0x192f   :  { %v3492_v49 = vmul.f32 -1.702, %v2394_v45 }
0x1930   :  { %2602 = vmatpush.msra.mxu0 %v3505_v41 }
0x1931   :  { %v3789_v50 = vpop.eup %3788  ;;  %v2402_v27 = vmul.f32 1.442695, %v3492_v49 }
0x1932   :  { %v2404_v51 = vadd.f32 1.0, %v3789_v50  ;;  %2603 = vmatpush.msra.mxu0 %v3504_v26  ;;  %v3529_v50 = vld [vmem:[%s4917_s14 + $0x78] sm:$0xff] }
0x1933   :  { %3790 = vpow2.f32 %v2402_v27  ;;  %v3536_v27 = vld [vmem:[%s4913_s17 + $0x78] sm:$0xff] }
0x1934   :  { %3792 = vrcp.f32 %v2404_v51  ;;  %v2417_v58 = vand.u32 2147483648, %v2404_v51  ;;  %v2415_v62 = vand.u32 2147483647, %v2404_v51  ;;  %vm2411_vm15 = vweird.f32 %v2404_v51  ;;  %2755 = vmatpush.msrb.mxu0 %v3529_v50 }
0x1936   :  { %v2418_v0 = vor.u32 1.1754944e-38, %v2417_v58  ;;  %vm2416_vm8 = vcmp.eq.f32.partialorder %v2415_v62, 8.507059e+37  ;;  %v3526_v58 = vld [vmem:[%s4917_s14 + $0x60] sm:$0xff] }
0x1939   :  { %v3791_v52 = vpop.eup %3790 }
0x193a   :  { %v3793_v53 = vpop.eup %3792  ;;  %v2405_v54 = vadd.f32 1.0, %v3791_v52  ;;  %v3535_v52 = vld [vmem:[%s4913_s17 + $0x70] sm:$0xff] }
0x193b   :  { %v2407_v47 = vmul.f32 %v3793_v53, %v2404_v51  ;;  %vm2412_vm14 = vweird.f32 %v3793_v53  ;;  %v3528_v51 = vld [vmem:[%s4917_s14 + $0x70] sm:$0xff] }
0x193c   :  { %3794 = vrcp.f32 %v2405_v54  ;;  %vm2413_vm7 = vmor %vm2411_vm15, %vm2412_vm14  ;;  %v2432_v24 = vand.u32 2147483648, %v2405_v54  ;;  %v2430_v5 = vand.u32 2147483647, %v2405_v54  ;;  %vm2426_vm5 = vweird.f32 %v2405_v54  ;;  %2756 = vmatpush.msrb.mxu0 %v3528_v51 }
0x193d   :  { %v2408_v56 = vsub.f32 1.0, %v2407_v47  ;;  %v3534_v47 = vld [vmem:[%s4913_s17 + $0x68] sm:$0xff] }
0x193e   :  { %v2433_v7 = vor.u32 1.1754944e-38, %v2432_v24  ;;  %vm2431_vm9 = vcmp.eq.f32.partialorder %v2430_v5, 8.507059e+37  ;;  %v3677_v24 = vld [vmem:[%s4915_s29 + $0x1] ss:$0 sm:$0xff] }
0x193f   :  { %v2409_v60 = vmul.f32 %v3793_v53, %v2408_v56 }
0x1941   :  { %v2410_v15 = vadd.f32 %v3793_v53, %v2409_v60  ;;  %v3533_v60 = vld [vmem:[%s4913_s17 + $0x60] sm:$0xff] }
0x1942   :  { %v3795_v63 = vpop.eup %3794 }
0x1943   :  { %v2414_v28 = vsel %vm2413_vm7, %v3793_v53, %v2410_v15  ;;  %v2422_v1 = vmul.f32 %v3795_v63, %v2405_v54  ;;  %vm2427_vm3 = vweird.f32 %v3795_v63  ;;  %v3527_v54 = vld [vmem:[%s4917_s14 + $0x68] sm:$0xff] }
0x1944   :  { %v2419_v21 = vsel %vm2416_vm8, %v2418_v0, %v2414_v28  ;;  %vm2428_vm6 = vmor %vm2426_vm5, %vm2427_vm3  ;;  %2757 = vmatpush.msrb.mxu0 %v3527_v54  ;;  %v3684_v54 = vld [vmem:[%s4921_s27 + $0x3] ss:$0 sm:$0xff] }
0x1945   :  { %v2436_v3 = vmul.f32 %v2419_v21, %v2391_v57  ;;  %v2423_v20 = vsub.f32 1.0, %v2422_v1  ;;  %v3512_v57 = vld [vmem:[%s4914_s21 + $0x48] sm:$0xff] }
0x1946   :  { %2635 = vmatpush.msra.mxu1 %v3512_v57  ;;  %2758 = vmatpush.msrb.mxu0 %v3526_v58 }
0x1947   :  { %v2424_v4 = vmul.f32 %v3795_v63, %v2423_v20  ;;  %3493 = vmatmul.msk.f32.vlgmr.msrb.gmra.mxu2 %vm237_vm0, %v2436_v3 }
0x1948   :  { %2636 = vmatpush.msra.mxu1 %v3511_v43 }
0x1949   :  { %v2425_v6 = vadd.f32 %v3795_v63, %v2424_v4 }
0x194a   :  { %2788 = vmatpush.msrb.mxu1 %v3536_v27 }
0x194b   :  { %v2429_v8 = vsel %vm2428_vm6, %v3795_v63, %v2425_v6  ;;  %v3678_v6 = vld [vmem:[%s4916_s8 + $0x1] ss:$0 sm:$0xff] }
0x194c   :  { %v2434_v9 = vsel %vm2431_vm9, %v2433_v7, %v2429_v8  ;;  %2789 = vmatpush.msrb.mxu1 %v3535_v52 }
0x194d   :  { %v2437_v2 = vmul.f32 %v2434_v9, %v2394_v45 }
0x194e   :  { %2790 = vmatpush.msrb.mxu1 %v3534_v47 }
0x194f   :  { %3494 = vmatmul.msk.f32.gmra.mxu2 %vm237_vm0, %v2437_v2 }
0x1950   :  { %2791 = vmatpush.msrb.mxu1 %v3533_v60 }
0x19ca   :  { %v2473_v11 = vpop.f32.mrf.mxu2 }
0x19cb   :  { %v2474_v12 = vadd.f32 %v3676_v10, %v2473_v11 }
0x19cd   :  { %v4689_v13 = vadd.f32 %v2474_v12, %v4651_v42 }
0x19cf   :  { %v2485_v14 = vsel %vm292_vm1, %v4689_v13, 0.0 }
0x19d0   :  { %2486 = vadd.xlane.f32.xlu0 %v2485_v14 }
0x19d2   :  { %v2476_v16 = vpop.f32.mrf.mxu2 }
0x19d3   :  { %v2477_v18 = vadd.f32 %v3676_v10, %v2476_v16 }
0x19d5   :  { %v4694_v19 = vadd.f32 %v2477_v18, %v4656_v48 }
0x19d7   :  { %v2488_v22 = vsel %vm292_vm1, %v4694_v19, 0.0 }
0x19d8   :  { %2489 = vadd.xlane.f32.xlu1 %v2488_v22 }
0x1a43   :  { %v2487_v59 = vpop.xlane.xlu0 %2486 }
0x1a44   :  { %v2491_v42 = vmul.f32 %v2487_v59, %v4175_v46 }
0x1a46   :  { %v4700_v23 = vsub.f32 %v4689_v13, %v2491_v42  ;;  %v3679_v42 = vld [vmem:[%s4920_s20 + $0x2] ss:$0 sm:$0xff] }
0x1a48   :  { %v2495_v25 = vmul.f32 %v4700_v23, %v4700_v23 }
0x1a4a   :  { %v2497_v48 = vsel %vm292_vm1, %v2495_v25, 0.0 }
0x1a4b   :  { %v2490_v17 = vpop.xlane.xlu1 %2489  ;;  %2498 = vadd.xlane.f32.xlu2 %v2497_v48 }
0x1a4c   :  { %v2492_v29 = vmul.f32 %v2490_v17, %v4175_v46 }
0x1a4e   :  { %v4707_v30 = vsub.f32 %v4694_v19, %v2492_v29 }
0x1a50   :  { %v2496_v31 = vmul.f32 %v4707_v30, %v4707_v30 }
0x1a52   :  { %v2500_v33 = vsel %vm292_vm1, %v2496_v31, 0.0 }
0x1a53   :  { %2501 = vadd.xlane.f32.xlu0 %v2500_v33  ;;  %v3681_v33 = vld [vmem:[%s4922_s4 + $0x2] ss:$0 sm:$0xff] }
0x1abe   :  { %v2499_v44 = vpop.xlane.xlu2 %2498 }
0x1abf   :  { %v2503_v45 = vmul.f32 %v2499_v44, %v4175_v46 }
0x1ac1   :  { %v2505_v49 = vadd.f32 1e-05, %v2503_v45 }
0x1ac3   :  { %3796 = vrsqrt.f32 %v2505_v49  ;;  %vm2513_vm11 = vweird.f32 %v2505_v49 }
0x1ac6   :  { %v2502_v53 = vpop.xlane.xlu0 %2501 }
0x1ac7   :  { %v2504_v56 = vmul.f32 %v2502_v53, %v4175_v46 }
0x1ac9   :  { %v3797_v62 = vpop.eup %3796  ;;  %v2506_v15 = vadd.f32 1e-05, %v2504_v56 }
0x1aca   :  { %v2508_v63 = vmul.f32 %v3797_v62, %v2505_v49  ;;  %vm2514_vm10 = vweird.f32 %v3797_v62 }
0x1acb   :  { %3798 = vrsqrt.f32 %v2506_v15  ;;  %vm2515_vm12 = vmor %vm2513_vm11, %vm2514_vm10  ;;  %vm2523_vm15 = vweird.f32 %v2506_v15 }
0x1acc   :  { %v2509_v0 = vmul.f32 %v3797_v62, %v2508_v63 }
0x1ace   :  { %v2510_v28 = vmul.f32 0.5, %v2509_v0 }
0x1ad0   :  { %v2511_v1 = vsub.f32 1.5, %v2510_v28 }
0x1ad1   :  { %v3799_v21 = vpop.eup %3798 }
0x1ad2   :  { %v2512_v3 = vmul.f32 %v3797_v62, %v2511_v1  ;;  %v2518_v20 = vmul.f32 %v3799_v21, %v2506_v15  ;;  %vm2524_vm14 = vweird.f32 %v3799_v21 }
0x1ad3   :  { %vm2525_vm7 = vmor %vm2523_vm15, %vm2524_vm14 }
0x1ad4   :  { %v2516_v4 = vsel %vm2515_vm12, %v3797_v62, %v2512_v3  ;;  %v2519_v5 = vmul.f32 %v3799_v21, %v2518_v20 }
0x1ad5   :  { %v2527_v7 = vmul.f32 %v2516_v4, %v4700_v23  ;;  %v3680_v23 = vld [vmem:[%s4921_s27 + $0x2] ss:$0 sm:$0xff]  ;;  %v3525_v4 = vld [vmem:[%s4924_s7 + $0x28] sm:$0xff] }
0x1ad6   :  { %v2520_v8 = vmul.f32 0.5, %v2519_v5 }
0x1ad7   :  { %v2532_v9 = vmul.f32 %v3677_v24, %v2527_v7 }
0x1ad8   :  { %v2521_v2 = vsub.f32 1.5, %v2520_v8 }
0x1ad9   :  { %v2537_v10 = vadd.f32 %v3678_v6, %v2532_v9 }
0x1ada   :  { %v2522_v11 = vmul.f32 %v3799_v21, %v2521_v2 }
0x1adb   :  { %3502 = vmatmul.msk.f32.vlgmr.msrb.gmra.mxu3 %vm292_vm1, %v2537_v10  ;;  %3509 = vmatmul.msk.f32.vlgmr.msra.gmra.mxu0 %vm292_vm1, %v2537_v10 }
0x1adc   :  { %v2526_v12 = vsel %vm2525_vm7, %v3799_v21, %v2522_v11  ;;  %3516 = vmatmul.msk.f32.vlgmr.msra.gmra.mxu1 %vm292_vm1, %v2537_v10 }
0x1add   :  { %v2528_v14 = vmul.f32 %v2526_v12, %v4707_v30 }
0x1adf   :  { %v2533_v16 = vmul.f32 %v3677_v24, %v2528_v14 }
0x1ae1   :  { %v2538_v18 = vadd.f32 %v3678_v6, %v2533_v16  ;;  %v3524_v16 = vld [vmem:[%s4924_s7 + $0x20] sm:$0xff] }
0x1ae3   :  { %3503 = vmatmul.msk.f32.gmra.mxu3 %vm292_vm1, %v2538_v18  ;;  %3510 = vmatmul.msk.f32.gmra.mxu0 %vm292_vm1, %v2538_v18 }
0x1ae4   :  { %3517 = vmatmul.msk.f32.gmra.mxu1 %vm292_vm1, %v2538_v18 }
0x1aeb   :  { %3531 = vmatmul.msk.f32.vlgmr.msrb.gmra.mxu0 %vm292_vm1, %v2537_v10 }
0x1aec   :  { %3538 = vmatmul.msk.f32.vlgmr.msrb.gmra.mxu1 %vm292_vm1, %v2537_v10 }
0x1af3   :  { %3532 = vmatmul.msk.f32.gmra.mxu0 %vm292_vm1, %v2538_v18 }
0x1af4   :  { %3539 = vmatmul.msk.f32.gmra.mxu1 %vm292_vm1, %v2538_v18 }
0x1b58   :  { %v2605_v22 = vpop.f32.mrf.mxu0 }
0x1b59   :  { %v2638_v59 = vpop.f32.mrf.mxu1  ;;  %v2606_v34 = vadd.f32 %v3679_v42, %v2605_v22 }
0x1b5a   :  { %v2639_v31 = vadd.f32 %v3680_v23, %v2638_v59 }
0x1b5e   :  { %v2572_v30 = vpop.f32.mrf.mxu3 }
0x1b5f   :  { %v2573_v36 = vadd.f32 %v3681_v33, %v2572_v30 }
0x1b60   :  { %v2608_v25 = vpop.f32.mrf.mxu0 }
0x1b61   :  { %v2609_v48 = vadd.f32 %v3679_v42, %v2608_v25  ;;  %v2641_v17 = vpop.f32.mrf.mxu1 }
0x1b62   :  { %v2642_v29 = vadd.f32 %v3680_v23, %v2641_v17 }
0x1b63   :  { %3518 = vmatpush.xpose.msk.msra.mxu2 %vm512_vm4, %v2609_v48 }
0x1b64   :  { %2721 = vmatpush.msra.mxu3 %v2642_v29 }
0x1b66   :  { %2722 = vmatpush.msra.mxu3 %v2639_v31  ;;  %v2575_v41 = vpop.f32.mrf.mxu3 }
0x1b67   :  { %3519 = vmatpush.xpose.msk.msra.mxu2 %vm512_vm4, %v2606_v34  ;;  %v2576_v57 = vadd.f32 %v3681_v33, %v2575_v41 }
0x1b68   :  { %v2760_v2 = vpop.f32.mrf.mxu0 }
0x1b69   :  { %v2793_v37 = vpop.f32.mrf.mxu1 }
0x1b6a   :  { %3520 = vmatmul.msk.f32.vlgmr.msra.gmra.mxu2 %vm512_vm4, %v2573_v36  ;;  %v2794_v44 = vadd.f32 %v3683_v32, %v2793_v37  ;;  %v3554_v37 = vld [vmem:[%s4924_s7 + $0x38] sm:$0xff] }
0x1b6b   :  { %2821 = vmatpush.msrb.mxu2 %v3543_v55  ;;  %2941 = vmatpush.msra.mxu1 %v3554_v37 }
0x1b6d   :  { %2822 = vmatpush.msrb.mxu2 %v3542_v61 }
0x1b6f   :  { %2823 = vmatpush.msrb.mxu2 %v3541_v39 }
0x1b70   :  { %v2763_v12 = vpop.f32.mrf.mxu0 }
0x1b71   :  { %2824 = vmatpush.msrb.mxu2 %v3540_v40  ;;  %v2796_v26 = vpop.f32.mrf.mxu1 }
0x1b72   :  { %v2797_v43 = vadd.f32 %v3683_v32, %v2796_v26  ;;  %3521 = vmatmul.msk.f32.gmra.mxu2 %vm512_vm4, %v2576_v57 }
0x1b73   :  { %2970 = vmatpush.msra.mxu2 %v3525_v4  ;;  %v3565_v4 = vld [vmem:[%s4926_s11 + $0x38] sm:$0xff] }
0x1b74   :  { %3547 = vmatpush.xpose.msk.msrb.mxu3 %vm512_vm4, %v2797_v43  ;;  %v3553_v43 = vld [vmem:[%s4924_s7 + $0x30] sm:$0xff] }
0x1b75   :  { %2971 = vmatpush.msra.mxu2 %v3524_v16  ;;  %2942 = vmatpush.msra.mxu1 %v3553_v43  ;;  %v3688_v43 = vld [vmem:[%s4930_s22 + $0x1] ss:$0 sm:$0xff] }
0x1b78   :  { %3548 = vmatpush.xpose.msk.msrb.mxu3 %vm512_vm4, %v2794_v44 }
0x1b7a   :  { %3545 = vmatmul.msk.f32.vlgmr.msrb.gmra.mxu2 %vm292_vm1, %v2537_v10  ;;  %v3682_v10 = vld [vmem:[%s4922_s4 + $0x3] ss:$0 sm:$0xff] }
0x1b7b   :  { %v2761_v11 = vadd.f32 %v3682_v10, %v2760_v2  ;;  %v2764_v14 = vadd.f32 %v3682_v10, %v2763_v12 }
0x1b82   :  { %3546 = vmatmul.msk.f32.gmra.mxu2 %vm292_vm1, %v2538_v18 }
0x1bed   :  { %v2673_v45 = vpop.f32.mrf.mxu2 }
0x1bee   :  { %v2674_v49 = vadd.f32 %v2673_v45, %v4616_v35 }
0x1bf0   :  { %v2679_v50 = vsel %vm512_vm4, %v2674_v49, -inf }
0x1bf1   :  { %2680 = vmax.xlane.f32.xlu1 %v2679_v50 }
0x1bf5   :  { %v2676_v27 = vpop.f32.mrf.mxu2 }
0x1bf6   :  { %v2677_v51 = vadd.f32 %v2676_v27, %v4621_v38 }
0x1bf8   :  { %v2682_v52 = vsel %vm512_vm4, %v2677_v51, -inf }
0x1bf9   :  { %2683 = vmax.xlane.f32.xlu2 %v2682_v52 }
0x1bfd   :  { %v2826_v53 = vpop.f32.mrf.mxu2 }
0x1bfe   :  { %v2827_v58 = vadd.f32 %v3684_v54, %v2826_v53 }
0x1c05   :  { %v2829_v47 = vpop.f32.mrf.mxu2 }
0x1c06   :  { %v2830_v56 = vadd.f32 %v3684_v54, %v2829_v47 }
0x1c08   :  { %2909 = vmatpush.msra.mxu0 %v2830_v56 }
0x1c0a   :  { %2910 = vmatpush.msra.mxu0 %v2827_v58 }
0x1c64   :  { %v2681_v60 = vpop.xlane.xlu1 %2680 }
0x1c65   :  { %v2685_v62 = vsub.f32 %v2674_v49, %v2681_v60 }
0x1c67   :  { %v2687_v15 = vmul.f32 1.442695, %v2685_v62 }
0x1c69   :  { %3800 = vpow2.f32 %v2687_v15 }
0x1c6c   :  { %v2684_v63 = vpop.xlane.xlu2 %2683 }
0x1c6d   :  { %v2686_v0 = vsub.f32 %v2677_v51, %v2684_v63  ;;  %v3685_v51 = vld [vmem:[%s4925_s10 + $0x1] ss:$0 sm:$0xff] }
0x1c6f   :  { %v3801_v28 = vpop.eup %3800  ;;  %v2689_v1 = vmul.f32 1.442695, %v2686_v0 }
0x1c70   :  { %v2691_v21 = vsel %vm512_vm4, %v3801_v28, 0.0 }
0x1c71   :  { %3802 = vpow2.f32 %v2689_v1  ;;  %2692 = vadd.xlane.f32.xlu0 %v2691_v21 }
0x1c77   :  { %v3803_v3 = vpop.eup %3802 }
0x1c78   :  { %v2694_v20 = vsel %vm512_vm4, %v3803_v3, 0.0 }
0x1c79   :  { %2695 = vadd.xlane.f32.xlu1 %v2694_v20 }
0x1ce4   :  { %v2693_v24 = vpop.xlane.xlu0 %2692 }
0x1ce5   :  { %3804 = vrcp.f32 %v2693_v24 }
0x1ceb   :  { %v3805_v5 = vpop.eup %3804 }
0x1cec   :  { %v2699_v6 = vmul.f32 %v3805_v5, %v3801_v28  ;;  %v2696_v7 = vpop.xlane.xlu1 %2695  ;;  %v3564_v5 = vld [vmem:[%s4926_s11 + $0x30] sm:$0xff] }
0x1ced   :  { %3806 = vrcp.f32 %v2696_v7  ;;  %v3562_v7 = vld [vmem:[%s4926_s11 + $0x20] sm:$0xff] }
0x1cee   :  { %3522 = vmatmul.msk.f32.vlgmr.msra.gmra.mxu3 %vm512_vm4, %v2699_v6  ;;  %v3563_v6 = vld [vmem:[%s4926_s11 + $0x28] sm:$0xff] }
0x1cef   :  { %3074 = vmatpush.msra.mxu3 %v3565_v4 }
0x1cf1   :  { %3075 = vmatpush.msra.mxu3 %v3564_v5 }
0x1cf3   :  { %v3807_v8 = vpop.eup %3806  ;;  %3076 = vmatpush.msra.mxu3 %v3563_v6 }
0x1cf4   :  { %v2700_v9 = vmul.f32 %v3807_v8, %v3803_v3 }
0x1cf5   :  { %3077 = vmatpush.msra.mxu3 %v3562_v7 }
0x1cf6   :  { %3523 = vmatmul.msk.f32.gmra.mxu3 %vm512_vm4, %v2700_v9 }
0x1cfe   :  { %3549 = vmatmul.msk.f32.vlgmr.msrb.gmra.mxu3 %vm512_vm4, %v2761_v11 }
0x1d06   :  { %3550 = vmatmul.msk.f32.gmra.mxu3 %vm512_vm4, %v2764_v14 }
0x1d71   :  { %v2724_v18 = vpop.f32.mrf.mxu3 }
0x1d72   :  { %3557 = vmatmul.msk.f32.vlgmr.msra.gmra.mxu2 %vm512_vm4, %v2724_v18 }
0x1d79   :  { %v2727_v22 = vpop.f32.mrf.mxu3 }
0x1d7a   :  { %3558 = vmatmul.msk.f32.gmra.mxu2 %vm512_vm4, %v2727_v22 }
0x1d81   :  { %v2861_v59 = vpop.f32.mrf.mxu3 }
0x1d82   :  { %v2862_v42 = vadd.f32 %v2861_v59, %v4616_v35 }
0x1d84   :  { %v2867_v23 = vsel %vm512_vm4, %v2862_v42, -inf }
0x1d85   :  { %2868 = vmax.xlane.f32.xlu2 %v2867_v23 }
0x1d89   :  { %v2864_v25 = vpop.f32.mrf.mxu3 }
0x1d8a   :  { %v2865_v48 = vadd.f32 %v2864_v25, %v4621_v38 }
0x1d8c   :  { %v2870_v17 = vsel %vm512_vm4, %v2865_v48, -inf }
0x1d8d   :  { %2871 = vmax.xlane.f32.xlu0 %v2870_v17 }
0x1df5   :  { %v2973_v49 = vpop.f32.mrf.mxu2 }
0x1df8   :  { %v2869_v29 = vpop.xlane.xlu2 %2868 }
0x1df9   :  { %v2873_v30 = vsub.f32 %v2862_v42, %v2869_v29 }
0x1dfb   :  { %v2875_v31 = vmul.f32 1.442695, %v2873_v30  ;;  %v3687_v30 = vld [vmem:[%s4928_s16 + $0x1] ss:$0 sm:$0xff] }
0x1dfd   :  { %3808 = vpow2.f32 %v2875_v31  ;;  %v2976_v47 = vpop.f32.mrf.mxu2 }
0x1e00   :  { %v2872_v33 = vpop.xlane.xlu0 %2871 }
0x1e01   :  { %v2874_v34 = vsub.f32 %v2865_v48, %v2872_v33  ;;  %v3686_v48 = vld [vmem:[%s4927_s15 + $0x1] ss:$0 sm:$0xff] }
0x1e03   :  { %v3809_v55 = vpop.eup %3808  ;;  %v2877_v36 = vmul.f32 1.442695, %v2874_v34 }
0x1e04   :  { %v2879_v35 = vsel %vm512_vm4, %v3809_v55, 0.0 }
0x1e05   :  { %3810 = vpow2.f32 %v2877_v36  ;;  %2880 = vadd.xlane.f32.xlu1 %v2879_v35 }
0x1e0b   :  { %v3811_v61 = vpop.eup %3810 }
0x1e0c   :  { %v2882_v38 = vsel %vm512_vm4, %v3811_v61, 0.0 }
0x1e0d   :  { %2883 = vadd.xlane.f32.xlu2 %v2882_v38 }
0x1e78   :  { %v2881_v39 = vpop.xlane.xlu1 %2880 }
0x1e79   :  { %3812 = vrcp.f32 %v2881_v39 }
0x1e7f   :  { %v3813_v40 = vpop.eup %3812 }
0x1e80   :  { %v2887_v41 = vmul.f32 %v3813_v40, %v3809_v55  ;;  %v2884_v57 = vpop.xlane.xlu2 %2883  ;;  %v3578_v40 = vld [vmem:[%s4929_s18 + $0x78] sm:$0xff] }
0x1e81   :  { %3814 = vrcp.f32 %v2884_v57  ;;  %3155 = vmatpush.msrb.mxu0 %v3578_v40  ;;  %v3576_v57 = vld [vmem:[%s4929_s18 + $0x68] sm:$0xff]  ;;  %v3216_v40 = vld [vmem:[%s4932_s1] sm:$0xff] }
0x1e82   :  { %3551 = vmatmul.msk.f32.vlgmr.msra.gmra.mxu0 %vm512_vm4, %v2887_v41  ;;  %v3577_v41 = vld [vmem:[%s4929_s18 + $0x70] sm:$0xff] }
0x1e83   :  { %3156 = vmatpush.msrb.mxu0 %v3577_v41 }
0x1e85   :  { %3157 = vmatpush.msrb.mxu0 %v3576_v57 }
0x1e87   :  { %v3815_v32 = vpop.eup %3814 }
0x1e88   :  { %v2888_v26 = vmul.f32 %v3815_v32, %v3811_v61  ;;  %v3575_v32 = vld [vmem:[%s4929_s18 + $0x60] sm:$0xff] }
0x1e89   :  { %3158 = vmatpush.msrb.mxu0 %v3575_v32 }
0x1e8a   :  { %3552 = vmatmul.msk.f32.gmra.mxu0 %vm512_vm4, %v2888_v26  ;;  %v3574_v26 = vld [vmem:[%s4929_s18 + $0x58] sm:$0xff] }
0x1e8b   :  { %3159 = vmatpush.msrb.mxu0 %v3574_v26 }
0x1eff   :  { %v2912_v44 = vpop.f32.mrf.mxu0 }
0x1f00   :  { %3555 = vmatmul.msk.f32.vlgmr.msra.gmra.mxu1 %vm512_vm4, %v2912_v44  ;;  %v3573_v44 = vld [vmem:[%s4929_s18 + $0x50] sm:$0xff] }
0x1f01   :  { %3160 = vmatpush.msrb.mxu0 %v3573_v44 }
0x1f07   :  { %v2915_v45 = vpop.f32.mrf.mxu0 }
0x1f08   :  { %3556 = vmatmul.msk.f32.gmra.mxu1 %vm512_vm4, %v2915_v45 }
0x1f7d   :  { %v2944_v50 = vpop.f32.mrf.mxu1 }
0x1f7e   :  { %v2974_v27 = vadd.f32 %v2973_v49, %v2944_v50  ;;  %v3572_v49 = vld [vmem:[%s4929_s18 + $0x48] sm:$0xff] }
0x1f7f   :  { %3161 = vmatpush.msrb.mxu0 %v3572_v49 }
0x1f80   :  { %v2979_v52 = vadd.f32 %v2974_v27, %v4689_v13  ;;  %v3571_v27 = vld [vmem:[%s4929_s18 + $0x40] sm:$0xff] }
0x1f81   :  { %3162 = vmatpush.msrb.mxu0 %v3571_v27  ;;  %v3690_v27 = vld [vmem:[%s4933_s9] ss:$0 sm:$0xff] }
0x1f82   :  { %v4794_v53 = vadd.f32 %v3685_v51, %v2979_v52 }
0x1f84   :  { %v2992_v54 = vsel %vm292_vm1, %v4794_v53, 0.0 }
0x1f85   :  { %2993 = vadd.xlane.f32.xlu0 %v2992_v54  ;;  %v2947_v56 = vpop.f32.mrf.mxu1 }
0x1f86   :  { %v2977_v58 = vadd.f32 %v2976_v47, %v2947_v56 }
0x1f88   :  { %v2980_v60 = vadd.f32 %v2977_v58, %v4694_v19 }
0x1f8a   :  { %v4799_v62 = vadd.f32 %v3685_v51, %v2980_v60 }
0x1f8c   :  { %v2995_v15 = vsel %vm292_vm1, %v4799_v62, 0.0 }
0x1f8d   :  { %2996 = vadd.xlane.f32.xlu1 %v2995_v15 }
0x1ff8   :  { %v2994_v13 = vpop.xlane.xlu0 %2993 }
0x1ff9   :  { %v2998_v63 = vmul.f32 %v2994_v13, %v4175_v46 }
0x1ffb   :  { %v3000_v0 = vsub.f32 %v4794_v53, %v2998_v63 }
0x1ffd   :  { %v3002_v28 = vmul.f32 %v3000_v0, %v3000_v0 }
0x1fff   :  { %v3004_v1 = vsel %vm292_vm1, %v3002_v28, 0.0 }
0x2000   :  { %3005 = vadd.xlane.f32.xlu2 %v3004_v1  ;;  %v2997_v19 = vpop.xlane.xlu1 %2996 }
0x2001   :  { %v2999_v21 = vmul.f32 %v2997_v19, %v4175_v46 }
0x2003   :  { %v3001_v3 = vsub.f32 %v4799_v62, %v2999_v21 }
0x2005   :  { %v3003_v20 = vmul.f32 %v3001_v3, %v3001_v3 }
0x2007   :  { %v3007_v24 = vsel %vm292_vm1, %v3003_v20, 0.0 }
0x2008   :  { %3008 = vadd.xlane.f32.xlu0 %v3007_v24 }
0x2073   :  { %v3006_v8 = vpop.xlane.xlu2 %3005 }
0x2074   :  { %v3010_v9 = vmul.f32 %v3006_v8, %v4175_v46 }
0x2076   :  { %v3012_v2 = vadd.f32 1e-05, %v3010_v9 }
0x2078   :  { %3816 = vrsqrt.f32 %v3012_v2  ;;  %vm3020_vm8 = vweird.f32 %v3012_v2 }
0x207b   :  { %v3009_v10 = vpop.xlane.xlu0 %3008 }
0x207c   :  { %v3011_v11 = vmul.f32 %v3009_v10, %v4175_v46 }
0x207e   :  { %v3817_v12 = vpop.eup %3816  ;;  %v3013_v14 = vadd.f32 1e-05, %v3011_v11 }
0x207f   :  { %v3015_v16 = vmul.f32 %v3817_v12, %v3012_v2  ;;  %vm3021_vm4 = vweird.f32 %v3817_v12 }
0x2080   :  { %3818 = vrsqrt.f32 %v3013_v14  ;;  %vm3022_vm3 = vmor %vm3020_vm8, %vm3021_vm4  ;;  %vm3030_vm6 = vweird.f32 %v3013_v14 }
0x2081   :  { %v3016_v18 = vmul.f32 %v3817_v12, %v3015_v16 }
0x2083   :  { %v3017_v22 = vmul.f32 0.5, %v3016_v18 }
0x2085   :  { %v3018_v59 = vsub.f32 1.5, %v3017_v22 }
0x2086   :  { %v3819_v42 = vpop.eup %3818 }
0x2087   :  { %v3019_v23 = vmul.f32 %v3817_v12, %v3018_v59  ;;  %v3025_v25 = vmul.f32 %v3819_v42, %v3013_v14  ;;  %vm3031_vm5 = vweird.f32 %v3819_v42  ;;  %v3689_v59 = vld [vmem:[%s4931_s23 + $0x1] ss:$0 sm:$0xff] }
0x2088   :  { %vm3032_vm9 = vmor %vm3030_vm6, %vm3031_vm5 }
0x2089   :  { %v3023_v17 = vsel %vm3022_vm3, %v3817_v12, %v3019_v23  ;;  %v3026_v29 = vmul.f32 %v3819_v42, %v3025_v25 }
0x208a   :  { %v3034_v31 = vmul.f32 %v3023_v17, %v3000_v0 }
0x208b   :  { %v3027_v33 = vmul.f32 0.5, %v3026_v29 }
0x208c   :  { %v3039_v34 = vmul.f32 %v3686_v48, %v3034_v31 }
0x208d   :  { %v3028_v55 = vsub.f32 1.5, %v3027_v33 }
0x208e   :  { %v3044_v36 = vadd.f32 %v3687_v30, %v3039_v34 }
0x208f   :  { %v3029_v35 = vmul.f32 %v3819_v42, %v3028_v55 }
0x2090   :  { %3567 = vmatmul.msk.f32.vlgmr.msra.gmra.mxu3 %vm292_vm1, %v3044_v36 }
0x2091   :  { %v3033_v61 = vsel %vm3032_vm9, %v3819_v42, %v3029_v35 }
0x2092   :  { %v3035_v38 = vmul.f32 %v3033_v61, %v3001_v3 }
0x2094   :  { %v3040_v37 = vmul.f32 %v3686_v48, %v3035_v38  ;;  %v3219_v38 = vld [vmem:[%s4932_s1 + $0x18] sm:$0xff] }
0x2095   :  { %3235 = vmatpush.msrb.mxu1 %v3219_v38 }
0x2096   :  { %v3045_v39 = vadd.f32 %v3687_v30, %v3040_v37  ;;  %v3218_v37 = vld [vmem:[%s4932_s1 + $0x10] sm:$0xff] }
0x2097   :  { %3236 = vmatpush.msrb.mxu1 %v3218_v37 }
0x2098   :  { %3568 = vmatmul.msk.f32.gmra.mxu3 %vm292_vm1, %v3045_v39  ;;  %v3217_v39 = vld [vmem:[%s4932_s1 + $0x8] sm:$0xff] }
0x2099   :  { %3237 = vmatpush.msrb.mxu1 %v3217_v39 }
0x209b   :  { %3238 = vmatpush.msrb.mxu1 %v3216_v40 }
0x2113   :  { %v3079_v45 = vpop.f32.mrf.mxu3 }
0x2114   :  { %v3080_v50 = vadd.f32 %v3688_v43, %v3079_v45 }
0x2116   :  { %v3569_v51 = vmul.f32 -1.702, %v3080_v50 }
0x2118   :  { %v3089_v52 = vmul.f32 1.442695, %v3569_v51 }
0x211a   :  { %3820 = vpow2.f32 %v3089_v52  ;;  %v3691_v52 = vld [vmem:[%s4934_s25] ss:$0 sm:$0xff] }
0x211b   :  { %v3082_v54 = vpop.f32.mrf.mxu3 }
0x211c   :  { %v3083_v47 = vadd.f32 %v3688_v43, %v3082_v54 }
0x211e   :  { %v3570_v56 = vmul.f32 -1.702, %v3083_v47 }
0x2120   :  { %v3821_v58 = vpop.eup %3820  ;;  %v3091_v60 = vmul.f32 1.442695, %v3570_v56 }
0x2121   :  { %v3093_v15 = vadd.f32 1.0, %v3821_v58 }
0x2122   :  { %3822 = vpow2.f32 %v3091_v60 }
0x2123   :  { %3824 = vrcp.f32 %v3093_v15  ;;  %v3106_v19 = vand.u32 2147483648, %v3093_v15  ;;  %v3104_v3 = vand.u32 2147483647, %v3093_v15  ;;  %vm3100_vm11 = vweird.f32 %v3093_v15 }
0x2125   :  { %v3107_v4 = vor.u32 1.1754944e-38, %v3106_v19  ;;  %vm3105_vm14 = vcmp.eq.f32.partialorder %v3104_v3, 8.507059e+37 }
0x2128   :  { %v3823_v13 = vpop.eup %3822 }
0x2129   :  { %v3825_v63 = vpop.eup %3824  ;;  %v3094_v0 = vadd.f32 1.0, %v3823_v13 }
0x212a   :  { %v3096_v28 = vmul.f32 %v3825_v63, %v3093_v15  ;;  %vm3101_vm10 = vweird.f32 %v3825_v63 }
0x212b   :  { %3826 = vrcp.f32 %v3094_v0  ;;  %vm3102_vm12 = vmor %vm3100_vm11, %vm3101_vm10  ;;  %v3121_v2 = vand.u32 2147483648, %v3094_v0  ;;  %v3119_v11 = vand.u32 2147483647, %v3094_v0  ;;  %vm3115_vm7 = vweird.f32 %v3094_v0 }
0x212c   :  { %v3097_v1 = vsub.f32 1.0, %v3096_v28 }
0x212d   :  { %v3122_v14 = vor.u32 1.1754944e-38, %v3121_v2  ;;  %vm3120_vm8 = vcmp.eq.f32.partialorder %v3119_v11, 8.507059e+37 }
0x212e   :  { %v3098_v21 = vmul.f32 %v3825_v63, %v3097_v1 }
0x2130   :  { %v3099_v20 = vadd.f32 %v3825_v63, %v3098_v21 }
0x2131   :  { %v3827_v24 = vpop.eup %3826 }
0x2132   :  { %v3103_v5 = vsel %vm3102_vm12, %v3825_v63, %v3099_v20  ;;  %v3111_v6 = vmul.f32 %v3827_v24, %v3094_v0  ;;  %vm3116_vm15 = vweird.f32 %v3827_v24 }
0x2133   :  { %v3108_v7 = vsel %vm3105_vm14, %v3107_v4, %v3103_v5  ;;  %vm3117_vm4 = vmor %vm3115_vm7, %vm3116_vm15 }
0x2134   :  { %v3125_v8 = vmul.f32 %v3108_v7, %v3080_v50  ;;  %v3112_v9 = vsub.f32 1.0, %v3111_v6 }
0x2136   :  { %v3113_v10 = vmul.f32 %v3827_v24, %v3112_v9  ;;  %3580 = vmatmul.msk.f32.vlgmr.msrb.gmra.mxu0 %vm237_vm0, %v3125_v8 }
0x2138   :  { %v3114_v12 = vadd.f32 %v3827_v24, %v3113_v10 }
0x213a   :  { %v3118_v16 = vsel %vm3117_vm4, %v3827_v24, %v3114_v12 }
0x213b   :  { %v3123_v18 = vsel %vm3120_vm8, %v3122_v14, %v3118_v16 }
0x213c   :  { %v3126_v22 = vmul.f32 %v3123_v18, %v3083_v47 }
0x213e   :  { %3581 = vmatmul.msk.f32.gmra.mxu0 %vm237_vm0, %v3126_v22 }
0x21b3   :  { %v3164_v42 = vpop.f32.mrf.mxu0 }
0x21b4   :  { %v3165_v23 = vadd.f32 %v3689_v59, %v3164_v42 }
0x21b6   :  { %v3170_v25 = vadd.f32 %v3165_v23, %v4794_v53 }
0x21b8   :  { %3172 = vst.msk [vmem:[#allocation2] sm:$0xff] %vm292_vm1, %v3170_v25 }
0x21bb   :  { %v3167_v48 = vpop.f32.mrf.mxu0 }
0x21bc   :  { %v3168_v17 = vadd.f32 %v3689_v59, %v3167_v48 }
0x21be   :  { %v3171_v29 = vadd.f32 %v3168_v17, %v4799_v62 }
0x21c0   :  { %3173 = vst.msk [vmem:[#allocation2 + $0x8] sm:$0xff] %vm292_vm1, %v3171_v29 }
0x21c7   :  { %v3179_v30 = vld [vmem:[%s3178_s0] sm:$0x1] }
0x21c8   :  { %v3181_v31 = vrot.slane %v3179_v30, 7  ;;  %v3176_v33 = vld [vmem:[%s3175_s5] sm:$0x1] }
0x21ca   :  { %v3183_v53 = vsel %vm1740_vm13, %v3176_v33, %v3181_v31 }
0x21cb   :  { %v3186_v34 = vsel %vm296_vm2, %v3183_v53, 0.0 }
0x21cc   :  { %3187 = vadd.xlane.f32.xlu1 %v3186_v34 }
0x223f   :  { %v3188_v55 = vpop.xlane.xlu1 %3187 }
0x2240   :  { %v3189_v62 = vmul.f32 %v3188_v55, %v4175_v46 }
0x2242   :  { %v3190_v36 = vsub.f32 %v3183_v53, %v3189_v62 }
0x2244   :  { %v3191_v35 = vmul.f32 %v3190_v36, %v3190_v36 }
0x2246   :  { %v3192_v61 = vsel %vm296_vm2, %v3191_v35, 0.0 }
0x2247   :  { %3193 = vadd.xlane.f32.xlu2 %v3192_v61 }
0x22ba   :  { %v3194_v41 = vpop.xlane.xlu2 %3193 }
0x22bb   :  { %v3195_v57 = vmul.f32 %v3194_v41, %v4175_v46 }
0x22bd   :  { %v3196_v32 = vadd.f32 1e-05, %v3195_v57 }
0x22bf   :  { %3828 = vrsqrt.f32 %v3196_v32  ;;  %vm3203_vm2 = vweird.f32 %v3196_v32 }
0x22c5   :  { %v3829_v26 = vpop.eup %3828 }
0x22c6   :  { %v3198_v43 = vmul.f32 %v3829_v26, %v3196_v32  ;;  %vm3204_vm0 = vweird.f32 %v3829_v26 }
0x22c7   :  { %vm3205_vm13 = vmor %vm3203_vm2, %vm3204_vm0 }
0x22c8   :  { %v3199_v44 = vmul.f32 %v3829_v26, %v3198_v43 }
0x22ca   :  { %v3200_v45 = vmul.f32 0.5, %v3199_v44 }
0x22cc   :  { %v3201_v49 = vsub.f32 1.5, %v3200_v45 }
0x22ce   :  { %v3202_v50 = vmul.f32 %v3829_v26, %v3201_v49 }
0x22d0   :  { %v3206_v51 = vsel %vm3205_vm13, %v3829_v26, %v3202_v50 }
0x22d1   :  { %v3207_v54 = vmul.f32 %v3206_v51, %v3190_v36 }
0x22d3   :  { %v3211_v47 = vmul.f32 %v3690_v27, %v3207_v54 }
0x22d5   :  { %v3215_v56 = vadd.f32 %v3691_v52, %v3211_v47 }
0x22d7   :  { %3583 = vmatmul.msk.f32.vlgmr.msrb.gmra.mxu1 %vm292_vm1, %v3215_v56 }
0x2354   :  { %v3240_v46 = vpop.f32.mrf.mxu1 }
0x2355   :  { %3584 = vst [vmem:[%s4136_s19 + $0x2] sm:$0x3] %v3240_v46 }
0x2356   :  { %3249 = vsyncpa [#allocation4], 1 }

</bundles_post_ra>
